<compile_context>
chip_gen: v6e
topology: v6e:2x2x1
jax: 0.10.0
libtpu: 0.0.40
codegen_flags: <defaults>
</compile_context>

<pallas_src>
import math

import jax
import jax.numpy as jnp
from jax import lax
from jax.experimental import pallas as pl
from jax.experimental.pallas import tpu as pltpu


_VMEM = pl.BlockSpec(memory_space=pltpu.MemorySpace.VMEM)


# -----------------------------------------------------------------------------
# Fused Pallas kernel: 3 feature layers + 2 fused (adv|val) layers + dueling head
# -----------------------------------------------------------------------------
def _make_fused_kernel(T, Bp, H, in_dim, out_dim):
    H2 = 2 * H

    def run_layer(x_seq, w_ih, w_hh, b, width, collect_seq):
        """One LSTM layer (possibly two branch LSTMs fused block-diagonally).

        x_seq : (T*Bp, din) value; row t*Bp + r = (timestep t, batch row r)
        w_ih  : (din, 4*width), w_hh : (width, 4*width), b : (1, 4*width)
        Gate order [i, f, g, o], each `width` wide (for fused layers each gate
        block is itself [gate_adv | gate_val]).
        """
        # Hoisted input projection + bias: one big MXU matmul, off the serial
        # recurrent critical path.
        pre = jnp.dot(x_seq, w_ih, preferred_element_type=jnp.float32) + b

        h = jnp.zeros((Bp, width), jnp.float32)
        c = jnp.zeros((Bp, width), jnp.float32)
        hs = []
        for t in range(T):  # fully unrolled; Bp == 8 -> slices are whole vregs
            gates = pre[t * Bp:(t + 1) * Bp, :] + jnp.dot(
                h, w_hh, preferred_element_type=jnp.float32)
            sg = jax.nn.sigmoid(gates)  # one full-width transcendental
            th = jnp.tanh(gates)        # one full-width transcendental
            i = sg[:, 0 * width:1 * width]
            f = sg[:, 1 * width:2 * width]
            g = th[:, 2 * width:3 * width]
            o = sg[:, 3 * width:4 * width]
            c = f * c + i * g
            h = o * jnp.tanh(c)
            if collect_seq:
                hs.append(h)
        seq = jnp.concatenate(hs, axis=0) if collect_seq else None
        return seq, h

    def kernel(x_ref, wih_ref, whh_ref, b_ref, whead_ref, bhead_ref, q_ref):
        # ---- shared feature stack: 3 plain LSTM layers of width H ------------
        seq = x_ref[...]
        for l in range(3):
            din = in_dim if l == 0 else H
            w_ih = wih_ref[l, :din, :4 * H]
            w_hh = whh_ref[l, :H, :4 * H]
            b = b_ref[l:l + 1, :4 * H]
            seq, _ = run_layer(seq, w_ih, w_hh, b, H, collect_seq=True)

        # ---- advantage + value branches fused block-diagonally (width 2H) ----
        # level 1: both branches read the same feature sequence
        seq, _ = run_layer(seq, wih_ref[3, :H, :], whh_ref[3, :H2, :],
                           b_ref[3:4, :], H2, collect_seq=True)
        # level 2: block-diagonal W_ih and W_hh; only the last h is needed
        _, h_last = run_layer(seq, wih_ref[4, :H2, :], whh_ref[4, :H2, :],
                              b_ref[4:5, :], H2, collect_seq=False)

        # ---- dueling head: block-diag [wa | wv], Q = V + A - mean(A) ----------
        head = jnp.dot(h_last, whead_ref[...],
                       preferred_element_type=jnp.float32) + bhead_ref[...]
        adv = head[:, :out_dim]
        val = head[:, out_dim:]
        q_ref[...] = val + adv - jnp.mean(adv, axis=1, keepdims=True)

    return kernel


# -----------------------------------------------------------------------------
# Weight packing helpers (pure JAX, run in the wrapper)
# -----------------------------------------------------------------------------
def _interleave_gates(a, v, H):
    """(din,4H),(din,4H) -> (din,8H) with columns [i_a,i_v,f_a,f_v,g_a,g_v,o_a,o_v]."""
    cols = []
    for k in range(4):
        cols.append(a[:, k * H:(k + 1) * H])
        cols.append(v[:, k * H:(k + 1) * H])
    return jnp.concatenate(cols, axis=1)


def _blockdiag_gates(a, v, H):
    """Block-diagonal fusion: rows 0:H act on the adv half of the input, rows
    H:2H on the val half; gate columns interleaved as in _interleave_gates."""
    top = _interleave_gates(a, jnp.zeros_like(a), H)
    bot = _interleave_gates(jnp.zeros_like(v), v, H)
    return jnp.concatenate([top, bot], axis=0)


# -----------------------------------------------------------------------------
# Wrapper: one pallas_call for the whole forward pass.
# -----------------------------------------------------------------------------
def lstm_dueling_forward(x, feat_params, adv_params, adv_proj, val_params, val_proj):
    """x: (B, T, in_dim) batch-first, like the PyTorch module. Returns (B, out_dim)."""
    B, T, in_dim = x.shape
    H = feat_params[0][1].shape[0]
    H2 = 2 * H
    wa, ba = adv_proj
    wv, bv = val_proj
    out_dim = wa.shape[1]
    Bp = 8  # pad batch to one full sublane group

    # Time-major flatten + zero-pad the batch (padded rows are discarded later).
    x_f32 = x.astype(jnp.float32)
    x_pad = jnp.pad(x_f32, ((0, Bp - B), (0, 0), (0, 0)))
    x_tm = jnp.transpose(x_pad, (1, 0, 2)).reshape(T * Bp, in_dim)

    # Fuse the two head branches block-diagonally into 2 double-width layers.
    layers = list(feat_params)
    (a0_ih, a0_hh, a0_b), (a1_ih, a1_hh, a1_b) = adv_params
    (v0_ih, v0_hh, v0_b), (v1_ih, v1_hh, v1_b) = val_params
    layers.append((_interleave_gates(a0_ih, v0_ih, H),
                   _blockdiag_gates(a0_hh, v0_hh, H),
                   _interleave_gates(a0_b, v0_b, H)))
    layers.append((_blockdiag_gates(a1_ih, v1_ih, H),
                   _blockdiag_gates(a1_hh, v1_hh, H),
                   _interleave_gates(a1_b, v1_b, H)))

    # Pack into 3 stacked tensors -> 6 input DMAs total instead of ~26.
    maxd, maxg = H2, 8 * H

    def pad2(m, rows, cols):
        r, c = m.shape
        return jnp.pad(m, ((0, rows - r), (0, cols - c)))

    wih_stack = jnp.stack([pad2(w_ih, maxd, maxg) for (w_ih, _, _) in layers])  # (5,64,256)
    whh_stack = jnp.stack([pad2(w_hh, maxd, maxg) for (_, w_hh, _) in layers])  # (5,64,256)
    b_stack = jnp.stack([pad2(b, 1, maxg)[0] for (_, _, b) in layers])          # (5,256)

    # Block-diagonal dueling head: [adv | val] columns.
    w_head = jnp.zeros((H2, 2 * out_dim), jnp.float32)
    w_head = w_head.at[:H, :out_dim].set(wa).at[H:, out_dim:].set(wv)
    b_head = jnp.concatenate([ba, bv], axis=1)  # (1, 2*out_dim)

    kernel = _make_fused_kernel(T, Bp, H, in_dim, out_dim)
    q_pad = pl.pallas_call(
        kernel,
        out_shape=jax.ShapeDtypeStruct((Bp, out_dim), jnp.float32),
        in_specs=[_VMEM] * 6,
        out_specs=_VMEM,
        cost_estimate=pl.CostEstimate(
            flops=10_100_000, transcendentals=130_000, bytes_accessed=700_000),
    )(x_tm, wih_stack, whh_stack, b_stack, w_head, b_head)
    return q_pad[:B]


# -----------------------------------------------------------------------------
# Parameter init (deterministic, mimics PyTorch uniform(-1/sqrt(H), 1/sqrt(H)))
# -----------------------------------------------------------------------------
def init_lstm_stack(key, num_layers, in_dim, hidden):
    params = []
    bound = 1.0 / math.sqrt(hidden)
    for layer in range(num_layers):
        din = in_dim if layer == 0 else hidden
        key, k1, k2, k3, k4 = jax.random.split(key, 5)
        w_ih = jax.random.uniform(k1, (din, 4 * hidden), jnp.float32, -bound, bound)
        w_hh = jax.random.uniform(k2, (hidden, 4 * hidden), jnp.float32, -bound, bound)
        b_ih = jax.random.uniform(k3, (4 * hidden,), jnp.float32, -bound, bound)
        b_hh = jax.random.uniform(k4, (4 * hidden,), jnp.float32, -bound, bound)
        params.append((w_ih, w_hh, (b_ih + b_hh).reshape(1, 4 * hidden)))
    return key, params


def init_linear(key, in_dim, out_dim):
    bound = 1.0 / math.sqrt(in_dim)
    key, k1, k2 = jax.random.split(key, 3)
    w = jax.random.uniform(k1, (in_dim, out_dim), jnp.float32, -bound, bound)
    b = jax.random.uniform(k2, (1, out_dim), jnp.float32, -bound, bound)
    return key, (w, b)


# -----------------------------------------------------------------------------
# Pure-JAX reference (correctness check, uses the original unfused params)
# -----------------------------------------------------------------------------
def _lstm_layer_ref(x_tm, w_ih, w_hh, b):
    T, B, _ = x_tm.shape
    H = w_hh.shape[0]

    def step(carry, x_t):
        h, c = carry
        gates = x_t @ w_ih + h @ w_hh + b
        i = jax.nn.sigmoid(gates[:, 0 * H:1 * H])
        f = jax.nn.sigmoid(gates[:, 1 * H:2 * H])
        g = jnp.tanh(gates[:, 2 * H:3 * H])
        o = jax.nn.sigmoid(gates[:, 3 * H:4 * H])
        c = f * c + i * g
        h = o * jnp.tanh(c)
        return (h, c), h

    init = (jnp.zeros((B, H), jnp.float32), jnp.zeros((B, H), jnp.float32))
    _, ys = lax.scan(step, init, x_tm)
    return ys


def _forward_ref(x, feat_params, adv_params, adv_proj, val_params, val_proj):
    x_tm = jnp.transpose(x, (1, 0, 2)).astype(jnp.float32)
    f = x_tm
    for p in feat_params:
        f = _lstm_layer_ref(f, *p)
    a = f
    for p in adv_params:
        a = _lstm_layer_ref(a, *p)
    v = f
    for p in val_params:
        v = _lstm_layer_ref(v, *p)
    wa, ba = adv_proj
    wv, bv = val_proj
    adv = a[-1] @ wa + ba
    val = v[-1] @ wv + bv
    return val + adv - jnp.mean(adv, axis=1, keepdims=True)


# -----------------------------------------------------------------------------
if __name__ == "__main__":
    B, T, in_dim, hidden, out_dim = 2, 8, 4, 32, 4

    key = jax.random.PRNGKey(0)
    key, feat_params = init_lstm_stack(key, 3, in_dim, hidden)   # feature_layer
    key, adv_params = init_lstm_stack(key, 2, hidden, hidden)    # advantage LSTM
    key, adv_proj = init_linear(key, hidden, out_dim)            # advantage_projection
    key, val_params = init_lstm_stack(key, 2, hidden, hidden)    # value LSTM
    key, val_proj = init_linear(key, hidden, out_dim)            # value_projection

    key, kx = jax.random.split(key)
    x = jax.random.normal(kx, (B, T, in_dim), jnp.float32)

    q = lstm_dueling_forward(x, feat_params, adv_params, adv_proj, val_params, val_proj)
    q = jax.block_until_ready(q)

    q_ref = _forward_ref(x, feat_params, adv_params, adv_proj, val_params, val_proj)
    assert q.shape == (B, out_dim)
    assert jnp.allclose(q, q_ref, atol=2e-4, rtol=1e-4), "mismatch vs pure-JAX reference"

    print("KERNEL_OK")
</pallas_src>

<mosaic_0001>
module attributes {stable_mosaic.version = 11 : i64} {
  func.func @kernel(%arg0: memref<64x4xf32, #tpu.memory_space<vmem>>, %arg1: memref<5x64x256xf32, #tpu.memory_space<vmem>>, %arg2: memref<5x64x256xf32, #tpu.memory_space<vmem>>, %arg3: memref<5x256xf32, #tpu.memory_space<vmem>>, %arg4: memref<64x8xf32, #tpu.memory_space<vmem>>, %arg5: memref<1x8xf32, #tpu.memory_space<vmem>>, %arg6: memref<8x4xf32, #tpu.memory_space<vmem>>) attributes {dimension_semantics = [], scalar_prefetch = 0 : i64, scratch_operands = 0 : i64, tpu.core_type = #tpu.core_type<tc>} {
    %c0 = arith.constant 0 : index
    %c0_0 = arith.constant 0 : index
    %0 = vector.load %arg0[%c0, %c0_0] : memref<64x4xf32, #tpu.memory_space<vmem>>, vector<64x4xf32>
    %c0_1 = arith.constant 0 : index
    %c0_2 = arith.constant 0 : index
    %c0_3 = arith.constant 0 : index
    %1 = vector.load %arg1[%c0_1, %c0_2, %c0_3] : memref<5x64x256xf32, #tpu.memory_space<vmem>>, vector<1x4x128xf32>
    %2 = vector.shape_cast %1 : vector<1x4x128xf32> to vector<4x128xf32>
    %c0_4 = arith.constant 0 : index
    %c0_5 = arith.constant 0 : index
    %c0_6 = arith.constant 0 : index
    %3 = vector.load %arg2[%c0_4, %c0_5, %c0_6] : memref<5x64x256xf32, #tpu.memory_space<vmem>>, vector<1x32x128xf32>
    %4 = vector.shape_cast %3 : vector<1x32x128xf32> to vector<32x128xf32>
    %c0_7 = arith.constant 0 : index
    %c0_8 = arith.constant 0 : index
    %5 = vector.load %arg3[%c0_7, %c0_8] : memref<5x256xf32, #tpu.memory_space<vmem>>, vector<1x128xf32>
    %cst = arith.constant dense<0.000000e+00> : vector<64x128xf32>
    %6 = tpu.matmul %0, %2, %cst {dimension_numbers = #tpu.dot_dimension_numbers<[1], [0], [0], [1], [0, 0, 1, 1], [], []>} : vector<64x4xf32>, vector<4x128xf32>, vector<64x128xf32> -> vector<64x128xf32>
    %7 = vector.broadcast %5 : vector<1x128xf32> to vector<64x128xf32>
    %8 = arith.addf %6, %7 : vector<64x128xf32>
    %cst_9 = arith.constant 0.000000e+00 : f32
    %9 = vector.broadcast %cst_9 : f32 to vector<8x32xf32>
    %cst_10 = arith.constant 0.000000e+00 : f32
    %10 = vector.broadcast %cst_10 : f32 to vector<8x32xf32>
    %11 = vector.extract_strided_slice %8 {offsets = [0, 0], sizes = [8, 128], strides = [1, 1]} : vector<64x128xf32> to vector<8x128xf32>
    %cst_11 = arith.constant dense<0.000000e+00> : vector<8x128xf32>
    %12 = tpu.matmul %9, %4, %cst_11 {dimension_numbers = #tpu.dot_dimension_numbers<[1], [0], [0], [1], [0, 0, 1, 1], [], []>} : vector<8x32xf32>, vector<32x128xf32>, vector<8x128xf32> -> vector<8x128xf32>
    %13 = arith.addf %11, %12 : vector<8x128xf32>
    %14 = arith.negf %13 : vector<8x128xf32>
    %15 = math.exp %14 : vector<8x128xf32>
    %cst_12 = arith.constant 1.000000e+00 : f32
    %16 = vector.broadcast %cst_12 : f32 to vector<8x128xf32>
    %17 = arith.addf %16, %15 : vector<8x128xf32>
    %18 = arith.divf %16, %17 : vector<8x128xf32>
    %19 = math.tanh %13 : vector<8x128xf32>
    %20 = vector.extract_strided_slice %18 {offsets = [0, 0], sizes = [8, 32], strides = [1, 1]} : vector<8x128xf32> to vector<8x32xf32>
    %21 = vector.extract_strided_slice %18 {offsets = [0, 32], sizes = [8, 32], strides = [1, 1]} : vector<8x128xf32> to vector<8x32xf32>
    %22 = vector.extract_strided_slice %19 {offsets = [0, 64], sizes = [8, 32], strides = [1, 1]} : vector<8x128xf32> to vector<8x32xf32>
    %23 = vector.extract_strided_slice %18 {offsets = [0, 96], sizes = [8, 32], strides = [1, 1]} : vector<8x128xf32> to vector<8x32xf32>
    %24 = arith.mulf %21, %10 : vector<8x32xf32>
    %25 = arith.mulf %20, %22 : vector<8x32xf32>
    %26 = arith.addf %24, %25 : vector<8x32xf32>
    %27 = math.tanh %26 : vector<8x32xf32>
    %28 = arith.mulf %23, %27 : vector<8x32xf32>
    %29 = vector.extract_strided_slice %8 {offsets = [8, 0], sizes = [8, 128], strides = [1, 1]} : vector<64x128xf32> to vector<8x128xf32>
    %cst_13 = arith.constant dense<0.000000e+00> : vector<8x128xf32>
    %30 = tpu.matmul %28, %4, %cst_13 {dimension_numbers = #tpu.dot_dimension_numbers<[1], [0], [0], [1], [0, 0, 1, 1], [], []>} : vector<8x32xf32>, vector<32x128xf32>, vector<8x128xf32> -> vector<8x128xf32>
    %31 = arith.addf %29, %30 : vector<8x128xf32>
    %32 = arith.negf %31 : vector<8x128xf32>
    %33 = math.exp %32 : vector<8x128xf32>
    %cst_14 = arith.constant 1.000000e+00 : f32
    %34 = vector.broadcast %cst_14 : f32 to vector<8x128xf32>
    %35 = arith.addf %34, %33 : vector<8x128xf32>
    %36 = arith.divf %34, %35 : vector<8x128xf32>
    %37 = math.tanh %31 : vector<8x128xf32>
    %38 = vector.extract_strided_slice %36 {offsets = [0, 0], sizes = [8, 32], strides = [1, 1]} : vector<8x128xf32> to vector<8x32xf32>
    %39 = vector.extract_strided_slice %36 {offsets = [0, 32], sizes = [8, 32], strides = [1, 1]} : vector<8x128xf32> to vector<8x32xf32>
    %40 = vector.extract_strided_slice %37 {offsets = [0, 64], sizes = [8, 32], strides = [1, 1]} : vector<8x128xf32> to vector<8x32xf32>
    %41 = vector.extract_strided_slice %36 {offsets = [0, 96], sizes = [8, 32], strides = [1, 1]} : vector<8x128xf32> to vector<8x32xf32>
    %42 = arith.mulf %39, %26 : vector<8x32xf32>
    %43 = arith.mulf %38, %40 : vector<8x32xf32>
    %44 = arith.addf %42, %43 : vector<8x32xf32>
    %45 = math.tanh %44 : vector<8x32xf32>
    %46 = arith.mulf %41, %45 : vector<8x32xf32>
    %47 = vector.extract_strided_slice %8 {offsets = [16, 0], sizes = [8, 128], strides = [1, 1]} : vector<64x128xf32> to vector<8x128xf32>
    %cst_15 = arith.constant dense<0.000000e+00> : vector<8x128xf32>
    %48 = tpu.matmul %46, %4, %cst_15 {dimension_numbers = #tpu.dot_dimension_numbers<[1], [0], [0], [1], [0, 0, 1, 1], [], []>} : vector<8x32xf32>, vector<32x128xf32>, vector<8x128xf32> -> vector<8x128xf32>
    %49 = arith.addf %47, %48 : vector<8x128xf32>
    %50 = arith.negf %49 : vector<8x128xf32>
    %51 = math.exp %50 : vector<8x128xf32>
    %cst_16 = arith.constant 1.000000e+00 : f32
    %52 = vector.broadcast %cst_16 : f32 to vector<8x128xf32>
    %53 = arith.addf %52, %51 : vector<8x128xf32>
    %54 = arith.divf %52, %53 : vector<8x128xf32>
    %55 = math.tanh %49 : vector<8x128xf32>
    %56 = vector.extract_strided_slice %54 {offsets = [0, 0], sizes = [8, 32], strides = [1, 1]} : vector<8x128xf32> to vector<8x32xf32>
    %57 = vector.extract_strided_slice %54 {offsets = [0, 32], sizes = [8, 32], strides = [1, 1]} : vector<8x128xf32> to vector<8x32xf32>
    %58 = vector.extract_strided_slice %55 {offsets = [0, 64], sizes = [8, 32], strides = [1, 1]} : vector<8x128xf32> to vector<8x32xf32>
    %59 = vector.extract_strided_slice %54 {offsets = [0, 96], sizes = [8, 32], strides = [1, 1]} : vector<8x128xf32> to vector<8x32xf32>
    %60 = arith.mulf %57, %44 : vector<8x32xf32>
    %61 = arith.mulf %56, %58 : vector<8x32xf32>
    %62 = arith.addf %60, %61 : vector<8x32xf32>
    %63 = math.tanh %62 : vector<8x32xf32>
    %64 = arith.mulf %59, %63 : vector<8x32xf32>
    %65 = vector.extract_strided_slice %8 {offsets = [24, 0], sizes = [8, 128], strides = [1, 1]} : vector<64x128xf32> to vector<8x128xf32>
    %cst_17 = arith.constant dense<0.000000e+00> : vector<8x128xf32>
    %66 = tpu.matmul %64, %4, %cst_17 {dimension_numbers = #tpu.dot_dimension_numbers<[1], [0], [0], [1], [0, 0, 1, 1], [], []>} : vector<8x32xf32>, vector<32x128xf32>, vector<8x128xf32> -> vector<8x128xf32>
    %67 = arith.addf %65, %66 : vector<8x128xf32>
    %68 = arith.negf %67 : vector<8x128xf32>
    %69 = math.exp %68 : vector<8x128xf32>
    %cst_18 = arith.constant 1.000000e+00 : f32
    %70 = vector.broadcast %cst_18 : f32 to vector<8x128xf32>
    %71 = arith.addf %70, %69 : vector<8x128xf32>
    %72 = arith.divf %70, %71 : vector<8x128xf32>
    %73 = math.tanh %67 : vector<8x128xf32>
    %74 = vector.extract_strided_slice %72 {offsets = [0, 0], sizes = [8, 32], strides = [1, 1]} : vector<8x128xf32> to vector<8x32xf32>
    %75 = vector.extract_strided_slice %72 {offsets = [0, 32], sizes = [8, 32], strides = [1, 1]} : vector<8x128xf32> to vector<8x32xf32>
    %76 = vector.extract_strided_slice %73 {offsets = [0, 64], sizes = [8, 32], strides = [1, 1]} : vector<8x128xf32> to vector<8x32xf32>
    %77 = vector.extract_strided_slice %72 {offsets = [0, 96], sizes = [8, 32], strides = [1, 1]} : vector<8x128xf32> to vector<8x32xf32>
    %78 = arith.mulf %75, %62 : vector<8x32xf32>
    %79 = arith.mulf %74, %76 : vector<8x32xf32>
    %80 = arith.addf %78, %79 : vector<8x32xf32>
    %81 = math.tanh %80 : vector<8x32xf32>
    %82 = arith.mulf %77, %81 : vector<8x32xf32>
    %83 = vector.extract_strided_slice %8 {offsets = [32, 0], sizes = [8, 128], strides = [1, 1]} : vector<64x128xf32> to vector<8x128xf32>
    %cst_19 = arith.constant dense<0.000000e+00> : vector<8x128xf32>
    %84 = tpu.matmul %82, %4, %cst_19 {dimension_numbers = #tpu.dot_dimension_numbers<[1], [0], [0], [1], [0, 0, 1, 1], [], []>} : vector<8x32xf32>, vector<32x128xf32>, vector<8x128xf32> -> vector<8x128xf32>
    %85 = arith.addf %83, %84 : vector<8x128xf32>
    %86 = arith.negf %85 : vector<8x128xf32>
    %87 = math.exp %86 : vector<8x128xf32>
    %cst_20 = arith.constant 1.000000e+00 : f32
    %88 = vector.broadcast %cst_20 : f32 to vector<8x128xf32>
    %89 = arith.addf %88, %87 : vector<8x128xf32>
    %90 = arith.divf %88, %89 : vector<8x128xf32>
    %91 = math.tanh %85 : vector<8x128xf32>
    %92 = vector.extract_strided_slice %90 {offsets = [0, 0], sizes = [8, 32], strides = [1, 1]} : vector<8x128xf32> to vector<8x32xf32>
    %93 = vector.extract_strided_slice %90 {offsets = [0, 32], sizes = [8, 32], strides = [1, 1]} : vector<8x128xf32> to vector<8x32xf32>
    %94 = vector.extract_strided_slice %91 {offsets = [0, 64], sizes = [8, 32], strides = [1, 1]} : vector<8x128xf32> to vector<8x32xf32>
    %95 = vector.extract_strided_slice %90 {offsets = [0, 96], sizes = [8, 32], strides = [1, 1]} : vector<8x128xf32> to vector<8x32xf32>
    %96 = arith.mulf %93, %80 : vector<8x32xf32>
    %97 = arith.mulf %92, %94 : vector<8x32xf32>
    %98 = arith.addf %96, %97 : vector<8x32xf32>
    %99 = math.tanh %98 : vector<8x32xf32>
    %100 = arith.mulf %95, %99 : vector<8x32xf32>
    %101 = vector.extract_strided_slice %8 {offsets = [40, 0], sizes = [8, 128], strides = [1, 1]} : vector<64x128xf32> to vector<8x128xf32>
    %cst_21 = arith.constant dense<0.000000e+00> : vector<8x128xf32>
    %102 = tpu.matmul %100, %4, %cst_21 {dimension_numbers = #tpu.dot_dimension_numbers<[1], [0], [0], [1], [0, 0, 1, 1], [], []>} : vector<8x32xf32>, vector<32x128xf32>, vector<8x128xf32> -> vector<8x128xf32>
    %103 = arith.addf %101, %102 : vector<8x128xf32>
    %104 = arith.negf %103 : vector<8x128xf32>
    %105 = math.exp %104 : vector<8x128xf32>
    %cst_22 = arith.constant 1.000000e+00 : f32
    %106 = vector.broadcast %cst_22 : f32 to vector<8x128xf32>
    %107 = arith.addf %106, %105 : vector<8x128xf32>
    %108 = arith.divf %106, %107 : vector<8x128xf32>
    %109 = math.tanh %103 : vector<8x128xf32>
    %110 = vector.extract_strided_slice %108 {offsets = [0, 0], sizes = [8, 32], strides = [1, 1]} : vector<8x128xf32> to vector<8x32xf32>
    %111 = vector.extract_strided_slice %108 {offsets = [0, 32], sizes = [8, 32], strides = [1, 1]} : vector<8x128xf32> to vector<8x32xf32>
    %112 = vector.extract_strided_slice %109 {offsets = [0, 64], sizes = [8, 32], strides = [1, 1]} : vector<8x128xf32> to vector<8x32xf32>
    %113 = vector.extract_strided_slice %108 {offsets = [0, 96], sizes = [8, 32], strides = [1, 1]} : vector<8x128xf32> to vector<8x32xf32>
    %114 = arith.mulf %111, %98 : vector<8x32xf32>
    %115 = arith.mulf %110, %112 : vector<8x32xf32>
    %116 = arith.addf %114, %115 : vector<8x32xf32>
    %117 = math.tanh %116 : vector<8x32xf32>
    %118 = arith.mulf %113, %117 : vector<8x32xf32>
    %119 = vector.extract_strided_slice %8 {offsets = [48, 0], sizes = [8, 128], strides = [1, 1]} : vector<64x128xf32> to vector<8x128xf32>
    %cst_23 = arith.constant dense<0.000000e+00> : vector<8x128xf32>
    %120 = tpu.matmul %118, %4, %cst_23 {dimension_numbers = #tpu.dot_dimension_numbers<[1], [0], [0], [1], [0, 0, 1, 1], [], []>} : vector<8x32xf32>, vector<32x128xf32>, vector<8x128xf32> -> vector<8x128xf32>
    %121 = arith.addf %119, %120 : vector<8x128xf32>
    %122 = arith.negf %121 : vector<8x128xf32>
    %123 = math.exp %122 : vector<8x128xf32>
    %cst_24 = arith.constant 1.000000e+00 : f32
    %124 = vector.broadcast %cst_24 : f32 to vector<8x128xf32>
    %125 = arith.addf %124, %123 : vector<8x128xf32>
    %126 = arith.divf %124, %125 : vector<8x128xf32>
    %127 = math.tanh %121 : vector<8x128xf32>
    %128 = vector.extract_strided_slice %126 {offsets = [0, 0], sizes = [8, 32], strides = [1, 1]} : vector<8x128xf32> to vector<8x32xf32>
    %129 = vector.extract_strided_slice %126 {offsets = [0, 32], sizes = [8, 32], strides = [1, 1]} : vector<8x128xf32> to vector<8x32xf32>
    %130 = vector.extract_strided_slice %127 {offsets = [0, 64], sizes = [8, 32], strides = [1, 1]} : vector<8x128xf32> to vector<8x32xf32>
    %131 = vector.extract_strided_slice %126 {offsets = [0, 96], sizes = [8, 32], strides = [1, 1]} : vector<8x128xf32> to vector<8x32xf32>
    %132 = arith.mulf %129, %116 : vector<8x32xf32>
    %133 = arith.mulf %128, %130 : vector<8x32xf32>
    %134 = arith.addf %132, %133 : vector<8x32xf32>
    %135 = math.tanh %134 : vector<8x32xf32>
    %136 = arith.mulf %131, %135 : vector<8x32xf32>
    %137 = vector.extract_strided_slice %8 {offsets = [56, 0], sizes = [8, 128], strides = [1, 1]} : vector<64x128xf32> to vector<8x128xf32>
    %cst_25 = arith.constant dense<0.000000e+00> : vector<8x128xf32>
    %138 = tpu.matmul %136, %4, %cst_25 {dimension_numbers = #tpu.dot_dimension_numbers<[1], [0], [0], [1], [0, 0, 1, 1], [], []>} : vector<8x32xf32>, vector<32x128xf32>, vector<8x128xf32> -> vector<8x128xf32>
    %139 = arith.addf %137, %138 : vector<8x128xf32>
    %140 = arith.negf %139 : vector<8x128xf32>
    %141 = math.exp %140 : vector<8x128xf32>
    %cst_26 = arith.constant 1.000000e+00 : f32
    %142 = vector.broadcast %cst_26 : f32 to vector<8x128xf32>
    %143 = arith.addf %142, %141 : vector<8x128xf32>
    %144 = arith.divf %142, %143 : vector<8x128xf32>
    %145 = math.tanh %139 : vector<8x128xf32>
    %146 = vector.extract_strided_slice %144 {offsets = [0, 0], sizes = [8, 32], strides = [1, 1]} : vector<8x128xf32> to vector<8x32xf32>
    %147 = vector.extract_strided_slice %144 {offsets = [0, 32], sizes = [8, 32], strides = [1, 1]} : vector<8x128xf32> to vector<8x32xf32>
    %148 = vector.extract_strided_slice %145 {offsets = [0, 64], sizes = [8, 32], strides = [1, 1]} : vector<8x128xf32> to vector<8x32xf32>
    %149 = vector.extract_strided_slice %144 {offsets = [0, 96], sizes = [8, 32], strides = [1, 1]} : vector<8x128xf32> to vector<8x32xf32>
    %150 = arith.mulf %147, %134 : vector<8x32xf32>
    %151 = arith.mulf %146, %148 : vector<8x32xf32>
    %152 = arith.addf %150, %151 : vector<8x32xf32>
    %153 = math.tanh %152 : vector<8x32xf32>
    %154 = arith.mulf %149, %153 : vector<8x32xf32>
    %155 = tpu.concatenate %28, %46, %64, %82, %100, %118, %136, %154 in 0 : vector<8x32xf32>, vector<8x32xf32>, vector<8x32xf32>, vector<8x32xf32>, vector<8x32xf32>, vector<8x32xf32>, vector<8x32xf32>, vector<8x32xf32> -> vector<64x32xf32>
    %c1 = arith.constant 1 : index
    %c0_27 = arith.constant 0 : index
    %c0_28 = arith.constant 0 : index
    %156 = vector.load %arg1[%c1, %c0_27, %c0_28] : memref<5x64x256xf32, #tpu.memory_space<vmem>>, vector<1x32x128xf32>
    %157 = vector.shape_cast %156 : vector<1x32x128xf32> to vector<32x128xf32>
    %c1_29 = arith.constant 1 : index
    %c0_30 = arith.constant 0 : index
    %c0_31 = arith.constant 0 : index
    %158 = vector.load %arg2[%c1_29, %c0_30, %c0_31] : memref<5x64x256xf32, #tpu.memory_space<vmem>>, vector<1x32x128xf32>
    %159 = vector.shape_cast %158 : vector<1x32x128xf32> to vector<32x128xf32>
    %c1_32 = arith.constant 1 : index
    %c0_33 = arith.constant 0 : index
    %160 = vector.load %arg3[%c1_32, %c0_33] : memref<5x256xf32, #tpu.memory_space<vmem>>, vector<1x128xf32>
    %cst_34 = arith.constant dense<0.000000e+00> : vector<64x128xf32>
    %161 = tpu.matmul %155, %157, %cst_34 {dimension_numbers = #tpu.dot_dimension_numbers<[1], [0], [0], [1], [0, 0, 1, 1], [], []>} : vector<64x32xf32>, vector<32x128xf32>, vector<64x128xf32> -> vector<64x128xf32>
    %162 = vector.broadcast %160 : vector<1x128xf32> to vector<64x128xf32>
    %163 = arith.addf %161, %162 : vector<64x128xf32>
    %cst_35 = arith.constant 0.000000e+00 : f32
    %164 = vector.broadcast %cst_35 : f32 to vector<8x32xf32>
    %cst_36 = arith.constant 0.000000e+00 : f32
    %165 = vector.broadcast %cst_36 : f32 to vector<8x32xf32>
    %166 = vector.extract_strided_slice %163 {offsets = [0, 0], sizes = [8, 128], strides = [1, 1]} : vector<64x128xf32> to vector<8x128xf32>
    %cst_37 = arith.constant dense<0.000000e+00> : vector<8x128xf32>
    %167 = tpu.matmul %164, %159, %cst_37 {dimension_numbers = #tpu.dot_dimension_numbers<[1], [0], [0], [1], [0, 0, 1, 1], [], []>} : vector<8x32xf32>, vector<32x128xf32>, vector<8x128xf32> -> vector<8x128xf32>
    %168 = arith.addf %166, %167 : vector<8x128xf32>
    %169 = arith.negf %168 : vector<8x128xf32>
    %170 = math.exp %169 : vector<8x128xf32>
    %cst_38 = arith.constant 1.000000e+00 : f32
    %171 = vector.broadcast %cst_38 : f32 to vector<8x128xf32>
    %172 = arith.addf %171, %170 : vector<8x128xf32>
    %173 = arith.divf %171, %172 : vector<8x128xf32>
    %174 = math.tanh %168 : vector<8x128xf32>
    %175 = vector.extract_strided_slice %173 {offsets = [0, 0], sizes = [8, 32], strides = [1, 1]} : vector<8x128xf32> to vector<8x32xf32>
    %176 = vector.extract_strided_slice %173 {offsets = [0, 32], sizes = [8, 32], strides = [1, 1]} : vector<8x128xf32> to vector<8x32xf32>
    %177 = vector.extract_strided_slice %174 {offsets = [0, 64], sizes = [8, 32], strides = [1, 1]} : vector<8x128xf32> to vector<8x32xf32>
    %178 = vector.extract_strided_slice %173 {offsets = [0, 96], sizes = [8, 32], strides = [1, 1]} : vector<8x128xf32> to vector<8x32xf32>
    %179 = arith.mulf %176, %165 : vector<8x32xf32>
    %180 = arith.mulf %175, %177 : vector<8x32xf32>
    %181 = arith.addf %179, %180 : vector<8x32xf32>
    %182 = math.tanh %181 : vector<8x32xf32>
    %183 = arith.mulf %178, %182 : vector<8x32xf32>
    %184 = vector.extract_strided_slice %163 {offsets = [8, 0], sizes = [8, 128], strides = [1, 1]} : vector<64x128xf32> to vector<8x128xf32>
    %cst_39 = arith.constant dense<0.000000e+00> : vector<8x128xf32>
    %185 = tpu.matmul %183, %159, %cst_39 {dimension_numbers = #tpu.dot_dimension_numbers<[1], [0], [0], [1], [0, 0, 1, 1], [], []>} : vector<8x32xf32>, vector<32x128xf32>, vector<8x128xf32> -> vector<8x128xf32>
    %186 = arith.addf %184, %185 : vector<8x128xf32>
    %187 = arith.negf %186 : vector<8x128xf32>
    %188 = math.exp %187 : vector<8x128xf32>
    %cst_40 = arith.constant 1.000000e+00 : f32
    %189 = vector.broadcast %cst_40 : f32 to vector<8x128xf32>
    %190 = arith.addf %189, %188 : vector<8x128xf32>
    %191 = arith.divf %189, %190 : vector<8x128xf32>
    %192 = math.tanh %186 : vector<8x128xf32>
    %193 = vector.extract_strided_slice %191 {offsets = [0, 0], sizes = [8, 32], strides = [1, 1]} : vector<8x128xf32> to vector<8x32xf32>
    %194 = vector.extract_strided_slice %191 {offsets = [0, 32], sizes = [8, 32], strides = [1, 1]} : vector<8x128xf32> to vector<8x32xf32>
    %195 = vector.extract_strided_slice %192 {offsets = [0, 64], sizes = [8, 32], strides = [1, 1]} : vector<8x128xf32> to vector<8x32xf32>
    %196 = vector.extract_strided_slice %191 {offsets = [0, 96], sizes = [8, 32], strides = [1, 1]} : vector<8x128xf32> to vector<8x32xf32>
    %197 = arith.mulf %194, %181 : vector<8x32xf32>
    %198 = arith.mulf %193, %195 : vector<8x32xf32>
    %199 = arith.addf %197, %198 : vector<8x32xf32>
    %200 = math.tanh %199 : vector<8x32xf32>
    %201 = arith.mulf %196, %200 : vector<8x32xf32>
    %202 = vector.extract_strided_slice %163 {offsets = [16, 0], sizes = [8, 128], strides = [1, 1]} : vector<64x128xf32> to vector<8x128xf32>
    %cst_41 = arith.constant dense<0.000000e+00> : vector<8x128xf32>
    %203 = tpu.matmul %201, %159, %cst_41 {dimension_numbers = #tpu.dot_dimension_numbers<[1], [0], [0], [1], [0, 0, 1, 1], [], []>} : vector<8x32xf32>, vector<32x128xf32>, vector<8x128xf32> -> vector<8x128xf32>
    %204 = arith.addf %202, %203 : vector<8x128xf32>
    %205 = arith.negf %204 : vector<8x128xf32>
    %206 = math.exp %205 : vector<8x128xf32>
    %cst_42 = arith.constant 1.000000e+00 : f32
    %207 = vector.broadcast %cst_42 : f32 to vector<8x128xf32>
    %208 = arith.addf %207, %206 : vector<8x128xf32>
    %209 = arith.divf %207, %208 : vector<8x128xf32>
    %210 = math.tanh %204 : vector<8x128xf32>
    %211 = vector.extract_strided_slice %209 {offsets = [0, 0], sizes = [8, 32], strides = [1, 1]} : vector<8x128xf32> to vector<8x32xf32>
    %212 = vector.extract_strided_slice %209 {offsets = [0, 32], sizes = [8, 32], strides = [1, 1]} : vector<8x128xf32> to vector<8x32xf32>
    %213 = vector.extract_strided_slice %210 {offsets = [0, 64], sizes = [8, 32], strides = [1, 1]} : vector<8x128xf32> to vector<8x32xf32>
    %214 = vector.extract_strided_slice %209 {offsets = [0, 96], sizes = [8, 32], strides = [1, 1]} : vector<8x128xf32> to vector<8x32xf32>
    %215 = arith.mulf %212, %199 : vector<8x32xf32>
    %216 = arith.mulf %211, %213 : vector<8x32xf32>
    %217 = arith.addf %215, %216 : vector<8x32xf32>
    %218 = math.tanh %217 : vector<8x32xf32>
    %219 = arith.mulf %214, %218 : vector<8x32xf32>
    %220 = vector.extract_strided_slice %163 {offsets = [24, 0], sizes = [8, 128], strides = [1, 1]} : vector<64x128xf32> to vector<8x128xf32>
    %cst_43 = arith.constant dense<0.000000e+00> : vector<8x128xf32>
    %221 = tpu.matmul %219, %159, %cst_43 {dimension_numbers = #tpu.dot_dimension_numbers<[1], [0], [0], [1], [0, 0, 1, 1], [], []>} : vector<8x32xf32>, vector<32x128xf32>, vector<8x128xf32> -> vector<8x128xf32>
    %222 = arith.addf %220, %221 : vector<8x128xf32>
    %223 = arith.negf %222 : vector<8x128xf32>
    %224 = math.exp %223 : vector<8x128xf32>
    %cst_44 = arith.constant 1.000000e+00 : f32
    %225 = vector.broadcast %cst_44 : f32 to vector<8x128xf32>
    %226 = arith.addf %225, %224 : vector<8x128xf32>
    %227 = arith.divf %225, %226 : vector<8x128xf32>
    %228 = math.tanh %222 : vector<8x128xf32>
    %229 = vector.extract_strided_slice %227 {offsets = [0, 0], sizes = [8, 32], strides = [1, 1]} : vector<8x128xf32> to vector<8x32xf32>
    %230 = vector.extract_strided_slice %227 {offsets = [0, 32], sizes = [8, 32], strides = [1, 1]} : vector<8x128xf32> to vector<8x32xf32>
    %231 = vector.extract_strided_slice %228 {offsets = [0, 64], sizes = [8, 32], strides = [1, 1]} : vector<8x128xf32> to vector<8x32xf32>
    %232 = vector.extract_strided_slice %227 {offsets = [0, 96], sizes = [8, 32], strides = [1, 1]} : vector<8x128xf32> to vector<8x32xf32>
    %233 = arith.mulf %230, %217 : vector<8x32xf32>
    %234 = arith.mulf %229, %231 : vector<8x32xf32>
    %235 = arith.addf %233, %234 : vector<8x32xf32>
    %236 = math.tanh %235 : vector<8x32xf32>
    %237 = arith.mulf %232, %236 : vector<8x32xf32>
    %238 = vector.extract_strided_slice %163 {offsets = [32, 0], sizes = [8, 128], strides = [1, 1]} : vector<64x128xf32> to vector<8x128xf32>
    %cst_45 = arith.constant dense<0.000000e+00> : vector<8x128xf32>
    %239 = tpu.matmul %237, %159, %cst_45 {dimension_numbers = #tpu.dot_dimension_numbers<[1], [0], [0], [1], [0, 0, 1, 1], [], []>} : vector<8x32xf32>, vector<32x128xf32>, vector<8x128xf32> -> vector<8x128xf32>
    %240 = arith.addf %238, %239 : vector<8x128xf32>
    %241 = arith.negf %240 : vector<8x128xf32>
    %242 = math.exp %241 : vector<8x128xf32>
    %cst_46 = arith.constant 1.000000e+00 : f32
    %243 = vector.broadcast %cst_46 : f32 to vector<8x128xf32>
    %244 = arith.addf %243, %242 : vector<8x128xf32>
    %245 = arith.divf %243, %244 : vector<8x128xf32>
    %246 = math.tanh %240 : vector<8x128xf32>
    %247 = vector.extract_strided_slice %245 {offsets = [0, 0], sizes = [8, 32], strides = [1, 1]} : vector<8x128xf32> to vector<8x32xf32>
    %248 = vector.extract_strided_slice %245 {offsets = [0, 32], sizes = [8, 32], strides = [1, 1]} : vector<8x128xf32> to vector<8x32xf32>
    %249 = vector.extract_strided_slice %246 {offsets = [0, 64], sizes = [8, 32], strides = [1, 1]} : vector<8x128xf32> to vector<8x32xf32>
    %250 = vector.extract_strided_slice %245 {offsets = [0, 96], sizes = [8, 32], strides = [1, 1]} : vector<8x128xf32> to vector<8x32xf32>
    %251 = arith.mulf %248, %235 : vector<8x32xf32>
    %252 = arith.mulf %247, %249 : vector<8x32xf32>
    %253 = arith.addf %251, %252 : vector<8x32xf32>
    %254 = math.tanh %253 : vector<8x32xf32>
    %255 = arith.mulf %250, %254 : vector<8x32xf32>
    %256 = vector.extract_strided_slice %163 {offsets = [40, 0], sizes = [8, 128], strides = [1, 1]} : vector<64x128xf32> to vector<8x128xf32>
    %cst_47 = arith.constant dense<0.000000e+00> : vector<8x128xf32>
    %257 = tpu.matmul %255, %159, %cst_47 {dimension_numbers = #tpu.dot_dimension_numbers<[1], [0], [0], [1], [0, 0, 1, 1], [], []>} : vector<8x32xf32>, vector<32x128xf32>, vector<8x128xf32> -> vector<8x128xf32>
    %258 = arith.addf %256, %257 : vector<8x128xf32>
    %259 = arith.negf %258 : vector<8x128xf32>
    %260 = math.exp %259 : vector<8x128xf32>
    %cst_48 = arith.constant 1.000000e+00 : f32
    %261 = vector.broadcast %cst_48 : f32 to vector<8x128xf32>
    %262 = arith.addf %261, %260 : vector<8x128xf32>
    %263 = arith.divf %261, %262 : vector<8x128xf32>
    %264 = math.tanh %258 : vector<8x128xf32>
    %265 = vector.extract_strided_slice %263 {offsets = [0, 0], sizes = [8, 32], strides = [1, 1]} : vector<8x128xf32> to vector<8x32xf32>
    %266 = vector.extract_strided_slice %263 {offsets = [0, 32], sizes = [8, 32], strides = [1, 1]} : vector<8x128xf32> to vector<8x32xf32>
    %267 = vector.extract_strided_slice %264 {offsets = [0, 64], sizes = [8, 32], strides = [1, 1]} : vector<8x128xf32> to vector<8x32xf32>
    %268 = vector.extract_strided_slice %263 {offsets = [0, 96], sizes = [8, 32], strides = [1, 1]} : vector<8x128xf32> to vector<8x32xf32>
    %269 = arith.mulf %266, %253 : vector<8x32xf32>
    %270 = arith.mulf %265, %267 : vector<8x32xf32>
    %271 = arith.addf %269, %270 : vector<8x32xf32>
    %272 = math.tanh %271 : vector<8x32xf32>
    %273 = arith.mulf %268, %272 : vector<8x32xf32>
    %274 = vector.extract_strided_slice %163 {offsets = [48, 0], sizes = [8, 128], strides = [1, 1]} : vector<64x128xf32> to vector<8x128xf32>
    %cst_49 = arith.constant dense<0.000000e+00> : vector<8x128xf32>
    %275 = tpu.matmul %273, %159, %cst_49 {dimension_numbers = #tpu.dot_dimension_numbers<[1], [0], [0], [1], [0, 0, 1, 1], [], []>} : vector<8x32xf32>, vector<32x128xf32>, vector<8x128xf32> -> vector<8x128xf32>
    %276 = arith.addf %274, %275 : vector<8x128xf32>
    %277 = arith.negf %276 : vector<8x128xf32>
    %278 = math.exp %277 : vector<8x128xf32>
    %cst_50 = arith.constant 1.000000e+00 : f32
    %279 = vector.broadcast %cst_50 : f32 to vector<8x128xf32>
    %280 = arith.addf %279, %278 : vector<8x128xf32>
    %281 = arith.divf %279, %280 : vector<8x128xf32>
    %282 = math.tanh %276 : vector<8x128xf32>
    %283 = vector.extract_strided_slice %281 {offsets = [0, 0], sizes = [8, 32], strides = [1, 1]} : vector<8x128xf32> to vector<8x32xf32>
    %284 = vector.extract_strided_slice %281 {offsets = [0, 32], sizes = [8, 32], strides = [1, 1]} : vector<8x128xf32> to vector<8x32xf32>
    %285 = vector.extract_strided_slice %282 {offsets = [0, 64], sizes = [8, 32], strides = [1, 1]} : vector<8x128xf32> to vector<8x32xf32>
    %286 = vector.extract_strided_slice %281 {offsets = [0, 96], sizes = [8, 32], strides = [1, 1]} : vector<8x128xf32> to vector<8x32xf32>
    %287 = arith.mulf %284, %271 : vector<8x32xf32>
    %288 = arith.mulf %283, %285 : vector<8x32xf32>
    %289 = arith.addf %287, %288 : vector<8x32xf32>
    %290 = math.tanh %289 : vector<8x32xf32>
    %291 = arith.mulf %286, %290 : vector<8x32xf32>
    %292 = vector.extract_strided_slice %163 {offsets = [56, 0], sizes = [8, 128], strides = [1, 1]} : vector<64x128xf32> to vector<8x128xf32>
    %cst_51 = arith.constant dense<0.000000e+00> : vector<8x128xf32>
    %293 = tpu.matmul %291, %159, %cst_51 {dimension_numbers = #tpu.dot_dimension_numbers<[1], [0], [0], [1], [0, 0, 1, 1], [], []>} : vector<8x32xf32>, vector<32x128xf32>, vector<8x128xf32> -> vector<8x128xf32>
    %294 = arith.addf %292, %293 : vector<8x128xf32>
    %295 = arith.negf %294 : vector<8x128xf32>
    %296 = math.exp %295 : vector<8x128xf32>
    %cst_52 = arith.constant 1.000000e+00 : f32
    %297 = vector.broadcast %cst_52 : f32 to vector<8x128xf32>
    %298 = arith.addf %297, %296 : vector<8x128xf32>
    %299 = arith.divf %297, %298 : vector<8x128xf32>
    %300 = math.tanh %294 : vector<8x128xf32>
    %301 = vector.extract_strided_slice %299 {offsets = [0, 0], sizes = [8, 32], strides = [1, 1]} : vector<8x128xf32> to vector<8x32xf32>
    %302 = vector.extract_strided_slice %299 {offsets = [0, 32], sizes = [8, 32], strides = [1, 1]} : vector<8x128xf32> to vector<8x32xf32>
    %303 = vector.extract_strided_slice %300 {offsets = [0, 64], sizes = [8, 32], strides = [1, 1]} : vector<8x128xf32> to vector<8x32xf32>
    %304 = vector.extract_strided_slice %299 {offsets = [0, 96], sizes = [8, 32], strides = [1, 1]} : vector<8x128xf32> to vector<8x32xf32>
    %305 = arith.mulf %302, %289 : vector<8x32xf32>
    %306 = arith.mulf %301, %303 : vector<8x32xf32>
    %307 = arith.addf %305, %306 : vector<8x32xf32>
    %308 = math.tanh %307 : vector<8x32xf32>
    %309 = arith.mulf %304, %308 : vector<8x32xf32>
    %310 = tpu.concatenate %183, %201, %219, %237, %255, %273, %291, %309 in 0 : vector<8x32xf32>, vector<8x32xf32>, vector<8x32xf32>, vector<8x32xf32>, vector<8x32xf32>, vector<8x32xf32>, vector<8x32xf32>, vector<8x32xf32> -> vector<64x32xf32>
    %c2 = arith.constant 2 : index
    %c0_53 = arith.constant 0 : index
    %c0_54 = arith.constant 0 : index
    %311 = vector.load %arg1[%c2, %c0_53, %c0_54] : memref<5x64x256xf32, #tpu.memory_space<vmem>>, vector<1x32x128xf32>
    %312 = vector.shape_cast %311 : vector<1x32x128xf32> to vector<32x128xf32>
    %c2_55 = arith.constant 2 : index
    %c0_56 = arith.constant 0 : index
    %c0_57 = arith.constant 0 : index
    %313 = vector.load %arg2[%c2_55, %c0_56, %c0_57] : memref<5x64x256xf32, #tpu.memory_space<vmem>>, vector<1x32x128xf32>
    %314 = vector.shape_cast %313 : vector<1x32x128xf32> to vector<32x128xf32>
    %c2_58 = arith.constant 2 : index
    %c0_59 = arith.constant 0 : index
    %315 = vector.load %arg3[%c2_58, %c0_59] : memref<5x256xf32, #tpu.memory_space<vmem>>, vector<1x128xf32>
    %cst_60 = arith.constant dense<0.000000e+00> : vector<64x128xf32>
    %316 = tpu.matmul %310, %312, %cst_60 {dimension_numbers = #tpu.dot_dimension_numbers<[1], [0], [0], [1], [0, 0, 1, 1], [], []>} : vector<64x32xf32>, vector<32x128xf32>, vector<64x128xf32> -> vector<64x128xf32>
    %317 = vector.broadcast %315 : vector<1x128xf32> to vector<64x128xf32>
    %318 = arith.addf %316, %317 : vector<64x128xf32>
    %cst_61 = arith.constant 0.000000e+00 : f32
    %319 = vector.broadcast %cst_61 : f32 to vector<8x32xf32>
    %cst_62 = arith.constant 0.000000e+00 : f32
    %320 = vector.broadcast %cst_62 : f32 to vector<8x32xf32>
    %321 = vector.extract_strided_slice %318 {offsets = [0, 0], sizes = [8, 128], strides = [1, 1]} : vector<64x128xf32> to vector<8x128xf32>
    %cst_63 = arith.constant dense<0.000000e+00> : vector<8x128xf32>
    %322 = tpu.matmul %319, %314, %cst_63 {dimension_numbers = #tpu.dot_dimension_numbers<[1], [0], [0], [1], [0, 0, 1, 1], [], []>} : vector<8x32xf32>, vector<32x128xf32>, vector<8x128xf32> -> vector<8x128xf32>
    %323 = arith.addf %321, %322 : vector<8x128xf32>
    %324 = arith.negf %323 : vector<8x128xf32>
    %325 = math.exp %324 : vector<8x128xf32>
    %cst_64 = arith.constant 1.000000e+00 : f32
    %326 = vector.broadcast %cst_64 : f32 to vector<8x128xf32>
    %327 = arith.addf %326, %325 : vector<8x128xf32>
    %328 = arith.divf %326, %327 : vector<8x128xf32>
    %329 = math.tanh %323 : vector<8x128xf32>
    %330 = vector.extract_strided_slice %328 {offsets = [0, 0], sizes = [8, 32], strides = [1, 1]} : vector<8x128xf32> to vector<8x32xf32>
    %331 = vector.extract_strided_slice %328 {offsets = [0, 32], sizes = [8, 32], strides = [1, 1]} : vector<8x128xf32> to vector<8x32xf32>
    %332 = vector.extract_strided_slice %329 {offsets = [0, 64], sizes = [8, 32], strides = [1, 1]} : vector<8x128xf32> to vector<8x32xf32>
    %333 = vector.extract_strided_slice %328 {offsets = [0, 96], sizes = [8, 32], strides = [1, 1]} : vector<8x128xf32> to vector<8x32xf32>
    %334 = arith.mulf %331, %320 : vector<8x32xf32>
    %335 = arith.mulf %330, %332 : vector<8x32xf32>
    %336 = arith.addf %334, %335 : vector<8x32xf32>
    %337 = math.tanh %336 : vector<8x32xf32>
    %338 = arith.mulf %333, %337 : vector<8x32xf32>
    %339 = vector.extract_strided_slice %318 {offsets = [8, 0], sizes = [8, 128], strides = [1, 1]} : vector<64x128xf32> to vector<8x128xf32>
    %cst_65 = arith.constant dense<0.000000e+00> : vector<8x128xf32>
    %340 = tpu.matmul %338, %314, %cst_65 {dimension_numbers = #tpu.dot_dimension_numbers<[1], [0], [0], [1], [0, 0, 1, 1], [], []>} : vector<8x32xf32>, vector<32x128xf32>, vector<8x128xf32> -> vector<8x128xf32>
    %341 = arith.addf %339, %340 : vector<8x128xf32>
    %342 = arith.negf %341 : vector<8x128xf32>
    %343 = math.exp %342 : vector<8x128xf32>
    %cst_66 = arith.constant 1.000000e+00 : f32
    %344 = vector.broadcast %cst_66 : f32 to vector<8x128xf32>
    %345 = arith.addf %344, %343 : vector<8x128xf32>
    %346 = arith.divf %344, %345 : vector<8x128xf32>
    %347 = math.tanh %341 : vector<8x128xf32>
    %348 = vector.extract_strided_slice %346 {offsets = [0, 0], sizes = [8, 32], strides = [1, 1]} : vector<8x128xf32> to vector<8x32xf32>
    %349 = vector.extract_strided_slice %346 {offsets = [0, 32], sizes = [8, 32], strides = [1, 1]} : vector<8x128xf32> to vector<8x32xf32>
    %350 = vector.extract_strided_slice %347 {offsets = [0, 64], sizes = [8, 32], strides = [1, 1]} : vector<8x128xf32> to vector<8x32xf32>
    %351 = vector.extract_strided_slice %346 {offsets = [0, 96], sizes = [8, 32], strides = [1, 1]} : vector<8x128xf32> to vector<8x32xf32>
    %352 = arith.mulf %349, %336 : vector<8x32xf32>
    %353 = arith.mulf %348, %350 : vector<8x32xf32>
    %354 = arith.addf %352, %353 : vector<8x32xf32>
    %355 = math.tanh %354 : vector<8x32xf32>
    %356 = arith.mulf %351, %355 : vector<8x32xf32>
    %357 = vector.extract_strided_slice %318 {offsets = [16, 0], sizes = [8, 128], strides = [1, 1]} : vector<64x128xf32> to vector<8x128xf32>
    %cst_67 = arith.constant dense<0.000000e+00> : vector<8x128xf32>
    %358 = tpu.matmul %356, %314, %cst_67 {dimension_numbers = #tpu.dot_dimension_numbers<[1], [0], [0], [1], [0, 0, 1, 1], [], []>} : vector<8x32xf32>, vector<32x128xf32>, vector<8x128xf32> -> vector<8x128xf32>
    %359 = arith.addf %357, %358 : vector<8x128xf32>
    %360 = arith.negf %359 : vector<8x128xf32>
    %361 = math.exp %360 : vector<8x128xf32>
    %cst_68 = arith.constant 1.000000e+00 : f32
    %362 = vector.broadcast %cst_68 : f32 to vector<8x128xf32>
    %363 = arith.addf %362, %361 : vector<8x128xf32>
    %364 = arith.divf %362, %363 : vector<8x128xf32>
    %365 = math.tanh %359 : vector<8x128xf32>
    %366 = vector.extract_strided_slice %364 {offsets = [0, 0], sizes = [8, 32], strides = [1, 1]} : vector<8x128xf32> to vector<8x32xf32>
    %367 = vector.extract_strided_slice %364 {offsets = [0, 32], sizes = [8, 32], strides = [1, 1]} : vector<8x128xf32> to vector<8x32xf32>
    %368 = vector.extract_strided_slice %365 {offsets = [0, 64], sizes = [8, 32], strides = [1, 1]} : vector<8x128xf32> to vector<8x32xf32>
    %369 = vector.extract_strided_slice %364 {offsets = [0, 96], sizes = [8, 32], strides = [1, 1]} : vector<8x128xf32> to vector<8x32xf32>
    %370 = arith.mulf %367, %354 : vector<8x32xf32>
    %371 = arith.mulf %366, %368 : vector<8x32xf32>
    %372 = arith.addf %370, %371 : vector<8x32xf32>
    %373 = math.tanh %372 : vector<8x32xf32>
    %374 = arith.mulf %369, %373 : vector<8x32xf32>
    %375 = vector.extract_strided_slice %318 {offsets = [24, 0], sizes = [8, 128], strides = [1, 1]} : vector<64x128xf32> to vector<8x128xf32>
    %cst_69 = arith.constant dense<0.000000e+00> : vector<8x128xf32>
    %376 = tpu.matmul %374, %314, %cst_69 {dimension_numbers = #tpu.dot_dimension_numbers<[1], [0], [0], [1], [0, 0, 1, 1], [], []>} : vector<8x32xf32>, vector<32x128xf32>, vector<8x128xf32> -> vector<8x128xf32>
    %377 = arith.addf %375, %376 : vector<8x128xf32>
    %378 = arith.negf %377 : vector<8x128xf32>
    %379 = math.exp %378 : vector<8x128xf32>
    %cst_70 = arith.constant 1.000000e+00 : f32
    %380 = vector.broadcast %cst_70 : f32 to vector<8x128xf32>
    %381 = arith.addf %380, %379 : vector<8x128xf32>
    %382 = arith.divf %380, %381 : vector<8x128xf32>
    %383 = math.tanh %377 : vector<8x128xf32>
    %384 = vector.extract_strided_slice %382 {offsets = [0, 0], sizes = [8, 32], strides = [1, 1]} : vector<8x128xf32> to vector<8x32xf32>
    %385 = vector.extract_strided_slice %382 {offsets = [0, 32], sizes = [8, 32], strides = [1, 1]} : vector<8x128xf32> to vector<8x32xf32>
    %386 = vector.extract_strided_slice %383 {offsets = [0, 64], sizes = [8, 32], strides = [1, 1]} : vector<8x128xf32> to vector<8x32xf32>
    %387 = vector.extract_strided_slice %382 {offsets = [0, 96], sizes = [8, 32], strides = [1, 1]} : vector<8x128xf32> to vector<8x32xf32>
    %388 = arith.mulf %385, %372 : vector<8x32xf32>
    %389 = arith.mulf %384, %386 : vector<8x32xf32>
    %390 = arith.addf %388, %389 : vector<8x32xf32>
    %391 = math.tanh %390 : vector<8x32xf32>
    %392 = arith.mulf %387, %391 : vector<8x32xf32>
    %393 = vector.extract_strided_slice %318 {offsets = [32, 0], sizes = [8, 128], strides = [1, 1]} : vector<64x128xf32> to vector<8x128xf32>
    %cst_71 = arith.constant dense<0.000000e+00> : vector<8x128xf32>
    %394 = tpu.matmul %392, %314, %cst_71 {dimension_numbers = #tpu.dot_dimension_numbers<[1], [0], [0], [1], [0, 0, 1, 1], [], []>} : vector<8x32xf32>, vector<32x128xf32>, vector<8x128xf32> -> vector<8x128xf32>
    %395 = arith.addf %393, %394 : vector<8x128xf32>
    %396 = arith.negf %395 : vector<8x128xf32>
    %397 = math.exp %396 : vector<8x128xf32>
    %cst_72 = arith.constant 1.000000e+00 : f32
    %398 = vector.broadcast %cst_72 : f32 to vector<8x128xf32>
    %399 = arith.addf %398, %397 : vector<8x128xf32>
    %400 = arith.divf %398, %399 : vector<8x128xf32>
    %401 = math.tanh %395 : vector<8x128xf32>
    %402 = vector.extract_strided_slice %400 {offsets = [0, 0], sizes = [8, 32], strides = [1, 1]} : vector<8x128xf32> to vector<8x32xf32>
    %403 = vector.extract_strided_slice %400 {offsets = [0, 32], sizes = [8, 32], strides = [1, 1]} : vector<8x128xf32> to vector<8x32xf32>
    %404 = vector.extract_strided_slice %401 {offsets = [0, 64], sizes = [8, 32], strides = [1, 1]} : vector<8x128xf32> to vector<8x32xf32>
    %405 = vector.extract_strided_slice %400 {offsets = [0, 96], sizes = [8, 32], strides = [1, 1]} : vector<8x128xf32> to vector<8x32xf32>
    %406 = arith.mulf %403, %390 : vector<8x32xf32>
    %407 = arith.mulf %402, %404 : vector<8x32xf32>
    %408 = arith.addf %406, %407 : vector<8x32xf32>
    %409 = math.tanh %408 : vector<8x32xf32>
    %410 = arith.mulf %405, %409 : vector<8x32xf32>
    %411 = vector.extract_strided_slice %318 {offsets = [40, 0], sizes = [8, 128], strides = [1, 1]} : vector<64x128xf32> to vector<8x128xf32>
    %cst_73 = arith.constant dense<0.000000e+00> : vector<8x128xf32>
    %412 = tpu.matmul %410, %314, %cst_73 {dimension_numbers = #tpu.dot_dimension_numbers<[1], [0], [0], [1], [0, 0, 1, 1], [], []>} : vector<8x32xf32>, vector<32x128xf32>, vector<8x128xf32> -> vector<8x128xf32>
    %413 = arith.addf %411, %412 : vector<8x128xf32>
    %414 = arith.negf %413 : vector<8x128xf32>
    %415 = math.exp %414 : vector<8x128xf32>
    %cst_74 = arith.constant 1.000000e+00 : f32
    %416 = vector.broadcast %cst_74 : f32 to vector<8x128xf32>
    %417 = arith.addf %416, %415 : vector<8x128xf32>
    %418 = arith.divf %416, %417 : vector<8x128xf32>
    %419 = math.tanh %413 : vector<8x128xf32>
    %420 = vector.extract_strided_slice %418 {offsets = [0, 0], sizes = [8, 32], strides = [1, 1]} : vector<8x128xf32> to vector<8x32xf32>
    %421 = vector.extract_strided_slice %418 {offsets = [0, 32], sizes = [8, 32], strides = [1, 1]} : vector<8x128xf32> to vector<8x32xf32>
    %422 = vector.extract_strided_slice %419 {offsets = [0, 64], sizes = [8, 32], strides = [1, 1]} : vector<8x128xf32> to vector<8x32xf32>
    %423 = vector.extract_strided_slice %418 {offsets = [0, 96], sizes = [8, 32], strides = [1, 1]} : vector<8x128xf32> to vector<8x32xf32>
    %424 = arith.mulf %421, %408 : vector<8x32xf32>
    %425 = arith.mulf %420, %422 : vector<8x32xf32>
    %426 = arith.addf %424, %425 : vector<8x32xf32>
    %427 = math.tanh %426 : vector<8x32xf32>
    %428 = arith.mulf %423, %427 : vector<8x32xf32>
    %429 = vector.extract_strided_slice %318 {offsets = [48, 0], sizes = [8, 128], strides = [1, 1]} : vector<64x128xf32> to vector<8x128xf32>
    %cst_75 = arith.constant dense<0.000000e+00> : vector<8x128xf32>
    %430 = tpu.matmul %428, %314, %cst_75 {dimension_numbers = #tpu.dot_dimension_numbers<[1], [0], [0], [1], [0, 0, 1, 1], [], []>} : vector<8x32xf32>, vector<32x128xf32>, vector<8x128xf32> -> vector<8x128xf32>
    %431 = arith.addf %429, %430 : vector<8x128xf32>
    %432 = arith.negf %431 : vector<8x128xf32>
    %433 = math.exp %432 : vector<8x128xf32>
    %cst_76 = arith.constant 1.000000e+00 : f32
    %434 = vector.broadcast %cst_76 : f32 to vector<8x128xf32>
    %435 = arith.addf %434, %433 : vector<8x128xf32>
    %436 = arith.divf %434, %435 : vector<8x128xf32>
    %437 = math.tanh %431 : vector<8x128xf32>
    %438 = vector.extract_strided_slice %436 {offsets = [0, 0], sizes = [8, 32], strides = [1, 1]} : vector<8x128xf32> to vector<8x32xf32>
    %439 = vector.extract_strided_slice %436 {offsets = [0, 32], sizes = [8, 32], strides = [1, 1]} : vector<8x128xf32> to vector<8x32xf32>
    %440 = vector.extract_strided_slice %437 {offsets = [0, 64], sizes = [8, 32], strides = [1, 1]} : vector<8x128xf32> to vector<8x32xf32>
    %441 = vector.extract_strided_slice %436 {offsets = [0, 96], sizes = [8, 32], strides = [1, 1]} : vector<8x128xf32> to vector<8x32xf32>
    %442 = arith.mulf %439, %426 : vector<8x32xf32>
    %443 = arith.mulf %438, %440 : vector<8x32xf32>
    %444 = arith.addf %442, %443 : vector<8x32xf32>
    %445 = math.tanh %444 : vector<8x32xf32>
    %446 = arith.mulf %441, %445 : vector<8x32xf32>
    %447 = vector.extract_strided_slice %318 {offsets = [56, 0], sizes = [8, 128], strides = [1, 1]} : vector<64x128xf32> to vector<8x128xf32>
    %cst_77 = arith.constant dense<0.000000e+00> : vector<8x128xf32>
    %448 = tpu.matmul %446, %314, %cst_77 {dimension_numbers = #tpu.dot_dimension_numbers<[1], [0], [0], [1], [0, 0, 1, 1], [], []>} : vector<8x32xf32>, vector<32x128xf32>, vector<8x128xf32> -> vector<8x128xf32>
    %449 = arith.addf %447, %448 : vector<8x128xf32>
    %450 = arith.negf %449 : vector<8x128xf32>
    %451 = math.exp %450 : vector<8x128xf32>
    %cst_78 = arith.constant 1.000000e+00 : f32
    %452 = vector.broadcast %cst_78 : f32 to vector<8x128xf32>
    %453 = arith.addf %452, %451 : vector<8x128xf32>
    %454 = arith.divf %452, %453 : vector<8x128xf32>
    %455 = math.tanh %449 : vector<8x128xf32>
    %456 = vector.extract_strided_slice %454 {offsets = [0, 0], sizes = [8, 32], strides = [1, 1]} : vector<8x128xf32> to vector<8x32xf32>
    %457 = vector.extract_strided_slice %454 {offsets = [0, 32], sizes = [8, 32], strides = [1, 1]} : vector<8x128xf32> to vector<8x32xf32>
    %458 = vector.extract_strided_slice %455 {offsets = [0, 64], sizes = [8, 32], strides = [1, 1]} : vector<8x128xf32> to vector<8x32xf32>
    %459 = vector.extract_strided_slice %454 {offsets = [0, 96], sizes = [8, 32], strides = [1, 1]} : vector<8x128xf32> to vector<8x32xf32>
    %460 = arith.mulf %457, %444 : vector<8x32xf32>
    %461 = arith.mulf %456, %458 : vector<8x32xf32>
    %462 = arith.addf %460, %461 : vector<8x32xf32>
    %463 = math.tanh %462 : vector<8x32xf32>
    %464 = arith.mulf %459, %463 : vector<8x32xf32>
    %465 = tpu.concatenate %338, %356, %374, %392, %410, %428, %446, %464 in 0 : vector<8x32xf32>, vector<8x32xf32>, vector<8x32xf32>, vector<8x32xf32>, vector<8x32xf32>, vector<8x32xf32>, vector<8x32xf32>, vector<8x32xf32> -> vector<64x32xf32>
    %c3 = arith.constant 3 : index
    %c0_79 = arith.constant 0 : index
    %c0_80 = arith.constant 0 : index
    %466 = vector.load %arg1[%c3, %c0_79, %c0_80] : memref<5x64x256xf32, #tpu.memory_space<vmem>>, vector<1x32x256xf32>
    %467 = vector.shape_cast %466 : vector<1x32x256xf32> to vector<32x256xf32>
    %c3_81 = arith.constant 3 : index
    %c0_82 = arith.constant 0 : index
    %c0_83 = arith.constant 0 : index
    %468 = vector.load %arg2[%c3_81, %c0_82, %c0_83] : memref<5x64x256xf32, #tpu.memory_space<vmem>>, vector<1x64x256xf32>
    %469 = vector.shape_cast %468 : vector<1x64x256xf32> to vector<64x256xf32>
    %c3_84 = arith.constant 3 : index
    %c0_85 = arith.constant 0 : index
    %470 = vector.load %arg3[%c3_84, %c0_85] : memref<5x256xf32, #tpu.memory_space<vmem>>, vector<1x256xf32>
    %cst_86 = arith.constant dense<0.000000e+00> : vector<64x256xf32>
    %471 = tpu.matmul %465, %467, %cst_86 {dimension_numbers = #tpu.dot_dimension_numbers<[1], [0], [0], [1], [0, 0, 1, 1], [], []>} : vector<64x32xf32>, vector<32x256xf32>, vector<64x256xf32> -> vector<64x256xf32>
    %472 = vector.broadcast %470 : vector<1x256xf32> to vector<64x256xf32>
    %473 = arith.addf %471, %472 : vector<64x256xf32>
    %cst_87 = arith.constant 0.000000e+00 : f32
    %474 = vector.broadcast %cst_87 : f32 to vector<8x64xf32>
    %cst_88 = arith.constant 0.000000e+00 : f32
    %475 = vector.broadcast %cst_88 : f32 to vector<8x64xf32>
    %476 = vector.extract_strided_slice %473 {offsets = [0, 0], sizes = [8, 256], strides = [1, 1]} : vector<64x256xf32> to vector<8x256xf32>
    %cst_89 = arith.constant dense<0.000000e+00> : vector<8x256xf32>
    %477 = tpu.matmul %474, %469, %cst_89 {dimension_numbers = #tpu.dot_dimension_numbers<[1], [0], [0], [1], [0, 0, 1, 1], [], []>} : vector<8x64xf32>, vector<64x256xf32>, vector<8x256xf32> -> vector<8x256xf32>
    %478 = arith.addf %476, %477 : vector<8x256xf32>
    %479 = arith.negf %478 : vector<8x256xf32>
    %480 = math.exp %479 : vector<8x256xf32>
    %cst_90 = arith.constant 1.000000e+00 : f32
    %481 = vector.broadcast %cst_90 : f32 to vector<8x256xf32>
    %482 = arith.addf %481, %480 : vector<8x256xf32>
    %483 = arith.divf %481, %482 : vector<8x256xf32>
    %484 = math.tanh %478 : vector<8x256xf32>
    %485 = vector.extract_strided_slice %483 {offsets = [0, 0], sizes = [8, 64], strides = [1, 1]} : vector<8x256xf32> to vector<8x64xf32>
    %486 = vector.extract_strided_slice %483 {offsets = [0, 64], sizes = [8, 64], strides = [1, 1]} : vector<8x256xf32> to vector<8x64xf32>
    %487 = vector.extract_strided_slice %484 {offsets = [0, 128], sizes = [8, 64], strides = [1, 1]} : vector<8x256xf32> to vector<8x64xf32>
    %488 = vector.extract_strided_slice %483 {offsets = [0, 192], sizes = [8, 64], strides = [1, 1]} : vector<8x256xf32> to vector<8x64xf32>
    %489 = arith.mulf %486, %475 : vector<8x64xf32>
    %490 = arith.mulf %485, %487 : vector<8x64xf32>
    %491 = arith.addf %489, %490 : vector<8x64xf32>
    %492 = math.tanh %491 : vector<8x64xf32>
    %493 = arith.mulf %488, %492 : vector<8x64xf32>
    %494 = vector.extract_strided_slice %473 {offsets = [8, 0], sizes = [8, 256], strides = [1, 1]} : vector<64x256xf32> to vector<8x256xf32>
    %cst_91 = arith.constant dense<0.000000e+00> : vector<8x256xf32>
    %495 = tpu.matmul %493, %469, %cst_91 {dimension_numbers = #tpu.dot_dimension_numbers<[1], [0], [0], [1], [0, 0, 1, 1], [], []>} : vector<8x64xf32>, vector<64x256xf32>, vector<8x256xf32> -> vector<8x256xf32>
    %496 = arith.addf %494, %495 : vector<8x256xf32>
    %497 = arith.negf %496 : vector<8x256xf32>
    %498 = math.exp %497 : vector<8x256xf32>
    %cst_92 = arith.constant 1.000000e+00 : f32
    %499 = vector.broadcast %cst_92 : f32 to vector<8x256xf32>
    %500 = arith.addf %499, %498 : vector<8x256xf32>
    %501 = arith.divf %499, %500 : vector<8x256xf32>
    %502 = math.tanh %496 : vector<8x256xf32>
    %503 = vector.extract_strided_slice %501 {offsets = [0, 0], sizes = [8, 64], strides = [1, 1]} : vector<8x256xf32> to vector<8x64xf32>
    %504 = vector.extract_strided_slice %501 {offsets = [0, 64], sizes = [8, 64], strides = [1, 1]} : vector<8x256xf32> to vector<8x64xf32>
    %505 = vector.extract_strided_slice %502 {offsets = [0, 128], sizes = [8, 64], strides = [1, 1]} : vector<8x256xf32> to vector<8x64xf32>
    %506 = vector.extract_strided_slice %501 {offsets = [0, 192], sizes = [8, 64], strides = [1, 1]} : vector<8x256xf32> to vector<8x64xf32>
    %507 = arith.mulf %504, %491 : vector<8x64xf32>
    %508 = arith.mulf %503, %505 : vector<8x64xf32>
    %509 = arith.addf %507, %508 : vector<8x64xf32>
    %510 = math.tanh %509 : vector<8x64xf32>
    %511 = arith.mulf %506, %510 : vector<8x64xf32>
    %512 = vector.extract_strided_slice %473 {offsets = [16, 0], sizes = [8, 256], strides = [1, 1]} : vector<64x256xf32> to vector<8x256xf32>
    %cst_93 = arith.constant dense<0.000000e+00> : vector<8x256xf32>
    %513 = tpu.matmul %511, %469, %cst_93 {dimension_numbers = #tpu.dot_dimension_numbers<[1], [0], [0], [1], [0, 0, 1, 1], [], []>} : vector<8x64xf32>, vector<64x256xf32>, vector<8x256xf32> -> vector<8x256xf32>
    %514 = arith.addf %512, %513 : vector<8x256xf32>
    %515 = arith.negf %514 : vector<8x256xf32>
    %516 = math.exp %515 : vector<8x256xf32>
    %cst_94 = arith.constant 1.000000e+00 : f32
    %517 = vector.broadcast %cst_94 : f32 to vector<8x256xf32>
    %518 = arith.addf %517, %516 : vector<8x256xf32>
    %519 = arith.divf %517, %518 : vector<8x256xf32>
    %520 = math.tanh %514 : vector<8x256xf32>
    %521 = vector.extract_strided_slice %519 {offsets = [0, 0], sizes = [8, 64], strides = [1, 1]} : vector<8x256xf32> to vector<8x64xf32>
    %522 = vector.extract_strided_slice %519 {offsets = [0, 64], sizes = [8, 64], strides = [1, 1]} : vector<8x256xf32> to vector<8x64xf32>
    %523 = vector.extract_strided_slice %520 {offsets = [0, 128], sizes = [8, 64], strides = [1, 1]} : vector<8x256xf32> to vector<8x64xf32>
    %524 = vector.extract_strided_slice %519 {offsets = [0, 192], sizes = [8, 64], strides = [1, 1]} : vector<8x256xf32> to vector<8x64xf32>
    %525 = arith.mulf %522, %509 : vector<8x64xf32>
    %526 = arith.mulf %521, %523 : vector<8x64xf32>
    %527 = arith.addf %525, %526 : vector<8x64xf32>
    %528 = math.tanh %527 : vector<8x64xf32>
    %529 = arith.mulf %524, %528 : vector<8x64xf32>
    %530 = vector.extract_strided_slice %473 {offsets = [24, 0], sizes = [8, 256], strides = [1, 1]} : vector<64x256xf32> to vector<8x256xf32>
    %cst_95 = arith.constant dense<0.000000e+00> : vector<8x256xf32>
    %531 = tpu.matmul %529, %469, %cst_95 {dimension_numbers = #tpu.dot_dimension_numbers<[1], [0], [0], [1], [0, 0, 1, 1], [], []>} : vector<8x64xf32>, vector<64x256xf32>, vector<8x256xf32> -> vector<8x256xf32>
    %532 = arith.addf %530, %531 : vector<8x256xf32>
    %533 = arith.negf %532 : vector<8x256xf32>
    %534 = math.exp %533 : vector<8x256xf32>
    %cst_96 = arith.constant 1.000000e+00 : f32
    %535 = vector.broadcast %cst_96 : f32 to vector<8x256xf32>
    %536 = arith.addf %535, %534 : vector<8x256xf32>
    %537 = arith.divf %535, %536 : vector<8x256xf32>
    %538 = math.tanh %532 : vector<8x256xf32>
    %539 = vector.extract_strided_slice %537 {offsets = [0, 0], sizes = [8, 64], strides = [1, 1]} : vector<8x256xf32> to vector<8x64xf32>
    %540 = vector.extract_strided_slice %537 {offsets = [0, 64], sizes = [8, 64], strides = [1, 1]} : vector<8x256xf32> to vector<8x64xf32>
    %541 = vector.extract_strided_slice %538 {offsets = [0, 128], sizes = [8, 64], strides = [1, 1]} : vector<8x256xf32> to vector<8x64xf32>
    %542 = vector.extract_strided_slice %537 {offsets = [0, 192], sizes = [8, 64], strides = [1, 1]} : vector<8x256xf32> to vector<8x64xf32>
    %543 = arith.mulf %540, %527 : vector<8x64xf32>
    %544 = arith.mulf %539, %541 : vector<8x64xf32>
    %545 = arith.addf %543, %544 : vector<8x64xf32>
    %546 = math.tanh %545 : vector<8x64xf32>
    %547 = arith.mulf %542, %546 : vector<8x64xf32>
    %548 = vector.extract_strided_slice %473 {offsets = [32, 0], sizes = [8, 256], strides = [1, 1]} : vector<64x256xf32> to vector<8x256xf32>
    %cst_97 = arith.constant dense<0.000000e+00> : vector<8x256xf32>
    %549 = tpu.matmul %547, %469, %cst_97 {dimension_numbers = #tpu.dot_dimension_numbers<[1], [0], [0], [1], [0, 0, 1, 1], [], []>} : vector<8x64xf32>, vector<64x256xf32>, vector<8x256xf32> -> vector<8x256xf32>
    %550 = arith.addf %548, %549 : vector<8x256xf32>
    %551 = arith.negf %550 : vector<8x256xf32>
    %552 = math.exp %551 : vector<8x256xf32>
    %cst_98 = arith.constant 1.000000e+00 : f32
    %553 = vector.broadcast %cst_98 : f32 to vector<8x256xf32>
    %554 = arith.addf %553, %552 : vector<8x256xf32>
    %555 = arith.divf %553, %554 : vector<8x256xf32>
    %556 = math.tanh %550 : vector<8x256xf32>
    %557 = vector.extract_strided_slice %555 {offsets = [0, 0], sizes = [8, 64], strides = [1, 1]} : vector<8x256xf32> to vector<8x64xf32>
    %558 = vector.extract_strided_slice %555 {offsets = [0, 64], sizes = [8, 64], strides = [1, 1]} : vector<8x256xf32> to vector<8x64xf32>
    %559 = vector.extract_strided_slice %556 {offsets = [0, 128], sizes = [8, 64], strides = [1, 1]} : vector<8x256xf32> to vector<8x64xf32>
    %560 = vector.extract_strided_slice %555 {offsets = [0, 192], sizes = [8, 64], strides = [1, 1]} : vector<8x256xf32> to vector<8x64xf32>
    %561 = arith.mulf %558, %545 : vector<8x64xf32>
    %562 = arith.mulf %557, %559 : vector<8x64xf32>
    %563 = arith.addf %561, %562 : vector<8x64xf32>
    %564 = math.tanh %563 : vector<8x64xf32>
    %565 = arith.mulf %560, %564 : vector<8x64xf32>
    %566 = vector.extract_strided_slice %473 {offsets = [40, 0], sizes = [8, 256], strides = [1, 1]} : vector<64x256xf32> to vector<8x256xf32>
    %cst_99 = arith.constant dense<0.000000e+00> : vector<8x256xf32>
    %567 = tpu.matmul %565, %469, %cst_99 {dimension_numbers = #tpu.dot_dimension_numbers<[1], [0], [0], [1], [0, 0, 1, 1], [], []>} : vector<8x64xf32>, vector<64x256xf32>, vector<8x256xf32> -> vector<8x256xf32>
    %568 = arith.addf %566, %567 : vector<8x256xf32>
    %569 = arith.negf %568 : vector<8x256xf32>
    %570 = math.exp %569 : vector<8x256xf32>
    %cst_100 = arith.constant 1.000000e+00 : f32
    %571 = vector.broadcast %cst_100 : f32 to vector<8x256xf32>
    %572 = arith.addf %571, %570 : vector<8x256xf32>
    %573 = arith.divf %571, %572 : vector<8x256xf32>
    %574 = math.tanh %568 : vector<8x256xf32>
    %575 = vector.extract_strided_slice %573 {offsets = [0, 0], sizes = [8, 64], strides = [1, 1]} : vector<8x256xf32> to vector<8x64xf32>
    %576 = vector.extract_strided_slice %573 {offsets = [0, 64], sizes = [8, 64], strides = [1, 1]} : vector<8x256xf32> to vector<8x64xf32>
    %577 = vector.extract_strided_slice %574 {offsets = [0, 128], sizes = [8, 64], strides = [1, 1]} : vector<8x256xf32> to vector<8x64xf32>
    %578 = vector.extract_strided_slice %573 {offsets = [0, 192], sizes = [8, 64], strides = [1, 1]} : vector<8x256xf32> to vector<8x64xf32>
    %579 = arith.mulf %576, %563 : vector<8x64xf32>
    %580 = arith.mulf %575, %577 : vector<8x64xf32>
    %581 = arith.addf %579, %580 : vector<8x64xf32>
    %582 = math.tanh %581 : vector<8x64xf32>
    %583 = arith.mulf %578, %582 : vector<8x64xf32>
    %584 = vector.extract_strided_slice %473 {offsets = [48, 0], sizes = [8, 256], strides = [1, 1]} : vector<64x256xf32> to vector<8x256xf32>
    %cst_101 = arith.constant dense<0.000000e+00> : vector<8x256xf32>
    %585 = tpu.matmul %583, %469, %cst_101 {dimension_numbers = #tpu.dot_dimension_numbers<[1], [0], [0], [1], [0, 0, 1, 1], [], []>} : vector<8x64xf32>, vector<64x256xf32>, vector<8x256xf32> -> vector<8x256xf32>
    %586 = arith.addf %584, %585 : vector<8x256xf32>
    %587 = arith.negf %586 : vector<8x256xf32>
    %588 = math.exp %587 : vector<8x256xf32>
    %cst_102 = arith.constant 1.000000e+00 : f32
    %589 = vector.broadcast %cst_102 : f32 to vector<8x256xf32>
    %590 = arith.addf %589, %588 : vector<8x256xf32>
    %591 = arith.divf %589, %590 : vector<8x256xf32>
    %592 = math.tanh %586 : vector<8x256xf32>
    %593 = vector.extract_strided_slice %591 {offsets = [0, 0], sizes = [8, 64], strides = [1, 1]} : vector<8x256xf32> to vector<8x64xf32>
    %594 = vector.extract_strided_slice %591 {offsets = [0, 64], sizes = [8, 64], strides = [1, 1]} : vector<8x256xf32> to vector<8x64xf32>
    %595 = vector.extract_strided_slice %592 {offsets = [0, 128], sizes = [8, 64], strides = [1, 1]} : vector<8x256xf32> to vector<8x64xf32>
    %596 = vector.extract_strided_slice %591 {offsets = [0, 192], sizes = [8, 64], strides = [1, 1]} : vector<8x256xf32> to vector<8x64xf32>
    %597 = arith.mulf %594, %581 : vector<8x64xf32>
    %598 = arith.mulf %593, %595 : vector<8x64xf32>
    %599 = arith.addf %597, %598 : vector<8x64xf32>
    %600 = math.tanh %599 : vector<8x64xf32>
    %601 = arith.mulf %596, %600 : vector<8x64xf32>
    %602 = vector.extract_strided_slice %473 {offsets = [56, 0], sizes = [8, 256], strides = [1, 1]} : vector<64x256xf32> to vector<8x256xf32>
    %cst_103 = arith.constant dense<0.000000e+00> : vector<8x256xf32>
    %603 = tpu.matmul %601, %469, %cst_103 {dimension_numbers = #tpu.dot_dimension_numbers<[1], [0], [0], [1], [0, 0, 1, 1], [], []>} : vector<8x64xf32>, vector<64x256xf32>, vector<8x256xf32> -> vector<8x256xf32>
    %604 = arith.addf %602, %603 : vector<8x256xf32>
    %605 = arith.negf %604 : vector<8x256xf32>
    %606 = math.exp %605 : vector<8x256xf32>
    %cst_104 = arith.constant 1.000000e+00 : f32
    %607 = vector.broadcast %cst_104 : f32 to vector<8x256xf32>
    %608 = arith.addf %607, %606 : vector<8x256xf32>
    %609 = arith.divf %607, %608 : vector<8x256xf32>
    %610 = math.tanh %604 : vector<8x256xf32>
    %611 = vector.extract_strided_slice %609 {offsets = [0, 0], sizes = [8, 64], strides = [1, 1]} : vector<8x256xf32> to vector<8x64xf32>
    %612 = vector.extract_strided_slice %609 {offsets = [0, 64], sizes = [8, 64], strides = [1, 1]} : vector<8x256xf32> to vector<8x64xf32>
    %613 = vector.extract_strided_slice %610 {offsets = [0, 128], sizes = [8, 64], strides = [1, 1]} : vector<8x256xf32> to vector<8x64xf32>
    %614 = vector.extract_strided_slice %609 {offsets = [0, 192], sizes = [8, 64], strides = [1, 1]} : vector<8x256xf32> to vector<8x64xf32>
    %615 = arith.mulf %612, %599 : vector<8x64xf32>
    %616 = arith.mulf %611, %613 : vector<8x64xf32>
    %617 = arith.addf %615, %616 : vector<8x64xf32>
    %618 = math.tanh %617 : vector<8x64xf32>
    %619 = arith.mulf %614, %618 : vector<8x64xf32>
    %620 = tpu.concatenate %493, %511, %529, %547, %565, %583, %601, %619 in 0 : vector<8x64xf32>, vector<8x64xf32>, vector<8x64xf32>, vector<8x64xf32>, vector<8x64xf32>, vector<8x64xf32>, vector<8x64xf32>, vector<8x64xf32> -> vector<64x64xf32>
    %c4 = arith.constant 4 : index
    %c0_105 = arith.constant 0 : index
    %c0_106 = arith.constant 0 : index
    %621 = vector.load %arg1[%c4, %c0_105, %c0_106] : memref<5x64x256xf32, #tpu.memory_space<vmem>>, vector<1x64x256xf32>
    %622 = vector.shape_cast %621 : vector<1x64x256xf32> to vector<64x256xf32>
    %c4_107 = arith.constant 4 : index
    %c0_108 = arith.constant 0 : index
    %c0_109 = arith.constant 0 : index
    %623 = vector.load %arg2[%c4_107, %c0_108, %c0_109] : memref<5x64x256xf32, #tpu.memory_space<vmem>>, vector<1x64x256xf32>
    %624 = vector.shape_cast %623 : vector<1x64x256xf32> to vector<64x256xf32>
    %c4_110 = arith.constant 4 : index
    %c0_111 = arith.constant 0 : index
    %625 = vector.load %arg3[%c4_110, %c0_111] : memref<5x256xf32, #tpu.memory_space<vmem>>, vector<1x256xf32>
    %cst_112 = arith.constant dense<0.000000e+00> : vector<64x256xf32>
    %626 = tpu.matmul %620, %622, %cst_112 {dimension_numbers = #tpu.dot_dimension_numbers<[1], [0], [0], [1], [0, 0, 1, 1], [], []>} : vector<64x64xf32>, vector<64x256xf32>, vector<64x256xf32> -> vector<64x256xf32>
    %627 = vector.broadcast %625 : vector<1x256xf32> to vector<64x256xf32>
    %628 = arith.addf %626, %627 : vector<64x256xf32>
    %cst_113 = arith.constant 0.000000e+00 : f32
    %629 = vector.broadcast %cst_113 : f32 to vector<8x64xf32>
    %cst_114 = arith.constant 0.000000e+00 : f32
    %630 = vector.broadcast %cst_114 : f32 to vector<8x64xf32>
    %631 = vector.extract_strided_slice %628 {offsets = [0, 0], sizes = [8, 256], strides = [1, 1]} : vector<64x256xf32> to vector<8x256xf32>
    %cst_115 = arith.constant dense<0.000000e+00> : vector<8x256xf32>
    %632 = tpu.matmul %629, %624, %cst_115 {dimension_numbers = #tpu.dot_dimension_numbers<[1], [0], [0], [1], [0, 0, 1, 1], [], []>} : vector<8x64xf32>, vector<64x256xf32>, vector<8x256xf32> -> vector<8x256xf32>
    %633 = arith.addf %631, %632 : vector<8x256xf32>
    %634 = arith.negf %633 : vector<8x256xf32>
    %635 = math.exp %634 : vector<8x256xf32>
    %cst_116 = arith.constant 1.000000e+00 : f32
    %636 = vector.broadcast %cst_116 : f32 to vector<8x256xf32>
    %637 = arith.addf %636, %635 : vector<8x256xf32>
    %638 = arith.divf %636, %637 : vector<8x256xf32>
    %639 = math.tanh %633 : vector<8x256xf32>
    %640 = vector.extract_strided_slice %638 {offsets = [0, 0], sizes = [8, 64], strides = [1, 1]} : vector<8x256xf32> to vector<8x64xf32>
    %641 = vector.extract_strided_slice %638 {offsets = [0, 64], sizes = [8, 64], strides = [1, 1]} : vector<8x256xf32> to vector<8x64xf32>
    %642 = vector.extract_strided_slice %639 {offsets = [0, 128], sizes = [8, 64], strides = [1, 1]} : vector<8x256xf32> to vector<8x64xf32>
    %643 = vector.extract_strided_slice %638 {offsets = [0, 192], sizes = [8, 64], strides = [1, 1]} : vector<8x256xf32> to vector<8x64xf32>
    %644 = arith.mulf %641, %630 : vector<8x64xf32>
    %645 = arith.mulf %640, %642 : vector<8x64xf32>
    %646 = arith.addf %644, %645 : vector<8x64xf32>
    %647 = math.tanh %646 : vector<8x64xf32>
    %648 = arith.mulf %643, %647 : vector<8x64xf32>
    %649 = vector.extract_strided_slice %628 {offsets = [8, 0], sizes = [8, 256], strides = [1, 1]} : vector<64x256xf32> to vector<8x256xf32>
    %cst_117 = arith.constant dense<0.000000e+00> : vector<8x256xf32>
    %650 = tpu.matmul %648, %624, %cst_117 {dimension_numbers = #tpu.dot_dimension_numbers<[1], [0], [0], [1], [0, 0, 1, 1], [], []>} : vector<8x64xf32>, vector<64x256xf32>, vector<8x256xf32> -> vector<8x256xf32>
    %651 = arith.addf %649, %650 : vector<8x256xf32>
    %652 = arith.negf %651 : vector<8x256xf32>
    %653 = math.exp %652 : vector<8x256xf32>
    %cst_118 = arith.constant 1.000000e+00 : f32
    %654 = vector.broadcast %cst_118 : f32 to vector<8x256xf32>
    %655 = arith.addf %654, %653 : vector<8x256xf32>
    %656 = arith.divf %654, %655 : vector<8x256xf32>
    %657 = math.tanh %651 : vector<8x256xf32>
    %658 = vector.extract_strided_slice %656 {offsets = [0, 0], sizes = [8, 64], strides = [1, 1]} : vector<8x256xf32> to vector<8x64xf32>
    %659 = vector.extract_strided_slice %656 {offsets = [0, 64], sizes = [8, 64], strides = [1, 1]} : vector<8x256xf32> to vector<8x64xf32>
    %660 = vector.extract_strided_slice %657 {offsets = [0, 128], sizes = [8, 64], strides = [1, 1]} : vector<8x256xf32> to vector<8x64xf32>
    %661 = vector.extract_strided_slice %656 {offsets = [0, 192], sizes = [8, 64], strides = [1, 1]} : vector<8x256xf32> to vector<8x64xf32>
    %662 = arith.mulf %659, %646 : vector<8x64xf32>
    %663 = arith.mulf %658, %660 : vector<8x64xf32>
    %664 = arith.addf %662, %663 : vector<8x64xf32>
    %665 = math.tanh %664 : vector<8x64xf32>
    %666 = arith.mulf %661, %665 : vector<8x64xf32>
    %667 = vector.extract_strided_slice %628 {offsets = [16, 0], sizes = [8, 256], strides = [1, 1]} : vector<64x256xf32> to vector<8x256xf32>
    %cst_119 = arith.constant dense<0.000000e+00> : vector<8x256xf32>
    %668 = tpu.matmul %666, %624, %cst_119 {dimension_numbers = #tpu.dot_dimension_numbers<[1], [0], [0], [1], [0, 0, 1, 1], [], []>} : vector<8x64xf32>, vector<64x256xf32>, vector<8x256xf32> -> vector<8x256xf32>
    %669 = arith.addf %667, %668 : vector<8x256xf32>
    %670 = arith.negf %669 : vector<8x256xf32>
    %671 = math.exp %670 : vector<8x256xf32>
    %cst_120 = arith.constant 1.000000e+00 : f32
    %672 = vector.broadcast %cst_120 : f32 to vector<8x256xf32>
    %673 = arith.addf %672, %671 : vector<8x256xf32>
    %674 = arith.divf %672, %673 : vector<8x256xf32>
    %675 = math.tanh %669 : vector<8x256xf32>
    %676 = vector.extract_strided_slice %674 {offsets = [0, 0], sizes = [8, 64], strides = [1, 1]} : vector<8x256xf32> to vector<8x64xf32>
    %677 = vector.extract_strided_slice %674 {offsets = [0, 64], sizes = [8, 64], strides = [1, 1]} : vector<8x256xf32> to vector<8x64xf32>
    %678 = vector.extract_strided_slice %675 {offsets = [0, 128], sizes = [8, 64], strides = [1, 1]} : vector<8x256xf32> to vector<8x64xf32>
    %679 = vector.extract_strided_slice %674 {offsets = [0, 192], sizes = [8, 64], strides = [1, 1]} : vector<8x256xf32> to vector<8x64xf32>
    %680 = arith.mulf %677, %664 : vector<8x64xf32>
    %681 = arith.mulf %676, %678 : vector<8x64xf32>
    %682 = arith.addf %680, %681 : vector<8x64xf32>
    %683 = math.tanh %682 : vector<8x64xf32>
    %684 = arith.mulf %679, %683 : vector<8x64xf32>
    %685 = vector.extract_strided_slice %628 {offsets = [24, 0], sizes = [8, 256], strides = [1, 1]} : vector<64x256xf32> to vector<8x256xf32>
    %cst_121 = arith.constant dense<0.000000e+00> : vector<8x256xf32>
    %686 = tpu.matmul %684, %624, %cst_121 {dimension_numbers = #tpu.dot_dimension_numbers<[1], [0], [0], [1], [0, 0, 1, 1], [], []>} : vector<8x64xf32>, vector<64x256xf32>, vector<8x256xf32> -> vector<8x256xf32>
    %687 = arith.addf %685, %686 : vector<8x256xf32>
    %688 = arith.negf %687 : vector<8x256xf32>
    %689 = math.exp %688 : vector<8x256xf32>
    %cst_122 = arith.constant 1.000000e+00 : f32
    %690 = vector.broadcast %cst_122 : f32 to vector<8x256xf32>
    %691 = arith.addf %690, %689 : vector<8x256xf32>
    %692 = arith.divf %690, %691 : vector<8x256xf32>
    %693 = math.tanh %687 : vector<8x256xf32>
    %694 = vector.extract_strided_slice %692 {offsets = [0, 0], sizes = [8, 64], strides = [1, 1]} : vector<8x256xf32> to vector<8x64xf32>
    %695 = vector.extract_strided_slice %692 {offsets = [0, 64], sizes = [8, 64], strides = [1, 1]} : vector<8x256xf32> to vector<8x64xf32>
    %696 = vector.extract_strided_slice %693 {offsets = [0, 128], sizes = [8, 64], strides = [1, 1]} : vector<8x256xf32> to vector<8x64xf32>
    %697 = vector.extract_strided_slice %692 {offsets = [0, 192], sizes = [8, 64], strides = [1, 1]} : vector<8x256xf32> to vector<8x64xf32>
    %698 = arith.mulf %695, %682 : vector<8x64xf32>
    %699 = arith.mulf %694, %696 : vector<8x64xf32>
    %700 = arith.addf %698, %699 : vector<8x64xf32>
    %701 = math.tanh %700 : vector<8x64xf32>
    %702 = arith.mulf %697, %701 : vector<8x64xf32>
    %703 = vector.extract_strided_slice %628 {offsets = [32, 0], sizes = [8, 256], strides = [1, 1]} : vector<64x256xf32> to vector<8x256xf32>
    %cst_123 = arith.constant dense<0.000000e+00> : vector<8x256xf32>
    %704 = tpu.matmul %702, %624, %cst_123 {dimension_numbers = #tpu.dot_dimension_numbers<[1], [0], [0], [1], [0, 0, 1, 1], [], []>} : vector<8x64xf32>, vector<64x256xf32>, vector<8x256xf32> -> vector<8x256xf32>
    %705 = arith.addf %703, %704 : vector<8x256xf32>
    %706 = arith.negf %705 : vector<8x256xf32>
    %707 = math.exp %706 : vector<8x256xf32>
    %cst_124 = arith.constant 1.000000e+00 : f32
    %708 = vector.broadcast %cst_124 : f32 to vector<8x256xf32>
    %709 = arith.addf %708, %707 : vector<8x256xf32>
    %710 = arith.divf %708, %709 : vector<8x256xf32>
    %711 = math.tanh %705 : vector<8x256xf32>
    %712 = vector.extract_strided_slice %710 {offsets = [0, 0], sizes = [8, 64], strides = [1, 1]} : vector<8x256xf32> to vector<8x64xf32>
    %713 = vector.extract_strided_slice %710 {offsets = [0, 64], sizes = [8, 64], strides = [1, 1]} : vector<8x256xf32> to vector<8x64xf32>
    %714 = vector.extract_strided_slice %711 {offsets = [0, 128], sizes = [8, 64], strides = [1, 1]} : vector<8x256xf32> to vector<8x64xf32>
    %715 = vector.extract_strided_slice %710 {offsets = [0, 192], sizes = [8, 64], strides = [1, 1]} : vector<8x256xf32> to vector<8x64xf32>
    %716 = arith.mulf %713, %700 : vector<8x64xf32>
    %717 = arith.mulf %712, %714 : vector<8x64xf32>
    %718 = arith.addf %716, %717 : vector<8x64xf32>
    %719 = math.tanh %718 : vector<8x64xf32>
    %720 = arith.mulf %715, %719 : vector<8x64xf32>
    %721 = vector.extract_strided_slice %628 {offsets = [40, 0], sizes = [8, 256], strides = [1, 1]} : vector<64x256xf32> to vector<8x256xf32>
    %cst_125 = arith.constant dense<0.000000e+00> : vector<8x256xf32>
    %722 = tpu.matmul %720, %624, %cst_125 {dimension_numbers = #tpu.dot_dimension_numbers<[1], [0], [0], [1], [0, 0, 1, 1], [], []>} : vector<8x64xf32>, vector<64x256xf32>, vector<8x256xf32> -> vector<8x256xf32>
    %723 = arith.addf %721, %722 : vector<8x256xf32>
    %724 = arith.negf %723 : vector<8x256xf32>
    %725 = math.exp %724 : vector<8x256xf32>
    %cst_126 = arith.constant 1.000000e+00 : f32
    %726 = vector.broadcast %cst_126 : f32 to vector<8x256xf32>
    %727 = arith.addf %726, %725 : vector<8x256xf32>
    %728 = arith.divf %726, %727 : vector<8x256xf32>
    %729 = math.tanh %723 : vector<8x256xf32>
    %730 = vector.extract_strided_slice %728 {offsets = [0, 0], sizes = [8, 64], strides = [1, 1]} : vector<8x256xf32> to vector<8x64xf32>
    %731 = vector.extract_strided_slice %728 {offsets = [0, 64], sizes = [8, 64], strides = [1, 1]} : vector<8x256xf32> to vector<8x64xf32>
    %732 = vector.extract_strided_slice %729 {offsets = [0, 128], sizes = [8, 64], strides = [1, 1]} : vector<8x256xf32> to vector<8x64xf32>
    %733 = vector.extract_strided_slice %728 {offsets = [0, 192], sizes = [8, 64], strides = [1, 1]} : vector<8x256xf32> to vector<8x64xf32>
    %734 = arith.mulf %731, %718 : vector<8x64xf32>
    %735 = arith.mulf %730, %732 : vector<8x64xf32>
    %736 = arith.addf %734, %735 : vector<8x64xf32>
    %737 = math.tanh %736 : vector<8x64xf32>
    %738 = arith.mulf %733, %737 : vector<8x64xf32>
    %739 = vector.extract_strided_slice %628 {offsets = [48, 0], sizes = [8, 256], strides = [1, 1]} : vector<64x256xf32> to vector<8x256xf32>
    %cst_127 = arith.constant dense<0.000000e+00> : vector<8x256xf32>
    %740 = tpu.matmul %738, %624, %cst_127 {dimension_numbers = #tpu.dot_dimension_numbers<[1], [0], [0], [1], [0, 0, 1, 1], [], []>} : vector<8x64xf32>, vector<64x256xf32>, vector<8x256xf32> -> vector<8x256xf32>
    %741 = arith.addf %739, %740 : vector<8x256xf32>
    %742 = arith.negf %741 : vector<8x256xf32>
    %743 = math.exp %742 : vector<8x256xf32>
    %cst_128 = arith.constant 1.000000e+00 : f32
    %744 = vector.broadcast %cst_128 : f32 to vector<8x256xf32>
    %745 = arith.addf %744, %743 : vector<8x256xf32>
    %746 = arith.divf %744, %745 : vector<8x256xf32>
    %747 = math.tanh %741 : vector<8x256xf32>
    %748 = vector.extract_strided_slice %746 {offsets = [0, 0], sizes = [8, 64], strides = [1, 1]} : vector<8x256xf32> to vector<8x64xf32>
    %749 = vector.extract_strided_slice %746 {offsets = [0, 64], sizes = [8, 64], strides = [1, 1]} : vector<8x256xf32> to vector<8x64xf32>
    %750 = vector.extract_strided_slice %747 {offsets = [0, 128], sizes = [8, 64], strides = [1, 1]} : vector<8x256xf32> to vector<8x64xf32>
    %751 = vector.extract_strided_slice %746 {offsets = [0, 192], sizes = [8, 64], strides = [1, 1]} : vector<8x256xf32> to vector<8x64xf32>
    %752 = arith.mulf %749, %736 : vector<8x64xf32>
    %753 = arith.mulf %748, %750 : vector<8x64xf32>
    %754 = arith.addf %752, %753 : vector<8x64xf32>
    %755 = math.tanh %754 : vector<8x64xf32>
    %756 = arith.mulf %751, %755 : vector<8x64xf32>
    %757 = vector.extract_strided_slice %628 {offsets = [56, 0], sizes = [8, 256], strides = [1, 1]} : vector<64x256xf32> to vector<8x256xf32>
    %cst_129 = arith.constant dense<0.000000e+00> : vector<8x256xf32>
    %758 = tpu.matmul %756, %624, %cst_129 {dimension_numbers = #tpu.dot_dimension_numbers<[1], [0], [0], [1], [0, 0, 1, 1], [], []>} : vector<8x64xf32>, vector<64x256xf32>, vector<8x256xf32> -> vector<8x256xf32>
    %759 = arith.addf %757, %758 : vector<8x256xf32>
    %760 = arith.negf %759 : vector<8x256xf32>
    %761 = math.exp %760 : vector<8x256xf32>
    %cst_130 = arith.constant 1.000000e+00 : f32
    %762 = vector.broadcast %cst_130 : f32 to vector<8x256xf32>
    %763 = arith.addf %762, %761 : vector<8x256xf32>
    %764 = arith.divf %762, %763 : vector<8x256xf32>
    %765 = math.tanh %759 : vector<8x256xf32>
    %766 = vector.extract_strided_slice %764 {offsets = [0, 0], sizes = [8, 64], strides = [1, 1]} : vector<8x256xf32> to vector<8x64xf32>
    %767 = vector.extract_strided_slice %764 {offsets = [0, 64], sizes = [8, 64], strides = [1, 1]} : vector<8x256xf32> to vector<8x64xf32>
    %768 = vector.extract_strided_slice %765 {offsets = [0, 128], sizes = [8, 64], strides = [1, 1]} : vector<8x256xf32> to vector<8x64xf32>
    %769 = vector.extract_strided_slice %764 {offsets = [0, 192], sizes = [8, 64], strides = [1, 1]} : vector<8x256xf32> to vector<8x64xf32>
    %770 = arith.mulf %767, %754 : vector<8x64xf32>
    %771 = arith.mulf %766, %768 : vector<8x64xf32>
    %772 = arith.addf %770, %771 : vector<8x64xf32>
    %773 = math.tanh %772 : vector<8x64xf32>
    %774 = arith.mulf %769, %773 : vector<8x64xf32>
    %c0_131 = arith.constant 0 : index
    %c0_132 = arith.constant 0 : index
    %775 = vector.load %arg4[%c0_131, %c0_132] : memref<64x8xf32, #tpu.memory_space<vmem>>, vector<64x8xf32>
    %cst_133 = arith.constant dense<0.000000e+00> : vector<8x8xf32>
    %776 = tpu.matmul %774, %775, %cst_133 {dimension_numbers = #tpu.dot_dimension_numbers<[1], [0], [0], [1], [0, 0, 1, 1], [], []>} : vector<8x64xf32>, vector<64x8xf32>, vector<8x8xf32> -> vector<8x8xf32>
    %c0_134 = arith.constant 0 : index
    %c0_135 = arith.constant 0 : index
    %777 = vector.load %arg5[%c0_134, %c0_135] : memref<1x8xf32, #tpu.memory_space<vmem>>, vector<1x8xf32>
    %778 = vector.broadcast %777 : vector<1x8xf32> to vector<8x8xf32>
    %779 = arith.addf %776, %778 : vector<8x8xf32>
    %780 = vector.extract_strided_slice %779 {offsets = [0, 0], sizes = [8, 4], strides = [1, 1]} : vector<8x8xf32> to vector<8x4xf32>
    %781 = vector.extract_strided_slice %779 {offsets = [0, 4], sizes = [8, 4], strides = [1, 1]} : vector<8x8xf32> to vector<8x4xf32>
    %782 = arith.addf %781, %780 : vector<8x4xf32>
    %cst_136 = arith.constant dense<0.000000e+00> : vector<8xf32>
    %783 = vector.multi_reduction <add>, %780, %cst_136 [1] : vector<8x4xf32> to vector<8xf32>
    %784 = vector.shape_cast %783 : vector<8xf32> to vector<8x1xf32>
    %cst_137 = arith.constant 4.000000e+00 : f32
    %785 = vector.broadcast %cst_137 : f32 to vector<8x1xf32>
    %786 = arith.divf %784, %785 : vector<8x1xf32>
    %787 = vector.broadcast %786 : vector<8x1xf32> to vector<8x4xf32>
    %788 = arith.subf %782, %787 : vector<8x4xf32>
    %c0_138 = arith.constant 0 : index
    %c0_139 = arith.constant 0 : index
    %789 = vector.load %arg6[%c0_138, %c0_139] : memref<8x4xf32, #tpu.memory_space<vmem>>, vector<8x4xf32>
    tpu.vector_store %arg6[%c0_138, %c0_139], %788 {strides = array<i32>} : memref<8x4xf32, #tpu.memory_space<vmem>>, vector<8x4xf32>,
    return
  }
}

</mosaic_0001>

<bundles_post_ra>
// kernel: tpu_custom_call.1
= control target key start
LH: loop header
LB: loop body
LE: loop exit
PB: predicated region body
PF: predicated region fallthrough
CT: control target
= control target key end

     0   :  { %11 = vsyncpa [#allocation3], 0  ;;  %s7157_s0 = inlined_call_operand.vmem [shape: f32[64,4], index: 0, kind: input, shape index: {}]   ;;  %s7158_s1 = inlined_call_operand.hbm [shape: f32[5,64,256], index: 1, kind: input, shape index: {}]   ;;  %s7159_s2 = inlined_call_operand.hbm [shape: f32[5,64,256], index: 2, kind: input, shape index: {}]   ;;  %s7160_s3 = inlined_call_operand.vmem [shape: f32[5,256], index: 3, kind: input, shape index: {}]   ;;  %s7161_s4 = inlined_call_operand.vmem [shape: f32[64,8], index: 4, kind: input, shape index: {}]   ;;  %s7162_s5 = inlined_call_operand.vmem [shape: f32[1,8], index: 5, kind: input, shape index: {}]   ;;  %s7163_s6 = inlined_call_operand.vmem [shape: f32[8,4], index: 6, kind: output, shape index: {}]  }
   0x1   :  { %12 = vsyncpa [#allocation5], 0  ;;  %s5930_s21 = smov [#allocation2]  }
   0x2   :  { %s20_s22 = sshll.u32 %s5930_s21, 4  ;;  %s21_s22 = int_to_ptr.vmem [resolvable:$true] %s20_s22 }
   0x3   :  { %s5894_s23 = scalar_lea.vmem %s21_s22, 10240  ;;  %p5899_p1 = scmp.lt.s32.totalorder %s21_s22, %s21_s22 }
   0x4   :  { %p5895_p0 = scmp.ne.s32.totalorder %s21_s22, %s5894_s23  ;;  %p5900_p2 = scmp.lt.s32.totalorder %s5894_s23, %s5894_s23 }
   0x6   :  { %p5901_p3 = por %p5900_p2, %p5899_p1 }
   0x8   :  { %p5902_p4 = pnand %p5901_p3, %p5895_p0 }
   0xa   :  { %5905 = shalt.err (!%p5902_p4)
}
   0xb   :  { %s5931_s24 = smov 256   ;;  %s5932_s25 = smov 16  }
   0xc   :  { %26 = dma.hbm_to_vmem [thread:$0]  %s7158_s1, 10240, %s21_s22, [#allocation3], %s5931_s24, %s5931_s24, %s5932_s25  }
   0xd   :  { %s5933_s28 = smov [#allocation4]  }
   0xe   :  { %s32_s29 = sshll.u32 %s5933_s28, 4  ;;  %s33_s29 = int_to_ptr.vmem [resolvable:$true] %s32_s29 }
   0xf   :  { %s5914_s30 = scalar_lea.vmem %s33_s29, 10240  ;;  %p5919_p6 = scmp.lt.s32.totalorder %s33_s29, %s33_s29 }
  0x10   :  { %p5915_p5 = scmp.ne.s32.totalorder %s33_s29, %s5914_s30  ;;  %p5920_p7 = scmp.lt.s32.totalorder %s5914_s30, %s5914_s30 }
  0x12   :  { %p5921_p8 = por %p5920_p7, %p5919_p6 }
  0x14   :  { %p5922_p9 = pnand %p5921_p8, %p5915_p5 }
  0x16   :  { %5925 = shalt.err (!%p5922_p9)
}
  0x17   :  { %38 = dma.hbm_to_vmem [thread:$0]  %s7159_s2, 10240, %s33_s29, [#allocation5], %s5931_s24, %s5931_s24, %s5932_s25  }
  0x18   :  { %5926 = dma.done.wait [#allocation3], 10240  }
  0x19   :  { %5927 = vsyncadd [#allocation3], 4294957056 }
  0x1a   :  { %5928 = dma.done.wait [#allocation5], 10240  }
  0x1b   :  { %5929 = vsyncadd [#allocation5], 4294957056  ;;  %v5934_v0 = vmov 0.0   ;;  %vm5935_vm0 = vmmov 0   ;;  %vm90_vm1 = vcmask 1043456   ;;  %vm65_vm2 = vcmask 31744  }
  0x1c   :  { %5169 = vmatprep.subr.mxu1 %v5934_v0  ;;  %5177 = vmatprep.mubr.msk.f32.mxu1 %vm5935_vm0, %v5934_v0  ;;  %v59_v1 = vld [vmem:[#allocation2] sm:$0xf]  ;;  %v5984_v2 = vld [vmem:[#allocation4 + $0x30] sm:$0xff]  ;;  %v52_v4 = vld [vmem:[%s7157_s0 + $0x8] sm:$0xff]  ;;  %s5936_s13 = smov 64   ;;  %s5937_s14 = smov 32  }
  0x1d   :  { %v51_v3 = vld [vmem:[%s7157_s0] sm:$0xff]  ;;  %5155 = vmatprep.subr.msk.mxu0 %vm90_vm1, %v59_v1  ;;  %5170 = vmatpush3.msra.mxu1 %v5984_v2  ;;  %v5998_v6 = vld [vmem:[#allocation4 + $0x10] sm:$0xff]  ;;  %vm199_vm3 = vcmask 261120   ;;  %v54_v44 = vld [vmem:[%s7157_s0 + $0x18] sm:$0xff]  ;;  %vm2987_vm4 = vcmask 523264   ;;  %s5938_s25 = smov 4  }
  0x1e   :  { %v5993_v5 = vld [vmem:[#allocation4 + $0x20] sm:$0xff]  ;;  %5156 = vmatpush3.msk.msra.mxu0 %vm90_vm1, %v59_v1  ;;  %5157 = vmatprep.mubr.msk.f32.mxu0 %vm65_vm2, %v51_v3  ;;  %v53_v43 = vld [vmem:[%s7157_s0 + $0x10] sm:$0xff]  ;;  %v56_v46 = vld [vmem:[%s7157_s0 + $0x28] sm:$0xff] }
  0x1f   :  { %5171 = vmatprep.subr.mxu1 %v5934_v0  ;;  %5158 = vmatmul.mubr.msk.f32.vlgmr.msra.gmra.mxu0 %vm65_vm2, %v52_v4  ;;  %v6003_v7 = vld [vmem:[#allocation4] sm:$0xff]  ;;  %v57_v47 = vld [vmem:[%s7157_s0 + $0x30] sm:$0xff]  ;;  %v58_v48 = vld [vmem:[%s7157_s0 + $0x38] sm:$0xff] }
  0x20   :  { %5172 = vmatpush3.msra.mxu1 %v5993_v5  ;;  %5191 = vmatprep.subr.mxu0 %v5934_v0  ;;  %v6031_v9 = vld [vmem:[%s7160_s3] ss:$0 sm:$0xff] }
  0x21   :  { %5173 = vmatprep.subr.mxu1 %v5934_v0  ;;  %5192 = vmatpush3.msra.mxu0 %v5984_v2  ;;  %v55_v45 = vld [vmem:[%s7157_s0 + $0x20] sm:$0xff] }
  0x22   :  { %5174 = vmatpush3.msra.mxu1 %v5998_v6  ;;  %5193 = vmatprep.subr.mxu0 %v5934_v0 }
  0x23   :  { %5175 = vmatprep.subr.mxu1 %v5934_v0  ;;  %5194 = vmatpush3.msra.mxu0 %v5993_v5 }
  0x24   :  { %5176 = vmatpush3.msra.mxu1 %v6003_v7  ;;  %5195 = vmatprep.subr.mxu0 %v5934_v0 }
  0x25   :  { %5178 = vmatmul.mubr.f32.vlgmr.msra.gmra.mxu1 %v5934_v0  ;;  %5180 = vmatprep.subr.mxu1 %v5934_v0 }
  0x26   :  { %5181 = vmatpush3.msra.mxu1 %v5984_v2  ;;  %5188 = vmatprep.mubr.msk.f32.mxu1 %vm5935_vm0, %v5934_v0 }
  0x27   :  { %5182 = vmatprep.subr.mxu1 %v5934_v0  ;;  %5196 = vmatpush3.msra.mxu0 %v5998_v6 }
  0x28   :  { %5183 = vmatpush3.msra.mxu1 %v5993_v5  ;;  %5197 = vmatprep.subr.mxu0 %v5934_v0 }
  0x29   :  { %5184 = vmatprep.subr.mxu1 %v5934_v0  ;;  %5198 = vmatpush3.msra.mxu0 %v6003_v7 }
  0x2a   :  { %5185 = vmatpush3.msra.mxu1 %v5998_v6  ;;  %5213 = vmatprep.subr.mxu0 %v5934_v0 }
  0x2b   :  { %5186 = vmatprep.subr.mxu1 %v5934_v0  ;;  %5160 = vmatprep.mubr.msk.f32.mxu0 %vm65_vm2, %v53_v43 }
  0x2c   :  { %5187 = vmatpush3.msra.mxu1 %v6003_v7  ;;  %5161 = vmatmul.mubr.msk.f32.gmra.mxu0 %vm65_vm2, %v54_v44 }
  0x2d   :  { %5202 = vmatprep.subr.mxu1 %v5934_v0  ;;  %5163 = vmatprep.mubr.msk.f32.mxu0 %vm65_vm2, %v55_v45 }
  0x30   :  { %5164 = vmatmul.mubr.msk.f32.gmra.mxu0 %vm65_vm2, %v56_v46 }
  0x31   :  { %5166 = vmatprep.mubr.msk.f32.mxu0 %vm65_vm2, %v57_v47 }
  0x34   :  { %5167 = vmatmul.mubr.msk.f32.gmra.mxu0 %vm65_vm2, %v58_v48 }
  0x35   :  { %5199 = vmatprep.mubr.msk.f32.mxu0 %vm5935_vm0, %v5934_v0 }
  0xdf   :  { %v5159_v8 = vpop.f32.mrf.mxu0 }
  0xe0   :  { %v166_v29 = vadd.f32 %v5159_v8, %v6031_v9 }
  0xe1   :  { %v160_v10 = vpop.f32.mrf.mxu0 }
  0xe2   :  { %v161_v11 = vadd.f32 %v160_v10, %v6031_v9 }
  0xe5   :  { %v269_v12 = vpop.f32.mrf.mxu1 }
  0xe6   :  { %v273_v13 = vadd.f32 %v269_v12, %v161_v11 }
  0xe7   :  { %v5179_v14 = vpop.f32.mrf.mxu1 }
  0xe8   :  { %5502 = vtanh.f32 %v273_v13  ;;  %v4866_v16 = vmul.f32 -1.442695, %v273_v13 }
  0xea   :  { %5504 = vpow2.f32 %v4866_v16 }
  0xec   :  { %v5162_v53 = vpop.f32.mrf.mxu0 }
  0xee   :  { %v170_v54 = vpop.f32.mrf.mxu0 }
  0xef   :  { %v171_v59 = vadd.f32 %v170_v54, %v6031_v9 }
  0xf0   :  { %v6097_v55 = vpop.f32.mrf.mxu0 }
  0xf2   :  { %v6099_v56 = vpop.f32.mrf.mxu0 }
  0xf4   :  { %v6101_v57 = vpop.f32.mrf.mxu0 }
  0xf5   :  { %v5503_v15 = vpop.eup %5502 }
  0xf6   :  { %283 = vrot.lane.b32.xlu0 %v5503_v15, %s5936_s13  ;;  %v6103_v58 = vpop.f32.mrf.mxu0 }
  0xf7   :  { %v5505_v17 = vpop.eup %5504 }
  0xf8   :  { %v277_v18 = vadd.f32 1.0, %v5505_v17 }
  0xfa   :  { %5506 = vrcp.f32 %v277_v18 }
 0x107   :  { %v5507_v19 = vpop.eup %5506 }
 0x108   :  { %v281_v22 = vmul.f32 0.0, %v5507_v19 }
 0x168   :  { %v284_v20 = vpop.permute.xlu0 %283 }
 0x169   :  { %v286_v21 = vmul.f32 %v5507_v19, %v284_v20 }
 0x16b   :  { %288 = vrot.lane.b32.xlu0 %v286_v21, %s5937_s14 }
 0x1dd   :  { %v289_v23 = vpop.permute.xlu0 %288 }
 0x1de   :  { %v291_v24 = vadd.f32 %v289_v23, %v281_v22 }
 0x1e0   :  { %5508 = vtanh.f32 %v291_v24 }
 0x1ed   :  { %v5509_v25 = vpop.eup %5508 }
 0x1ee   :  { %294 = vrot.lane.b32.xlu1 %v5509_v25, %s5936_s13 }
 0x260   :  { %v295_v26 = vpop.permute.xlu1 %294 }
 0x261   :  { %v297_v27 = vmul.f32 %v5507_v19, %v295_v26  ;;  %v176_v19 = vadd.f32 %v5162_v53, %v6031_v9 }
 0x263   :  { %299 = vrot.lane.b32.xlu1 %v297_v27, %s5937_s14 }
 0x2d5   :  { %v6038_v28 = vpop.permute.xlu1 %299 }
 0x2d6   :  { %5189 = vmatmul.mubr.msk.f32.vlgmr.msra.gmra.mxu1 %vm199_vm3, %v6038_v28 }
 0x2d7   :  { %5203 = vmatpush3.msra.mxu1 %v5984_v2  ;;  %5210 = vmatprep.mubr.msk.f32.mxu1 %vm5935_vm0, %v5934_v0 }
 0x2d8   :  { %5204 = vmatprep.subr.mxu1 %v5934_v0 }
 0x2d9   :  { %5205 = vmatpush3.msra.mxu1 %v5993_v5 }
 0x2da   :  { %5206 = vmatprep.subr.mxu1 %v5934_v0 }
 0x2db   :  { %5207 = vmatpush3.msra.mxu1 %v5998_v6 }
 0x2dc   :  { %5208 = vmatprep.subr.mxu1 %v5934_v0 }
 0x2dd   :  { %5209 = vmatpush3.msra.mxu1 %v6003_v7 }
 0x2de   :  { %5224 = vmatprep.subr.mxu1 %v5934_v0 }
 0x396   :  { %v369_v30 = vpop.f32.mrf.mxu1 }
 0x397   :  { %v373_v31 = vadd.f32 %v369_v30, %v166_v29 }
 0x398   :  { %v5190_v32 = vpop.f32.mrf.mxu1 }
 0x399   :  { %5510 = vtanh.f32 %v373_v31  ;;  %v4868_v34 = vmul.f32 -1.442695, %v373_v31 }
 0x39b   :  { %5512 = vpow2.f32 %v4868_v34 }
 0x3a6   :  { %v5511_v33 = vpop.eup %5510 }
 0x3a7   :  { %383 = vrot.lane.b32.xlu0 %v5511_v33, %s5936_s13 }
 0x3a8   :  { %v5513_v35 = vpop.eup %5512 }
 0x3a9   :  { %v377_v36 = vadd.f32 1.0, %v5513_v35 }
 0x3ab   :  { %5514 = vrcp.f32 %v377_v36 }
 0x3b8   :  { %v5515_v37 = vpop.eup %5514 }
 0x3b9   :  { %v381_v40 = vmul.f32 %v5515_v37, %v291_v24 }
 0x419   :  { %v384_v38 = vpop.permute.xlu0 %383 }
 0x41a   :  { %v386_v39 = vmul.f32 %v5515_v37, %v384_v38  ;;  %v181_v38 = vadd.f32 %v6099_v56, %v6031_v9 }
 0x41c   :  { %388 = vrot.lane.b32.xlu1 %v386_v39, %s5937_s14 }
 0x48e   :  { %v389_v41 = vpop.permute.xlu1 %388 }
 0x48f   :  { %v391_v42 = vadd.f32 %v389_v41, %v381_v40 }
 0x491   :  { %5516 = vtanh.f32 %v391_v42 }
 0x49e   :  { %v5517_v49 = vpop.eup %5516 }
 0x49f   :  { %394 = vrot.lane.b32.xlu0 %v5517_v49, %s5936_s13 }
 0x511   :  { %v395_v50 = vpop.permute.xlu0 %394 }
 0x512   :  { %v397_v51 = vmul.f32 %v5515_v37, %v395_v50 }
 0x514   :  { %399 = vrot.lane.b32.xlu1 %v397_v51, %s5937_s14 }
 0x586   :  { %v6083_v52 = vpop.permute.xlu1 %399 }
 0x587   :  { %5200 = vmatmul.mubr.msk.f32.vlgmr.msra.gmra.mxu0 %vm199_vm3, %v6083_v52 }
 0x588   :  { %5214 = vmatpush3.msra.mxu0 %v5984_v2  ;;  %5221 = vmatprep.mubr.msk.f32.mxu0 %vm5935_vm0, %v5934_v0 }
 0x589   :  { %5215 = vmatprep.subr.mxu0 %v5934_v0 }
 0x58a   :  { %5216 = vmatpush3.msra.mxu0 %v5993_v5 }
 0x58b   :  { %5217 = vmatprep.subr.mxu0 %v5934_v0 }
 0x58c   :  { %5218 = vmatpush3.msra.mxu0 %v5998_v6 }
 0x58d   :  { %5219 = vmatprep.subr.mxu0 %v5934_v0 }
 0x58e   :  { %5220 = vmatpush3.msra.mxu0 %v6003_v7 }
 0x58f   :  { %5235 = vmatprep.subr.mxu0 %v5934_v0 }
 0x647   :  { %v469_v60 = vpop.f32.mrf.mxu0 }
 0x648   :  { %v473_v61 = vadd.f32 %v469_v60, %v171_v59 }
 0x649   :  { %v5201_v62 = vpop.f32.mrf.mxu0 }
 0x64a   :  { %5518 = vtanh.f32 %v473_v61  ;;  %v4870_v1 = vmul.f32 -1.442695, %v473_v61 }
 0x64c   :  { %5520 = vpow2.f32 %v4870_v1 }
 0x657   :  { %v5519_v63 = vpop.eup %5518 }
 0x658   :  { %483 = vrot.lane.b32.xlu0 %v5519_v63, %s5936_s13 }
 0x659   :  { %v5521_v3 = vpop.eup %5520 }
 0x65a   :  { %v477_v4 = vadd.f32 1.0, %v5521_v3 }
 0x65c   :  { %5522 = vrcp.f32 %v477_v4 }
 0x669   :  { %v5523_v8 = vpop.eup %5522 }
 0x66a   :  { %v481_v12 = vmul.f32 %v5523_v8, %v391_v42 }
 0x6ca   :  { %v484_v10 = vpop.permute.xlu0 %483 }
 0x6cb   :  { %v486_v11 = vmul.f32 %v5523_v8, %v484_v10 }
 0x6cd   :  { %488 = vrot.lane.b32.xlu1 %v486_v11, %s5937_s14  ;;  %v1002_v11 = vld [vmem:[#allocation2 + $0xb0] sm:$0xff] }
 0x73f   :  { %v489_v13 = vpop.permute.xlu1 %488 }
 0x740   :  { %v491_v14 = vadd.f32 %v489_v13, %v481_v12 }
 0x742   :  { %5524 = vtanh.f32 %v491_v14 }
 0x74f   :  { %v5525_v15 = vpop.eup %5524 }
 0x750   :  { %494 = vrot.lane.b32.xlu0 %v5525_v15, %s5936_s13 }
 0x7c2   :  { %v495_v16 = vpop.permute.xlu0 %494 }
 0x7c3   :  { %v497_v17 = vmul.f32 %v5523_v8, %v495_v16  ;;  %v1001_v16 = vld [vmem:[#allocation2 + $0xa0] sm:$0xff] }
 0x7c5   :  { %499 = vrot.lane.b32.xlu1 %v497_v17, %s5937_s14  ;;  %v1000_v17 = vld [vmem:[#allocation2 + $0x90] sm:$0xff] }
 0x837   :  { %v6110_v18 = vpop.permute.xlu1 %499 }
 0x838   :  { %5211 = vmatmul.mubr.msk.f32.vlgmr.msra.gmra.mxu1 %vm199_vm3, %v6110_v18 }
 0x839   :  { %5225 = vmatpush3.msra.mxu1 %v5984_v2  ;;  %5232 = vmatprep.mubr.msk.f32.mxu1 %vm5935_vm0, %v5934_v0 }
 0x83a   :  { %5226 = vmatprep.subr.mxu1 %v5934_v0 }
 0x83b   :  { %5227 = vmatpush3.msra.mxu1 %v5993_v5 }
 0x83c   :  { %5228 = vmatprep.subr.mxu1 %v5934_v0 }
 0x83d   :  { %5229 = vmatpush3.msra.mxu1 %v5998_v6 }
 0x83e   :  { %5230 = vmatprep.subr.mxu1 %v5934_v0 }
 0x83f   :  { %5231 = vmatpush3.msra.mxu1 %v6003_v7 }
 0x840   :  { %5246 = vmatprep.subr.mxu1 %v5934_v0 }
 0x8f8   :  { %v569_v20 = vpop.f32.mrf.mxu1 }
 0x8f9   :  { %v573_v21 = vadd.f32 %v569_v20, %v176_v19  ;;  %v999_v19 = vld [vmem:[#allocation2 + $0x80] sm:$0xff] }
 0x8fa   :  { %v5212_v22 = vpop.f32.mrf.mxu1 }
 0x8fb   :  { %5526 = vtanh.f32 %v573_v21  ;;  %v4872_v24 = vmul.f32 -1.442695, %v573_v21 }
 0x8fd   :  { %5528 = vpow2.f32 %v4872_v24 }
 0x908   :  { %v5527_v23 = vpop.eup %5526 }
 0x909   :  { %583 = vrot.lane.b32.xlu0 %v5527_v23, %s5936_s13 }
 0x90a   :  { %v5529_v25 = vpop.eup %5528 }
 0x90b   :  { %v577_v26 = vadd.f32 1.0, %v5529_v25 }
 0x90d   :  { %5530 = vrcp.f32 %v577_v26 }
 0x91a   :  { %v5531_v27 = vpop.eup %5530 }
 0x91b   :  { %v581_v31 = vmul.f32 %v5531_v27, %v491_v14 }
 0x97b   :  { %v584_v29 = vpop.permute.xlu0 %583 }
 0x97c   :  { %v586_v30 = vmul.f32 %v5531_v27, %v584_v29 }
 0x97e   :  { %588 = vrot.lane.b32.xlu1 %v586_v30, %s5937_s14 }
 0x9f0   :  { %v589_v32 = vpop.permute.xlu1 %588 }
 0x9f1   :  { %v591_v33 = vadd.f32 %v589_v32, %v581_v31  ;;  %v6185_v32 = vld [vmem:[#allocation4 + $0xb0] sm:$0xff] }
 0x9f3   :  { %5532 = vtanh.f32 %v591_v33 }
 0xa00   :  { %v5533_v34 = vpop.eup %5532 }
 0xa01   :  { %594 = vrot.lane.b32.xlu0 %v5533_v34, %s5936_s13  ;;  %v6192_v34 = vld [vmem:[#allocation4 + $0x90] sm:$0xff] }
 0xa73   :  { %v595_v35 = vpop.permute.xlu0 %594 }
 0xa74   :  { %v597_v36 = vmul.f32 %v5531_v27, %v595_v35  ;;  %v6196_v35 = vld [vmem:[#allocation4 + $0x80] sm:$0xff] }
 0xa76   :  { %599 = vrot.lane.b32.xlu1 %v597_v36, %s5937_s14 }
 0xae8   :  { %v6129_v37 = vpop.permute.xlu1 %599 }
 0xae9   :  { %5222 = vmatmul.mubr.msk.f32.vlgmr.msra.gmra.mxu0 %vm199_vm3, %v6129_v37 }
 0xaea   :  { %5236 = vmatpush3.msra.mxu0 %v5984_v2  ;;  %5243 = vmatprep.mubr.msk.f32.mxu0 %vm5935_vm0, %v5934_v0 }
 0xaeb   :  { %5237 = vmatprep.subr.mxu0 %v5934_v0 }
 0xaec   :  { %5238 = vmatpush3.msra.mxu0 %v5993_v5 }
 0xaed   :  { %5239 = vmatprep.subr.mxu0 %v5934_v0 }
 0xaee   :  { %5240 = vmatpush3.msra.mxu0 %v5998_v6 }
 0xaef   :  { %5241 = vmatprep.subr.mxu0 %v5934_v0 }
 0xaf0   :  { %5242 = vmatpush3.msra.mxu0 %v6003_v7 }
 0xaf1   :  { %5257 = vmatprep.subr.mxu0 %v1002_v11 }
 0xba9   :  { %v669_v39 = vpop.f32.mrf.mxu0 }
 0xbaa   :  { %v673_v40 = vadd.f32 %v669_v39, %v181_v38  ;;  %v196_v39 = vadd.f32 %v6101_v57, %v6031_v9 }
 0xbab   :  { %v5223_v41 = vpop.f32.mrf.mxu0 }
 0xbac   :  { %5534 = vtanh.f32 %v673_v40  ;;  %v4874_v43 = vmul.f32 -1.442695, %v673_v40 }
 0xbae   :  { %5536 = vpow2.f32 %v4874_v43 }
 0xbb9   :  { %v5535_v42 = vpop.eup %5534 }
 0xbba   :  { %683 = vrot.lane.b32.xlu0 %v5535_v42, %s5936_s13 }
 0xbbb   :  { %v5537_v44 = vpop.eup %5536 }
 0xbbc   :  { %v677_v45 = vadd.f32 1.0, %v5537_v44 }
 0xbbe   :  { %5538 = vrcp.f32 %v677_v45  ;;  %v6232_v45 = vld [vmem:[%s7160_s3 + $0x1] ss:$0 sm:$0xff] }
 0xbcb   :  { %v5539_v46 = vpop.eup %5538 }
 0xbcc   :  { %v681_v49 = vmul.f32 %v5539_v46, %v591_v33  ;;  %v6188_v33 = vld [vmem:[#allocation4 + $0xa0] sm:$0xff] }
 0xc2c   :  { %v684_v47 = vpop.permute.xlu0 %683 }
 0xc2d   :  { %v686_v48 = vmul.f32 %v5539_v46, %v684_v47 }
 0xc2f   :  { %688 = vrot.lane.b32.xlu1 %v686_v48, %s5937_s14 }
 0xca1   :  { %v689_v50 = vpop.permute.xlu1 %688 }
 0xca2   :  { %v691_v51 = vadd.f32 %v689_v50, %v681_v49 }
 0xca4   :  { %5540 = vtanh.f32 %v691_v51 }
 0xcb1   :  { %v5541_v53 = vpop.eup %5540 }
 0xcb2   :  { %694 = vrot.lane.b32.xlu0 %v5541_v53, %s5936_s13 }
 0xd24   :  { %v695_v54 = vpop.permute.xlu0 %694 }
 0xd25   :  { %v697_v56 = vmul.f32 %v5539_v46, %v695_v54 }
 0xd27   :  { %699 = vrot.lane.b32.xlu1 %v697_v56, %s5937_s14 }
 0xd99   :  { %v700_v59 = vpop.permute.xlu1 %699 }
 0xd9a   :  { %5233 = vmatmul.mubr.msk.f32.vlgmr.msra.gmra.mxu1 %vm199_vm3, %v700_v59 }
 0xd9b   :  { %5247 = vmatpush3.msra.mxu1 %v5984_v2  ;;  %5254 = vmatprep.mubr.msk.f32.mxu1 %vm5935_vm0, %v5934_v0  ;;  %v186_v2 = vadd.f32 %v6097_v55, %v6031_v9 }
 0xd9c   :  { %5248 = vmatprep.subr.mxu1 %v5934_v0 }
 0xd9d   :  { %5249 = vmatpush3.msra.mxu1 %v5993_v5 }
 0xd9e   :  { %5250 = vmatprep.subr.mxu1 %v5934_v0 }
 0xd9f   :  { %5251 = vmatpush3.msra.mxu1 %v5998_v6 }
 0xda0   :  { %5252 = vmatprep.subr.mxu1 %v5934_v0 }
 0xda1   :  { %5253 = vmatpush3.msra.mxu1 %v6003_v7 }
 0xda2   :  { %5277 = vmatprep.subr.mxu1 %v5934_v0 }
 0xe5a   :  { %v769_v60 = vpop.f32.mrf.mxu1 }
 0xe5b   :  { %v773_v61 = vadd.f32 %v769_v60, %v186_v2 }
 0xe5c   :  { %v5234_v62 = vpop.f32.mrf.mxu1 }
 0xe5d   :  { %5542 = vtanh.f32 %v773_v61  ;;  %v4876_v5 = vmul.f32 -1.442695, %v773_v61 }
 0xe5f   :  { %5544 = vpow2.f32 %v4876_v5 }
 0xe6a   :  { %v5543_v63 = vpop.eup %5542 }
 0xe6b   :  { %783 = vrot.lane.b32.xlu0 %v5543_v63, %s5936_s13 }
 0xe6c   :  { %v5545_v1 = vpop.eup %5544 }
 0xe6d   :  { %v777_v6 = vadd.f32 1.0, %v5545_v1 }
 0xe6f   :  { %5546 = vrcp.f32 %v777_v6 }
 0xe7c   :  { %v5547_v3 = vpop.eup %5546 }
 0xe7d   :  { %v781_v8 = vmul.f32 %v5547_v3, %v691_v51 }
 0xedd   :  { %v784_v4 = vpop.permute.xlu0 %783 }
 0xede   :  { %v786_v7 = vmul.f32 %v5547_v3, %v784_v4 }
 0xee0   :  { %788 = vrot.lane.b32.xlu1 %v786_v7, %s5937_s14 }
 0xf52   :  { %v789_v10 = vpop.permute.xlu1 %788 }
 0xf53   :  { %v791_v55 = vadd.f32 %v789_v10, %v781_v8 }
 0xf55   :  { %5548 = vtanh.f32 %v791_v55 }
 0xf62   :  { %v5549_v12 = vpop.eup %5548 }
 0xf63   :  { %794 = vrot.lane.b32.xlu0 %v5549_v12, %s5936_s13 }
 0xfd5   :  { %v795_v13 = vpop.permute.xlu0 %794 }
 0xfd6   :  { %v797_v14 = vmul.f32 %v5547_v3, %v795_v13 }
 0xfd8   :  { %799 = vrot.lane.b32.xlu1 %v797_v14, %s5937_s14 }
0x104a   :  { %v800_v15 = vpop.permute.xlu1 %799 }
0x104b   :  { %5244 = vmatmul.mubr.msk.f32.vlgmr.msra.gmra.mxu0 %vm199_vm3, %v800_v15 }
0x104c   :  { %5258 = vmatpush3.msra.mxu0 %v1002_v11  ;;  %5265 = vmatprep.mubr.msk.f32.mxu0 %vm199_vm3, %v6038_v28  ;;  %v191_v28 = vadd.f32 %v6103_v58, %v6031_v9 }
0x104d   :  { %5259 = vmatprep.subr.mxu0 %v1001_v16 }
0x104e   :  { %5260 = vmatpush3.msra.mxu0 %v1001_v16 }
0x104f   :  { %5261 = vmatprep.subr.mxu0 %v1000_v17 }
0x1050   :  { %5262 = vmatpush3.msra.mxu0 %v1000_v17 }
0x1051   :  { %5263 = vmatprep.subr.mxu0 %v999_v19 }
0x1052   :  { %5264 = vmatpush3.msra.mxu0 %v999_v19 }
0x1053   :  { %5266 = vmatmul.mubr.msk.f32.vlgmr.msra.gmra.mxu0 %vm199_vm3, %v6083_v52  ;;  %5299 = vmatprep.subr.mxu0 %v5934_v0 }
0x1054   :  { %5268 = vmatprep.mubr.msk.f32.mxu0 %vm199_vm3, %v6110_v18  ;;  %5300 = vmatpush3.msra.mxu0 %v6185_v32 }
0x1055   :  { %5301 = vmatprep.subr.mxu0 %v5934_v0 }
0x1056   :  { %5302 = vmatpush3.msra.mxu0 %v6188_v33 }
0x1057   :  { %5269 = vmatmul.mubr.msk.f32.gmra.mxu0 %vm199_vm3, %v6129_v37  ;;  %5303 = vmatprep.subr.mxu0 %v5934_v0 }
0x1058   :  { %5271 = vmatprep.mubr.msk.f32.mxu0 %vm199_vm3, %v700_v59  ;;  %5304 = vmatpush3.msra.mxu0 %v6192_v34 }
0x1059   :  { %5305 = vmatprep.subr.mxu0 %v5934_v0 }
0x105a   :  { %5306 = vmatpush3.msra.mxu0 %v6196_v35 }
0x105b   :  { %5272 = vmatmul.mubr.msk.f32.gmra.mxu0 %vm199_vm3, %v800_v15  ;;  %5321 = vmatprep.subr.mxu0 %v5934_v0 }
0x110b   :  { %v869_v20 = vpop.f32.mrf.mxu0 }
0x110c   :  { %v873_v21 = vadd.f32 %v869_v20, %v191_v28 }
0x110d   :  { %v5245_v22 = vpop.f32.mrf.mxu0 }
0x110e   :  { %5550 = vtanh.f32 %v873_v21  ;;  %v4878_v23 = vmul.f32 -1.442695, %v873_v21 }
0x1110   :  { %5552 = vpow2.f32 %v4878_v23 }
0x1113   :  { %v6227_v40 = vpop.f32.mrf.mxu0 }
0x1114   :  { %v1086_v16 = vadd.f32 %v6227_v40, %v6232_v45 }
0x1115   :  { %v1080_v44 = vpop.f32.mrf.mxu0 }
0x1116   :  { %v1081_v46 = vadd.f32 %v1080_v44, %v6232_v45 }
0x111b   :  { %v5551_v52 = vpop.eup %5550 }
0x111c   :  { %883 = vrot.lane.b32.xlu0 %v5551_v52, %s5936_s13 }
0x111d   :  { %v5553_v18 = vpop.eup %5552 }
0x111e   :  { %v877_v24 = vadd.f32 1.0, %v5553_v18 }
0x1120   :  { %5554 = vrcp.f32 %v877_v24 }
0x112d   :  { %v5555_v25 = vpop.eup %5554 }
0x112e   :  { %v881_v29 = vmul.f32 %v5555_v25, %v791_v55 }
0x118e   :  { %v884_v26 = vpop.permute.xlu0 %883 }
0x118f   :  { %v886_v27 = vmul.f32 %v5555_v25, %v884_v26 }
0x1191   :  { %888 = vrot.lane.b32.xlu1 %v886_v27, %s5937_s14 }
0x1203   :  { %v889_v30 = vpop.permute.xlu1 %888 }
0x1204   :  { %v6181_v58 = vadd.f32 %v889_v30, %v881_v29 }
0x1206   :  { %5556 = vtanh.f32 %v6181_v58 }
0x1213   :  { %v5557_v31 = vpop.eup %5556 }
0x1214   :  { %894 = vrot.lane.b32.xlu0 %v5557_v31, %s5936_s13 }
0x1286   :  { %v895_v36 = vpop.permute.xlu0 %894 }
0x1287   :  { %v897_v37 = vmul.f32 %v5555_v25, %v895_v36 }
0x1289   :  { %899 = vrot.lane.b32.xlu1 %v897_v37, %s5937_s14  ;;  %v5270_v37 = vpop.f32.mrf.mxu0 }
0x12fb   :  { %v900_v38 = vpop.permute.xlu1 %899 }
0x12fc   :  { %5255 = vmatmul.mubr.msk.f32.vlgmr.msra.gmra.mxu1 %vm199_vm3, %v900_v38  ;;  %5274 = vmatprep.mubr.msk.f32.mxu0 %vm199_vm3, %v900_v38  ;;  %v1090_v38 = vpop.f32.mrf.mxu0 }
0x12fd   :  { %5278 = vmatpush3.msra.mxu1 %v6185_v32  ;;  %5285 = vmatprep.mubr.msk.f32.mxu1 %vm5935_vm0, %v5934_v0 }
0x12fe   :  { %5279 = vmatprep.subr.mxu1 %v5934_v0 }
0x12ff   :  { %5280 = vmatpush3.msra.mxu1 %v6188_v33 }
0x1300   :  { %5281 = vmatprep.subr.mxu1 %v5934_v0 }
0x1301   :  { %5282 = vmatpush3.msra.mxu1 %v6192_v34 }
0x1302   :  { %5283 = vmatprep.subr.mxu1 %v5934_v0 }
0x1303   :  { %5284 = vmatpush3.msra.mxu1 %v6196_v35 }
0x1304   :  { %5286 = vmatmul.mubr.f32.vlgmr.msra.gmra.mxu1 %v5934_v0  ;;  %5288 = vmatprep.subr.mxu1 %v5934_v0 }
0x1305   :  { %5289 = vmatpush3.msra.mxu1 %v6185_v32  ;;  %5296 = vmatprep.mubr.msk.f32.mxu1 %vm5935_vm0, %v5934_v0 }
0x1306   :  { %5290 = vmatprep.subr.mxu1 %v5934_v0 }
0x1307   :  { %5291 = vmatpush3.msra.mxu1 %v6188_v33 }
0x1308   :  { %5292 = vmatprep.subr.mxu1 %v5934_v0 }
0x1309   :  { %5293 = vmatpush3.msra.mxu1 %v6192_v34 }
0x130a   :  { %5294 = vmatprep.subr.mxu1 %v5934_v0 }
0x130b   :  { %5295 = vmatpush3.msra.mxu1 %v6196_v35 }
0x130c   :  { %5310 = vmatprep.subr.mxu1 %v5934_v0 }
0x13bc   :  { %v969_v41 = vpop.f32.mrf.mxu1 }
0x13bd   :  { %v973_v42 = vadd.f32 %v969_v41, %v196_v39  ;;  %v6281_v39 = vpop.f32.mrf.mxu0 }
0x13be   :  { %v5256_v43 = vpop.f32.mrf.mxu1 }
0x13bf   :  { %v4880_v63 = vmul.f32 -1.442695, %v973_v42  ;;  %v6283_v40 = vpop.f32.mrf.mxu0  ;;  %v1091_v43 = vadd.f32 %v1090_v38, %v6232_v45 }
0x13c4   :  { %v1185_v47 = vpop.f32.mrf.mxu1 }
0x13c5   :  { %v1189_v48 = vadd.f32 %v1185_v47, %v1081_v46 }
0x13c6   :  { %v5287_v49 = vpop.f32.mrf.mxu1 }
0x13c7   :  { %5558 = vtanh.f32 %v1189_v48  ;;  %v4889_v9 = vmul.f32 -1.442695, %v1189_v48 }
0x13c9   :  { %5560 = vpow2.f32 %v4889_v9 }
0x13d4   :  { %v5559_v50 = vpop.eup %5558 }
0x13d5   :  { %1199 = vrot.lane.b32.xlu0 %v5559_v50, %s5936_s13 }
0x13d6   :  { %v5561_v57 = vpop.eup %5560 }
0x13d7   :  { %v1193_v51 = vadd.f32 1.0, %v5561_v57 }
0x13d9   :  { %5562 = vrcp.f32 %v1193_v51 }
0x13e6   :  { %v5563_v53 = vpop.eup %5562 }
0x13e7   :  { %v1197_v59 = vmul.f32 0.0, %v5563_v53 }
0x1447   :  { %v1200_v54 = vpop.permute.xlu0 %1199 }
0x1448   :  { %v1202_v56 = vmul.f32 %v5563_v53, %v1200_v54 }
0x144a   :  { %1204 = vrot.lane.b32.xlu1 %v1202_v56, %s5937_s14 }
0x14bc   :  { %v1205_v2 = vpop.permute.xlu1 %1204 }
0x14bd   :  { %v1207_v60 = vadd.f32 %v1205_v2, %v1197_v59 }
0x14bf   :  { %5564 = vtanh.f32 %v1207_v60 }
0x14c0   :  { %5566 = vtanh.f32 %v973_v42 }
0x14c1   :  { %5568 = vpow2.f32 %v4880_v63  ;;  %v1096_v63 = vadd.f32 %v5270_v37, %v6232_v45 }
0x14cc   :  { %v5565_v61 = vpop.eup %5564 }
0x14cd   :  { %1210 = vrot.lane.b32.xlu0 %v5565_v61, %s5936_s13  ;;  %v5567_v62 = vpop.eup %5566 }
0x14ce   :  { %v5569_v5 = vpop.eup %5568 }
0x14cf   :  { %v977_v1 = vadd.f32 1.0, %v5569_v5 }
0x14d1   :  { %983 = vrot.lane.b32.xlu0 %v5567_v62, %s5936_s13  ;;  %5570 = vrcp.f32 %v977_v1 }
0x14de   :  { %v5571_v4 = vpop.eup %5570 }
0x14df   :  { %v981_v55 = vmul.f32 %v5571_v4, %v6181_v58 }
0x153f   :  { %v1211_v6 = vpop.permute.xlu0 %1210 }
0x1540   :  { %v1213_v3 = vmul.f32 %v5563_v53, %v1211_v6 }
0x1542   :  { %1215 = vrot.lane.b32.xlu1 %v1213_v3, %s5937_s14 }
0x1543   :  { %v984_v7 = vpop.permute.xlu0 %983 }
0x1544   :  { %v986_v8 = vmul.f32 %v5571_v4, %v984_v7 }
0x1546   :  { %988 = vrot.lane.b32.xlu0 %v986_v8, %s5937_s14 }
0x15b4   :  { %v6241_v10 = vpop.permute.xlu1 %1215 }
0x15b5   :  { %5297 = vmatmul.mubr.msk.f32.vlgmr.msra.gmra.mxu1 %vm199_vm3, %v6241_v10 }
0x15b6   :  { %5311 = vmatpush3.msra.mxu1 %v6185_v32  ;;  %5318 = vmatprep.mubr.msk.f32.mxu1 %vm5935_vm0, %v5934_v0 }
0x15b7   :  { %5312 = vmatprep.subr.mxu1 %v5934_v0 }
0x15b8   :  { %v989_v11 = vpop.permute.xlu0 %988  ;;  %5313 = vmatpush3.msra.mxu1 %v6188_v33 }
0x15b9   :  { %v991_v12 = vadd.f32 %v989_v11, %v981_v55  ;;  %5314 = vmatprep.subr.mxu1 %v5934_v0 }
0x15ba   :  { %5315 = vmatpush3.msra.mxu1 %v6192_v34 }
0x15bb   :  { %5572 = vtanh.f32 %v991_v12  ;;  %5316 = vmatprep.subr.mxu1 %v5934_v0 }
0x15bc   :  { %5317 = vmatpush3.msra.mxu1 %v6196_v35 }
0x15bd   :  { %5332 = vmatprep.subr.mxu1 %v5934_v0 }
0x15c8   :  { %v5573_v13 = vpop.eup %5572 }
0x15c9   :  { %994 = vrot.lane.b32.xlu0 %v5573_v13, %s5936_s13 }
0x163b   :  { %v995_v14 = vpop.permute.xlu0 %994 }
0x163c   :  { %v997_v15 = vmul.f32 %v5571_v4, %v995_v14 }
0x163e   :  { %1010 = vrot.lane.b32.xlu0 %v997_v15, %s5937_s14 }
0x1675   :  { %v1285_v17 = vpop.f32.mrf.mxu1 }
0x1676   :  { %v1289_v19 = vadd.f32 %v1285_v17, %v1086_v16 }
0x1677   :  { %v5298_v28 = vpop.f32.mrf.mxu1 }
0x1678   :  { %5574 = vtanh.f32 %v1289_v19  ;;  %v4891_v22 = vmul.f32 -1.442695, %v1289_v19 }
0x167a   :  { %5576 = vpow2.f32 %v4891_v22 }
0x1685   :  { %v5575_v20 = vpop.eup %5574 }
0x1686   :  { %1299 = vrot.lane.b32.xlu1 %v5575_v20, %s5936_s13  ;;  %v1101_v20 = vadd.f32 %v6283_v40, %v6232_v45 }
0x1687   :  { %v5577_v52 = vpop.eup %5576 }
0x1688   :  { %v1293_v23 = vadd.f32 1.0, %v5577_v52 }
0x168a   :  { %5578 = vrcp.f32 %v1293_v23 }
0x1697   :  { %v5579_v18 = vpop.eup %5578 }
0x1698   :  { %v1297_v26 = vmul.f32 %v5579_v18, %v1207_v60 }
0x16b0   :  { %v1011_v21 = vpop.permute.xlu0 %1010 }
0x16b1   :  { %5275 = vmatmul.mubr.msk.f32.gmra.mxu0 %vm199_vm3, %v1011_v21 }
0x16b2   :  { %5307 = vmatprep.mubr.msk.f32.mxu0 %vm5935_vm0, %v5934_v0 }
0x16f8   :  { %v1300_v24 = vpop.permute.xlu1 %1299 }
0x16f9   :  { %v1302_v25 = vmul.f32 %v5579_v18, %v1300_v24 }
0x16fb   :  { %1304 = vrot.lane.b32.xlu1 %v1302_v25, %s5937_s14 }
0x176d   :  { %v1305_v27 = vpop.permute.xlu1 %1304 }
0x176e   :  { %v1307_v29 = vadd.f32 %v1305_v27, %v1297_v26 }
0x1770   :  { %5580 = vtanh.f32 %v1307_v29 }
0x1771   :  { %v6285_v41 = vpop.f32.mrf.mxu0 }
0x1773   :  { %v6287_v42 = vpop.f32.mrf.mxu0 }
0x177d   :  { %v5581_v30 = vpop.eup %5580 }
0x177e   :  { %1310 = vrot.lane.b32.xlu1 %v5581_v30, %s5936_s13 }
0x17f0   :  { %v1311_v58 = vpop.permute.xlu1 %1310 }
0x17f1   :  { %v1313_v31 = vmul.f32 %v5579_v18, %v1311_v58 }
0x17f3   :  { %1315 = vrot.lane.b32.xlu1 %v1313_v31, %s5937_s14 }
0x1865   :  { %v6267_v36 = vpop.permute.xlu1 %1315 }
0x1866   :  { %5308 = vmatmul.mubr.msk.f32.vlgmr.msra.gmra.mxu0 %vm199_vm3, %v6267_v36 }
0x1867   :  { %5322 = vmatpush3.msra.mxu0 %v6185_v32  ;;  %5329 = vmatprep.mubr.msk.f32.mxu0 %vm5935_vm0, %v5934_v0 }
0x1868   :  { %5323 = vmatprep.subr.mxu0 %v5934_v0 }
0x1869   :  { %5324 = vmatpush3.msra.mxu0 %v6188_v33 }
0x186a   :  { %5325 = vmatprep.subr.mxu0 %v5934_v0 }
0x186b   :  { %5326 = vmatpush3.msra.mxu0 %v6192_v34 }
0x186c   :  { %5327 = vmatprep.subr.mxu0 %v5934_v0 }
0x186d   :  { %5328 = vmatpush3.msra.mxu0 %v6196_v35 }
0x186e   :  { %5343 = vmatprep.subr.mxu0 %v5934_v0 }
0x1926   :  { %v1385_v44 = vpop.f32.mrf.mxu0 }
0x1927   :  { %v1389_v46 = vadd.f32 %v1385_v44, %v1091_v43 }
0x1928   :  { %v5309_v47 = vpop.f32.mrf.mxu0 }
0x1929   :  { %5582 = vtanh.f32 %v1389_v46  ;;  %v4893_v49 = vmul.f32 -1.442695, %v1389_v46 }
0x192b   :  { %5584 = vpow2.f32 %v4893_v49 }
0x1936   :  { %v5583_v48 = vpop.eup %5582 }
0x1937   :  { %1399 = vrot.lane.b32.xlu0 %v5583_v48, %s5936_s13 }
0x1938   :  { %v5585_v50 = vpop.eup %5584 }
0x1939   :  { %v1393_v9 = vadd.f32 1.0, %v5585_v50 }
0x193b   :  { %5586 = vrcp.f32 %v1393_v9 }
0x1948   :  { %v5587_v57 = vpop.eup %5586 }
0x1949   :  { %v1397_v54 = vmul.f32 %v5587_v57, %v1307_v29 }
0x19a9   :  { %v1400_v51 = vpop.permute.xlu0 %1399 }
0x19aa   :  { %v1402_v53 = vmul.f32 %v5587_v57, %v1400_v51 }
0x19ac   :  { %1404 = vrot.lane.b32.xlu1 %v1402_v53, %s5937_s14  ;;  %v1918_v53 = vld [vmem:[#allocation2 + $0x130] sm:$0xff] }
0x1a1e   :  { %v1405_v56 = vpop.permute.xlu1 %1404 }
0x1a1f   :  { %v1407_v59 = vadd.f32 %v1405_v56, %v1397_v54 }
0x1a21   :  { %5588 = vtanh.f32 %v1407_v59 }
0x1a2e   :  { %v5589_v2 = vpop.eup %5588 }
0x1a2f   :  { %1410 = vrot.lane.b32.xlu0 %v5589_v2, %s5936_s13 }
0x1aa1   :  { %v1411_v60 = vpop.permute.xlu0 %1410 }
0x1aa2   :  { %v1413_v61 = vmul.f32 %v5587_v57, %v1411_v60  ;;  %v1917_v60 = vld [vmem:[#allocation2 + $0x120] sm:$0xff] }
0x1aa4   :  { %1415 = vrot.lane.b32.xlu1 %v1413_v61, %s5937_s14  ;;  %v1916_v61 = vld [vmem:[#allocation2 + $0x110] sm:$0xff] }
0x1b16   :  { %v6294_v62 = vpop.permute.xlu1 %1415 }
0x1b17   :  { %5319 = vmatmul.mubr.msk.f32.vlgmr.msra.gmra.mxu1 %vm199_vm3, %v6294_v62 }
0x1b18   :  { %5333 = vmatpush3.msra.mxu1 %v6185_v32  ;;  %5340 = vmatprep.mubr.msk.f32.mxu1 %vm5935_vm0, %v5934_v0 }
0x1b19   :  { %5334 = vmatprep.subr.mxu1 %v5934_v0 }
0x1b1a   :  { %5335 = vmatpush3.msra.mxu1 %v6188_v33 }
0x1b1b   :  { %5336 = vmatprep.subr.mxu1 %v5934_v0 }
0x1b1c   :  { %5337 = vmatpush3.msra.mxu1 %v6192_v34 }
0x1b1d   :  { %5338 = vmatprep.subr.mxu1 %v5934_v0 }
0x1b1e   :  { %5339 = vmatpush3.msra.mxu1 %v6196_v35 }
0x1b1f   :  { %5354 = vmatprep.subr.mxu1 %v5934_v0 }
0x1bd7   :  { %v1485_v5 = vpop.f32.mrf.mxu1 }
0x1bd8   :  { %v1489_v1 = vadd.f32 %v1485_v5, %v1096_v63  ;;  %v1915_v63 = vld [vmem:[#allocation2 + $0x100] sm:$0xff] }
0x1bd9   :  { %v5320_v6 = vpop.f32.mrf.mxu1 }
0x1bda   :  { %5590 = vtanh.f32 %v1489_v1  ;;  %v4895_v4 = vmul.f32 -1.442695, %v1489_v1 }
0x1bdc   :  { %5592 = vpow2.f32 %v4895_v4 }
0x1be7   :  { %v5591_v3 = vpop.eup %5590 }
0x1be8   :  { %1499 = vrot.lane.b32.xlu0 %v5591_v3, %s5936_s13 }
0x1be9   :  { %v5593_v7 = vpop.eup %5592 }
0x1bea   :  { %v1493_v8 = vadd.f32 1.0, %v5593_v7 }
0x1bec   :  { %5594 = vrcp.f32 %v1493_v8 }
0x1bf9   :  { %v5595_v55 = vpop.eup %5594 }
0x1bfa   :  { %v1497_v13 = vmul.f32 %v5595_v55, %v1407_v59 }
0x1c5a   :  { %v1500_v11 = vpop.permute.xlu0 %1499 }
0x1c5b   :  { %v1502_v12 = vmul.f32 %v5595_v55, %v1500_v11 }
0x1c5d   :  { %1504 = vrot.lane.b32.xlu1 %v1502_v12, %s5937_s14 }
0x1ccf   :  { %v1505_v14 = vpop.permute.xlu1 %1504 }
0x1cd0   :  { %v1507_v15 = vadd.f32 %v1505_v14, %v1497_v13  ;;  %v6369_v14 = vld [vmem:[#allocation4 + $0x130] sm:$0xff] }
0x1cd2   :  { %5596 = vtanh.f32 %v1507_v15 }
0x1cdf   :  { %v5597_v16 = vpop.eup %5596 }
0x1ce0   :  { %1510 = vrot.lane.b32.xlu0 %v5597_v16, %s5936_s13  ;;  %v6376_v16 = vld [vmem:[#allocation4 + $0x110] sm:$0xff] }
0x1d52   :  { %v1511_v17 = vpop.permute.xlu0 %1510 }
0x1d53   :  { %v1513_v19 = vmul.f32 %v5595_v55, %v1511_v17  ;;  %v6380_v17 = vld [vmem:[#allocation4 + $0x100] sm:$0xff] }
0x1d55   :  { %1515 = vrot.lane.b32.xlu1 %v1513_v19, %s5937_s14 }
0x1dc7   :  { %v6313_v28 = vpop.permute.xlu1 %1515 }
0x1dc8   :  { %5330 = vmatmul.mubr.msk.f32.vlgmr.msra.gmra.mxu0 %vm199_vm3, %v6313_v28 }
0x1dc9   :  { %5344 = vmatpush3.msra.mxu0 %v6185_v32  ;;  %5351 = vmatprep.mubr.msk.f32.mxu0 %vm5935_vm0, %v5934_v0 }
0x1dca   :  { %5345 = vmatprep.subr.mxu0 %v5934_v0 }
0x1dcb   :  { %5346 = vmatpush3.msra.mxu0 %v6188_v33 }
0x1dcc   :  { %5347 = vmatprep.subr.mxu0 %v5934_v0 }
0x1dcd   :  { %5348 = vmatpush3.msra.mxu0 %v6192_v34 }
0x1dce   :  { %5349 = vmatprep.subr.mxu0 %v5934_v0 }
0x1dcf   :  { %5350 = vmatpush3.msra.mxu0 %v6196_v35 }
0x1dd0   :  { %5365 = vmatprep.subr.mxu0 %v1918_v53 }
0x1e88   :  { %v1585_v21 = vpop.f32.mrf.mxu0 }
0x1e89   :  { %v1589_v22 = vadd.f32 %v1585_v21, %v1101_v20  ;;  %v1116_v21 = vadd.f32 %v6285_v41, %v6232_v45 }
0x1e8a   :  { %v5331_v52 = vpop.f32.mrf.mxu0 }
0x1e8b   :  { %5598 = vtanh.f32 %v1589_v22  ;;  %v4897_v18 = vmul.f32 -1.442695, %v1589_v22 }
0x1e8d   :  { %5600 = vpow2.f32 %v4897_v18 }
0x1e98   :  { %v5599_v23 = vpop.eup %5598 }
0x1e99   :  { %1599 = vrot.lane.b32.xlu0 %v5599_v23, %s5936_s13 }
0x1e9a   :  { %v5601_v24 = vpop.eup %5600 }
0x1e9b   :  { %v1593_v25 = vadd.f32 1.0, %v5601_v24 }
0x1e9d   :  { %5602 = vrcp.f32 %v1593_v25  ;;  %v6416_v25 = vld [vmem:[%s7160_s3 + $0x2] ss:$0 sm:$0xff] }
0x1eaa   :  { %v5603_v26 = vpop.eup %5602 }
0x1eab   :  { %v1597_v30 = vmul.f32 %v5603_v26, %v1507_v15  ;;  %v6372_v15 = vld [vmem:[#allocation4 + $0x120] sm:$0xff] }
0x1f0b   :  { %v1600_v27 = vpop.permute.xlu0 %1599 }
0x1f0c   :  { %v1602_v29 = vmul.f32 %v5603_v26, %v1600_v27 }
0x1f0e   :  { %1604 = vrot.lane.b32.xlu1 %v1602_v29, %s5937_s14 }
0x1f80   :  { %v1605_v58 = vpop.permute.xlu1 %1604 }
0x1f81   :  { %v1607_v31 = vadd.f32 %v1605_v58, %v1597_v30 }
0x1f83   :  { %5604 = vtanh.f32 %v1607_v31 }
0x1f90   :  { %v5605_v37 = vpop.eup %5604 }
0x1f91   :  { %1610 = vrot.lane.b32.xlu0 %v5605_v37, %s5936_s13 }
0x2003   :  { %v1611_v38 = vpop.permute.xlu0 %1610 }
0x2004   :  { %v1613_v40 = vmul.f32 %v5603_v26, %v1611_v38 }
0x2006   :  { %1615 = vrot.lane.b32.xlu1 %v1613_v40, %s5937_s14 }
0x2078   :  { %v1616_v43 = vpop.permute.xlu1 %1615 }
0x2079   :  { %5341 = vmatmul.mubr.msk.f32.vlgmr.msra.gmra.mxu1 %vm199_vm3, %v1616_v43 }
0x207a   :  { %5355 = vmatpush3.msra.mxu1 %v6185_v32  ;;  %5362 = vmatprep.mubr.msk.f32.mxu1 %vm5935_vm0, %v5934_v0  ;;  %v1106_v32 = vadd.f32 %v6281_v39, %v6232_v45 }
0x207b   :  { %5356 = vmatprep.subr.mxu1 %v5934_v0 }
0x207c   :  { %5357 = vmatpush3.msra.mxu1 %v6188_v33 }
0x207d   :  { %5358 = vmatprep.subr.mxu1 %v5934_v0 }
0x207e   :  { %5359 = vmatpush3.msra.mxu1 %v6192_v34 }
0x207f   :  { %5360 = vmatprep.subr.mxu1 %v5934_v0 }
0x2080   :  { %5361 = vmatpush3.msra.mxu1 %v6196_v35 }
0x2081   :  { %5385 = vmatprep.subr.mxu1 %v5934_v0 }
0x2139   :  { %v1685_v44 = vpop.f32.mrf.mxu1 }
0x213a   :  { %v1689_v46 = vadd.f32 %v1685_v44, %v1106_v32 }
0x213b   :  { %v5342_v47 = vpop.f32.mrf.mxu1 }
0x213c   :  { %5606 = vtanh.f32 %v1689_v46  ;;  %v4899_v33 = vmul.f32 -1.442695, %v1689_v46 }
0x213e   :  { %5608 = vpow2.f32 %v4899_v33 }
0x2149   :  { %v5607_v48 = vpop.eup %5606 }
0x214a   :  { %1699 = vrot.lane.b32.xlu0 %v5607_v48, %s5936_s13 }
0x214b   :  { %v5609_v49 = vpop.eup %5608 }
0x214c   :  { %v1693_v34 = vadd.f32 1.0, %v5609_v49 }
0x214e   :  { %5610 = vrcp.f32 %v1693_v34 }
0x215b   :  { %v5611_v50 = vpop.eup %5610 }
0x215c   :  { %v1697_v57 = vmul.f32 %v5611_v50, %v1607_v31 }
0x21bc   :  { %v1700_v9 = vpop.permute.xlu0 %1699 }
0x21bd   :  { %v1702_v35 = vmul.f32 %v5611_v50, %v1700_v9 }
0x21bf   :  { %1704 = vrot.lane.b32.xlu1 %v1702_v35, %s5937_s14 }
0x2231   :  { %v1705_v51 = vpop.permute.xlu1 %1704 }
0x2232   :  { %v1707_v39 = vadd.f32 %v1705_v51, %v1697_v57 }
0x2234   :  { %5612 = vtanh.f32 %v1707_v39 }
0x2241   :  { %v5613_v54 = vpop.eup %5612 }
0x2242   :  { %1710 = vrot.lane.b32.xlu0 %v5613_v54, %s5936_s13 }
0x22b4   :  { %v1711_v56 = vpop.permute.xlu0 %1710 }
0x22b5   :  { %v1713_v59 = vmul.f32 %v5611_v50, %v1711_v56 }
0x22b7   :  { %1715 = vrot.lane.b32.xlu1 %v1713_v59, %s5937_s14 }
0x2329   :  { %v1716_v2 = vpop.permute.xlu1 %1715 }
0x232a   :  { %5352 = vmatmul.mubr.msk.f32.vlgmr.msra.gmra.mxu0 %vm199_vm3, %v1716_v2 }
0x232b   :  { %5366 = vmatpush3.msra.mxu0 %v1918_v53  ;;  %5373 = vmatprep.mubr.msk.f32.mxu0 %vm199_vm3, %v6241_v10  ;;  %v1111_v10 = vadd.f32 %v6287_v42, %v6232_v45 }
0x232c   :  { %5367 = vmatprep.subr.mxu0 %v1917_v60 }
0x232d   :  { %5368 = vmatpush3.msra.mxu0 %v1917_v60 }
0x232e   :  { %5369 = vmatprep.subr.mxu0 %v1916_v61 }
0x232f   :  { %5370 = vmatpush3.msra.mxu0 %v1916_v61 }
0x2330   :  { %5371 = vmatprep.subr.mxu0 %v1915_v63 }
0x2331   :  { %5372 = vmatpush3.msra.mxu0 %v1915_v63 }
0x2332   :  { %5374 = vmatmul.mubr.msk.f32.vlgmr.msra.gmra.mxu0 %vm199_vm3, %v6267_v36  ;;  %5407 = vmatprep.subr.mxu0 %v5934_v0 }
0x2333   :  { %5376 = vmatprep.mubr.msk.f32.mxu0 %vm199_vm3, %v6294_v62  ;;  %5408 = vmatpush3.msra.mxu0 %v6369_v14 }
0x2334   :  { %5409 = vmatprep.subr.mxu0 %v5934_v0 }
0x2335   :  { %5410 = vmatpush3.msra.mxu0 %v6372_v15 }
0x2336   :  { %5377 = vmatmul.mubr.msk.f32.gmra.mxu0 %vm199_vm3, %v6313_v28  ;;  %5411 = vmatprep.subr.mxu0 %v5934_v0 }
0x2337   :  { %5379 = vmatprep.mubr.msk.f32.mxu0 %vm199_vm3, %v1616_v43  ;;  %5412 = vmatpush3.msra.mxu0 %v6376_v16 }
0x2338   :  { %5413 = vmatprep.subr.mxu0 %v5934_v0 }
0x2339   :  { %5414 = vmatpush3.msra.mxu0 %v6380_v17 }
0x233a   :  { %5380 = vmatmul.mubr.msk.f32.gmra.mxu0 %vm199_vm3, %v1716_v2  ;;  %5429 = vmatprep.subr.mxu0 %v5934_v0 }
0x23ea   :  { %v1785_v5 = vpop.f32.mrf.mxu0 }
0x23eb   :  { %v1789_v1 = vadd.f32 %v1785_v5, %v1111_v10 }
0x23ec   :  { %v5353_v6 = vpop.f32.mrf.mxu0 }
0x23ed   :  { %5614 = vtanh.f32 %v1789_v1  ;;  %v4901_v3 = vmul.f32 -1.442695, %v1789_v1 }
0x23ef   :  { %5616 = vpow2.f32 %v4901_v3 }
0x23f2   :  { %v6411_v22 = vpop.f32.mrf.mxu0 }
0x23f3   :  { %v2002_v60 = vadd.f32 %v6411_v22, %v6416_v25 }
0x23f4   :  { %v1996_v24 = vpop.f32.mrf.mxu0 }
0x23f5   :  { %v1997_v26 = vadd.f32 %v1996_v24, %v6416_v25 }
0x23fa   :  { %v5615_v36 = vpop.eup %5614 }
0x23fb   :  { %1799 = vrot.lane.b32.xlu0 %v5615_v36, %s5936_s13 }
0x23fc   :  { %v5617_v62 = vpop.eup %5616 }
0x23fd   :  { %v1793_v4 = vadd.f32 1.0, %v5617_v62 }
0x23ff   :  { %5618 = vrcp.f32 %v1793_v4 }
0x240c   :  { %v5619_v7 = vpop.eup %5618 }
0x240d   :  { %v1797_v11 = vmul.f32 %v5619_v7, %v1707_v39 }
0x246d   :  { %v1800_v8 = vpop.permute.xlu0 %1799 }
0x246e   :  { %v1802_v55 = vmul.f32 %v5619_v7, %v1800_v8 }
0x2470   :  { %1804 = vrot.lane.b32.xlu1 %v1802_v55, %s5937_s14 }
0x24e2   :  { %v1805_v12 = vpop.permute.xlu1 %1804 }
0x24e3   :  { %v6365_v42 = vadd.f32 %v1805_v12, %v1797_v11 }
0x24e5   :  { %5620 = vtanh.f32 %v6365_v42 }
0x24f2   :  { %v5621_v13 = vpop.eup %5620 }
0x24f3   :  { %1810 = vrot.lane.b32.xlu0 %v5621_v13, %s5936_s13 }
0x2565   :  { %v1811_v19 = vpop.permute.xlu0 %1810 }
0x2566   :  { %v1813_v28 = vmul.f32 %v5619_v7, %v1811_v19 }
0x2568   :  { %1815 = vrot.lane.b32.xlu1 %v1813_v28, %s5937_s14  ;;  %v5378_v28 = vpop.f32.mrf.mxu0 }
0x25da   :  { %v1816_v20 = vpop.permute.xlu1 %1815 }
0x25db   :  { %5363 = vmatmul.mubr.msk.f32.vlgmr.msra.gmra.mxu1 %vm199_vm3, %v1816_v20  ;;  %5382 = vmatprep.mubr.msk.f32.mxu0 %vm199_vm3, %v1816_v20  ;;  %v2006_v20 = vpop.f32.mrf.mxu0 }
0x25dc   :  { %5386 = vmatpush3.msra.mxu1 %v6369_v14  ;;  %5393 = vmatprep.mubr.msk.f32.mxu1 %vm5935_vm0, %v5934_v0 }
0x25dd   :  { %5387 = vmatprep.subr.mxu1 %v5934_v0 }
0x25de   :  { %5388 = vmatpush3.msra.mxu1 %v6372_v15 }
0x25df   :  { %5389 = vmatprep.subr.mxu1 %v5934_v0 }
0x25e0   :  { %5390 = vmatpush3.msra.mxu1 %v6376_v16 }
0x25e1   :  { %5391 = vmatprep.subr.mxu1 %v5934_v0 }
0x25e2   :  { %5392 = vmatpush3.msra.mxu1 %v6380_v17 }
0x25e3   :  { %5394 = vmatmul.mubr.f32.vlgmr.msra.gmra.mxu1 %v5934_v0  ;;  %5396 = vmatprep.subr.mxu1 %v5934_v0 }
0x25e4   :  { %5397 = vmatpush3.msra.mxu1 %v6369_v14  ;;  %5404 = vmatprep.mubr.msk.f32.mxu1 %vm5935_vm0, %v5934_v0 }
0x25e5   :  { %5398 = vmatprep.subr.mxu1 %v5934_v0 }
0x25e6   :  { %5399 = vmatpush3.msra.mxu1 %v6372_v15 }
0x25e7   :  { %5400 = vmatprep.subr.mxu1 %v5934_v0 }
0x25e8   :  { %5401 = vmatpush3.msra.mxu1 %v6376_v16 }
0x25e9   :  { %5402 = vmatprep.subr.mxu1 %v5934_v0 }
0x25ea   :  { %5403 = vmatpush3.msra.mxu1 %v6380_v17 }
0x25eb   :  { %5418 = vmatprep.subr.mxu1 %v5934_v0 }
0x269b   :  { %v1885_v52 = vpop.f32.mrf.mxu1 }
0x269c   :  { %v1889_v23 = vadd.f32 %v1885_v52, %v1116_v21  ;;  %v6465_v21 = vpop.f32.mrf.mxu0 }
0x269d   :  { %v5364_v18 = vpop.f32.mrf.mxu1 }
0x269e   :  { %v4903_v48 = vmul.f32 -1.442695, %v1889_v23  ;;  %v6467_v22 = vpop.f32.mrf.mxu0  ;;  %v2007_v18 = vadd.f32 %v2006_v20, %v6416_v25 }
0x26a3   :  { %v2101_v27 = vpop.f32.mrf.mxu1 }
0x26a4   :  { %v2105_v29 = vadd.f32 %v2101_v27, %v1997_v26 }
0x26a5   :  { %v5395_v30 = vpop.f32.mrf.mxu1 }
0x26a6   :  { %5622 = vtanh.f32 %v2105_v29  ;;  %v4912_v45 = vmul.f32 -1.442695, %v2105_v29 }
0x26a8   :  { %5624 = vpow2.f32 %v4912_v45 }
0x26b3   :  { %v5623_v58 = vpop.eup %5622 }
0x26b4   :  { %2115 = vrot.lane.b32.xlu0 %v5623_v58, %s5936_s13 }
0x26b5   :  { %v5625_v41 = vpop.eup %5624 }
0x26b6   :  { %v2109_v31 = vadd.f32 1.0, %v5625_v41 }
0x26b8   :  { %5626 = vrcp.f32 %v2109_v31 }
0x26c5   :  { %v5627_v37 = vpop.eup %5626 }
0x26c6   :  { %v2113_v43 = vmul.f32 0.0, %v5627_v37 }
0x2726   :  { %v2116_v38 = vpop.permute.xlu0 %2115 }
0x2727   :  { %v2118_v40 = vmul.f32 %v5627_v37, %v2116_v38 }
0x2729   :  { %2120 = vrot.lane.b32.xlu1 %v2118_v40, %s5937_s14 }
0x279b   :  { %v2121_v32 = vpop.permute.xlu1 %2120 }
0x279c   :  { %v2123_v44 = vadd.f32 %v2121_v32, %v2113_v43 }
0x279e   :  { %5628 = vtanh.f32 %v2123_v44 }
0x279f   :  { %5630 = vtanh.f32 %v1889_v23 }
0x27a0   :  { %5632 = vpow2.f32 %v4903_v48  ;;  %v2012_v48 = vadd.f32 %v5378_v28, %v6416_v25 }
0x27ab   :  { %v5629_v46 = vpop.eup %5628 }
0x27ac   :  { %2126 = vrot.lane.b32.xlu0 %v5629_v46, %s5936_s13  ;;  %v5631_v47 = vpop.eup %5630 }
0x27ad   :  { %v5633_v33 = vpop.eup %5632 }
0x27ae   :  { %v1893_v49 = vadd.f32 1.0, %v5633_v33 }
0x27b0   :  { %1899 = vrot.lane.b32.xlu0 %v5631_v47, %s5936_s13  ;;  %5634 = vrcp.f32 %v1893_v49 }
0x27bd   :  { %v5635_v9 = vpop.eup %5634 }
0x27be   :  { %v1897_v39 = vmul.f32 %v5635_v9, %v6365_v42 }
0x281e   :  { %v2127_v34 = vpop.permute.xlu0 %2126 }
0x281f   :  { %v2129_v50 = vmul.f32 %v5627_v37, %v2127_v34 }
0x2821   :  { %2131 = vrot.lane.b32.xlu1 %v2129_v50, %s5937_s14 }
0x2822   :  { %v1900_v35 = vpop.permute.xlu0 %1899 }
0x2823   :  { %v1902_v57 = vmul.f32 %v5635_v9, %v1900_v35 }
0x2825   :  { %1904 = vrot.lane.b32.xlu0 %v1902_v57, %s5937_s14 }
0x2893   :  { %v6425_v51 = vpop.permute.xlu1 %2131 }
0x2894   :  { %5405 = vmatmul.mubr.msk.f32.vlgmr.msra.gmra.mxu1 %vm199_vm3, %v6425_v51 }
0x2895   :  { %5419 = vmatpush3.msra.mxu1 %v6369_v14  ;;  %5426 = vmatprep.mubr.msk.f32.mxu1 %vm5935_vm0, %v5934_v0 }
0x2896   :  { %5420 = vmatprep.subr.mxu1 %v5934_v0 }
0x2897   :  { %v1905_v53 = vpop.permute.xlu0 %1904  ;;  %5421 = vmatpush3.msra.mxu1 %v6372_v15 }
0x2898   :  { %v1907_v54 = vadd.f32 %v1905_v53, %v1897_v39  ;;  %5422 = vmatprep.subr.mxu1 %v5934_v0 }
0x2899   :  { %5423 = vmatpush3.msra.mxu1 %v6376_v16 }
0x289a   :  { %5636 = vtanh.f32 %v1907_v54  ;;  %5424 = vmatprep.subr.mxu1 %v5934_v0 }
0x289b   :  { %5425 = vmatpush3.msra.mxu1 %v6380_v17 }
0x289c   :  { %5440 = vmatprep.subr.mxu1 %v5934_v0 }
0x28a7   :  { %v5637_v56 = vpop.eup %5636 }
0x28a8   :  { %1910 = vrot.lane.b32.xlu0 %v5637_v56, %s5936_s13 }
0x291a   :  { %v1911_v59 = vpop.permute.xlu0 %1910 }
0x291b   :  { %v1913_v2 = vmul.f32 %v5635_v9, %v1911_v59 }
0x291d   :  { %1926 = vrot.lane.b32.xlu0 %v1913_v2, %s5937_s14 }
0x2954   :  { %v2201_v61 = vpop.f32.mrf.mxu1 }
0x2955   :  { %v2205_v63 = vadd.f32 %v2201_v61, %v2002_v60 }
0x2956   :  { %v5406_v10 = vpop.f32.mrf.mxu1 }
0x2957   :  { %5638 = vtanh.f32 %v2205_v63  ;;  %v4914_v6 = vmul.f32 -1.442695, %v2205_v63 }
0x2959   :  { %5640 = vpow2.f32 %v4914_v6 }
0x2964   :  { %v5639_v5 = vpop.eup %5638 }
0x2965   :  { %2215 = vrot.lane.b32.xlu1 %v5639_v5, %s5936_s13  ;;  %v2017_v5 = vadd.f32 %v6467_v22, %v6416_v25 }
0x2966   :  { %v5641_v36 = vpop.eup %5640 }
0x2967   :  { %v2209_v3 = vadd.f32 1.0, %v5641_v36 }
0x2969   :  { %5642 = vrcp.f32 %v2209_v3 }
0x2976   :  { %v5643_v62 = vpop.eup %5642 }
0x2977   :  { %v2213_v8 = vmul.f32 %v5643_v62, %v2123_v44 }
0x298f   :  { %v1927_v1 = vpop.permute.xlu0 %1926 }
0x2990   :  { %5383 = vmatmul.mubr.msk.f32.gmra.mxu0 %vm199_vm3, %v1927_v1 }
0x2991   :  { %5415 = vmatprep.mubr.msk.f32.mxu0 %vm5935_vm0, %v5934_v0 }
0x29d7   :  { %v2216_v4 = vpop.permute.xlu1 %2215 }
0x29d8   :  { %v2218_v7 = vmul.f32 %v5643_v62, %v2216_v4 }
0x29da   :  { %2220 = vrot.lane.b32.xlu1 %v2218_v7, %s5937_s14 }
0x2a4c   :  { %v2221_v55 = vpop.permute.xlu1 %2220 }
0x2a4d   :  { %v2223_v11 = vadd.f32 %v2221_v55, %v2213_v8 }
0x2a4f   :  { %5644 = vtanh.f32 %v2223_v11 }
0x2a50   :  { %v6469_v52 = vpop.f32.mrf.mxu0 }
0x2a52   :  { %v6471_v23 = vpop.f32.mrf.mxu0 }
0x2a5c   :  { %v5645_v12 = vpop.eup %5644 }
0x2a5d   :  { %2226 = vrot.lane.b32.xlu1 %v5645_v12, %s5936_s13 }
0x2acf   :  { %v2227_v42 = vpop.permute.xlu1 %2226 }
0x2ad0   :  { %v2229_v13 = vmul.f32 %v5643_v62, %v2227_v42 }
0x2ad2   :  { %2231 = vrot.lane.b32.xlu1 %v2229_v13, %s5937_s14 }
0x2b44   :  { %v6451_v19 = vpop.permute.xlu1 %2231 }
0x2b45   :  { %5416 = vmatmul.mubr.msk.f32.vlgmr.msra.gmra.mxu0 %vm199_vm3, %v6451_v19 }
0x2b46   :  { %5430 = vmatpush3.msra.mxu0 %v6369_v14  ;;  %5437 = vmatprep.mubr.msk.f32.mxu0 %vm5935_vm0, %v5934_v0 }
0x2b47   :  { %5431 = vmatprep.subr.mxu0 %v5934_v0 }
0x2b48   :  { %5432 = vmatpush3.msra.mxu0 %v6372_v15 }
0x2b49   :  { %5433 = vmatprep.subr.mxu0 %v5934_v0 }
0x2b4a   :  { %5434 = vmatpush3.msra.mxu0 %v6376_v16 }
0x2b4b   :  { %5435 = vmatprep.subr.mxu0 %v5934_v0 }
0x2b4c   :  { %5436 = vmatpush3.msra.mxu0 %v6380_v17 }
0x2b4d   :  { %5451 = vmatprep.subr.mxu0 %v5934_v0 }
0x2c05   :  { %v2301_v24 = vpop.f32.mrf.mxu0 }
0x2c06   :  { %v2305_v26 = vadd.f32 %v2301_v24, %v2007_v18  ;;  %v2022_v24 = vadd.f32 %v6465_v21, %v6416_v25 }
0x2c07   :  { %v5417_v27 = vpop.f32.mrf.mxu0 }
0x2c08   :  { %5646 = vtanh.f32 %v2305_v26  ;;  %v4916_v30 = vmul.f32 -1.442695, %v2305_v26 }
0x2c0a   :  { %5648 = vpow2.f32 %v4916_v30 }
0x2c15   :  { %v5647_v29 = vpop.eup %5646 }
0x2c16   :  { %2315 = vrot.lane.b32.xlu0 %v5647_v29, %s5936_s13 }
0x2c17   :  { %v5649_v58 = vpop.eup %5648 }
0x2c18   :  { %v2309_v45 = vadd.f32 1.0, %v5649_v58 }
0x2c1a   :  { %5650 = vrcp.f32 %v2309_v45 }
0x2c27   :  { %v5651_v41 = vpop.eup %5650 }
0x2c28   :  { %v2313_v38 = vmul.f32 %v5651_v41, %v2223_v11 }
0x2c88   :  { %v2316_v31 = vpop.permute.xlu0 %2315 }
0x2c89   :  { %v2318_v37 = vmul.f32 %v5651_v41, %v2316_v31 }
0x2c8b   :  { %2320 = vrot.lane.b32.xlu1 %v2318_v37, %s5937_s14  ;;  %v2838_v37 = vld [vmem:[#allocation2 + $0x1b8] sm:$0xff] }
0x2cfd   :  { %v2321_v40 = vpop.permute.xlu1 %2320 }
0x2cfe   :  { %v2323_v43 = vadd.f32 %v2321_v40, %v2313_v38 }
0x2d00   :  { %5652 = vtanh.f32 %v2323_v43 }
0x2d0d   :  { %v5653_v32 = vpop.eup %5652 }
0x2d0e   :  { %2326 = vrot.lane.b32.xlu0 %v5653_v32, %s5936_s13  ;;  %v2837_v32 = vld [vmem:[#allocation2 + $0x1b0] sm:$0xff] }
0x2d80   :  { %v2327_v44 = vpop.permute.xlu0 %2326 }
0x2d81   :  { %v2329_v46 = vmul.f32 %v5651_v41, %v2327_v44 }
0x2d83   :  { %2331 = vrot.lane.b32.xlu1 %v2329_v46, %s5937_s14  ;;  %v2836_v46 = vld [vmem:[#allocation2 + $0x1a8] sm:$0xff] }
0x2df5   :  { %v6478_v47 = vpop.permute.xlu1 %2331 }
0x2df6   :  { %5427 = vmatmul.mubr.msk.f32.vlgmr.msra.gmra.mxu1 %vm199_vm3, %v6478_v47 }
0x2df7   :  { %5441 = vmatpush3.msra.mxu1 %v6369_v14  ;;  %5448 = vmatprep.mubr.msk.f32.mxu1 %vm5935_vm0, %v5934_v0 }
0x2df8   :  { %5442 = vmatprep.subr.mxu1 %v5934_v0 }
0x2df9   :  { %5443 = vmatpush3.msra.mxu1 %v6372_v15 }
0x2dfa   :  { %5444 = vmatprep.subr.mxu1 %v5934_v0 }
0x2dfb   :  { %5445 = vmatpush3.msra.mxu1 %v6376_v16 }
0x2dfc   :  { %5446 = vmatprep.subr.mxu1 %v5934_v0 }
0x2dfd   :  { %5447 = vmatpush3.msra.mxu1 %v6380_v17 }
0x2dfe   :  { %5462 = vmatprep.subr.mxu1 %v5934_v0 }
0x2eb6   :  { %v2401_v33 = vpop.f32.mrf.mxu1 }
0x2eb7   :  { %v2405_v49 = vadd.f32 %v2401_v33, %v2012_v48  ;;  %v2835_v48 = vld [vmem:[#allocation2 + $0x1a0] sm:$0xff]  ;;  %v2834_v33 = vld [vmem:[#allocation2 + $0x198] sm:$0xff] }
0x2eb8   :  { %v5428_v34 = vpop.f32.mrf.mxu1 }
0x2eb9   :  { %5654 = vtanh.f32 %v2405_v49  ;;  %v4918_v9 = vmul.f32 -1.442695, %v2405_v49  ;;  %v2833_v49 = vld [vmem:[#allocation2 + $0x190] sm:$0xff]  ;;  %v2832_v34 = vld [vmem:[#allocation2 + $0x188] sm:$0xff] }
0x2ebb   :  { %5656 = vpow2.f32 %v4918_v9 }
0x2ec6   :  { %v5655_v50 = vpop.eup %5654 }
0x2ec7   :  { %2415 = vrot.lane.b32.xlu0 %v5655_v50, %s5936_s13  ;;  %v2831_v50 = vld [vmem:[#allocation2 + $0x180] sm:$0xff] }
0x2ec8   :  { %v5657_v35 = vpop.eup %5656 }
0x2ec9   :  { %v2409_v57 = vadd.f32 1.0, %v5657_v35 }
0x2ecb   :  { %5658 = vrcp.f32 %v2409_v57 }
0x2ed8   :  { %v5659_v39 = vpop.eup %5658 }
0x2ed9   :  { %v2413_v56 = vmul.f32 %v5659_v39, %v2323_v43 }
0x2f39   :  { %v2416_v53 = vpop.permute.xlu0 %2415 }
0x2f3a   :  { %v2418_v54 = vmul.f32 %v5659_v39, %v2416_v53 }
0x2f3c   :  { %2420 = vrot.lane.b32.xlu1 %v2418_v54, %s5937_s14 }
0x2fae   :  { %v2421_v59 = vpop.permute.xlu1 %2420 }
0x2faf   :  { %v2423_v2 = vadd.f32 %v2421_v59, %v2413_v56 }
0x2fb1   :  { %5660 = vtanh.f32 %v2423_v2 }
0x2fbe   :  { %v5661_v60 = vpop.eup %5660 }
0x2fbf   :  { %2426 = vrot.lane.b32.xlu0 %v5661_v60, %s5936_s13 }
0x3031   :  { %v2427_v61 = vpop.permute.xlu0 %2426 }
0x3032   :  { %v2429_v63 = vmul.f32 %v5659_v39, %v2427_v61  ;;  %v6557_v61 = vld [vmem:[#allocation4 + $0x1f8] sm:$0xff] }
0x3034   :  { %2431 = vrot.lane.b32.xlu1 %v2429_v63, %s5937_s14 }
0x30a6   :  { %v6497_v10 = vpop.permute.xlu1 %2431 }
0x30a7   :  { %5438 = vmatmul.mubr.msk.f32.vlgmr.msra.gmra.mxu0 %vm199_vm3, %v6497_v10 }
0x30a8   :  { %5452 = vmatpush3.msra.mxu0 %v6369_v14  ;;  %5459 = vmatprep.mubr.msk.f32.mxu0 %vm5935_vm0, %v5934_v0 }
0x30a9   :  { %5453 = vmatprep.subr.mxu0 %v5934_v0 }
0x30aa   :  { %5454 = vmatpush3.msra.mxu0 %v6372_v15 }
0x30ab   :  { %5455 = vmatprep.subr.mxu0 %v5934_v0 }
0x30ac   :  { %5456 = vmatpush3.msra.mxu0 %v6376_v16 }
0x30ad   :  { %5457 = vmatprep.subr.mxu0 %v5934_v0 }
0x30ae   :  { %5458 = vmatpush3.msra.mxu0 %v6380_v17 }
0x30af   :  { %2898 = vmatprep.subr.mxu0 %v2838_v37 }
0x3167   :  { %v2501_v1 = vpop.f32.mrf.mxu0 }
0x3168   :  { %v2505_v6 = vadd.f32 %v2501_v1, %v2017_v5  ;;  %v6564_v5 = vld [vmem:[#allocation4 + $0x1e8] sm:$0xff]  ;;  %v6567_v1 = vld [vmem:[#allocation4 + $0x1e0] sm:$0xff] }
0x3169   :  { %v5439_v36 = vpop.f32.mrf.mxu0 }
0x316a   :  { %5662 = vtanh.f32 %v2505_v6  ;;  %v4920_v62 = vmul.f32 -1.442695, %v2505_v6  ;;  %v6570_v6 = vld [vmem:[#allocation4 + $0x1d8] sm:$0xff]  ;;  %v6573_v36 = vld [vmem:[#allocation4 + $0x1d0] sm:$0xff] }
0x316c   :  { %5664 = vpow2.f32 %v4920_v62  ;;  %v6579_v62 = vld [vmem:[#allocation4 + $0x1c0] sm:$0xff] }
0x3177   :  { %v5663_v3 = vpop.eup %5662 }
0x3178   :  { %2515 = vrot.lane.b32.xlu0 %v5663_v3, %s5936_s13  ;;  %v6576_v3 = vld [vmem:[#allocation4 + $0x1c8] sm:$0xff] }
0x3179   :  { %v5665_v4 = vpop.eup %5664 }
0x317a   :  { %v2509_v7 = vadd.f32 1.0, %v5665_v4  ;;  %v6582_v4 = vld [vmem:[#allocation4 + $0x1b8] sm:$0xff] }
0x317c   :  { %5666 = vrcp.f32 %v2509_v7  ;;  %v6585_v7 = vld [vmem:[#allocation4 + $0x1b0] sm:$0xff] }
0x3189   :  { %v5667_v8 = vpop.eup %5666 }
0x318a   :  { %v2513_v12 = vmul.f32 %v5667_v8, %v2423_v2 }
0x31ea   :  { %v2516_v55 = vpop.permute.xlu0 %2515 }
0x31eb   :  { %v2518_v11 = vmul.f32 %v5667_v8, %v2516_v55 }
0x31ed   :  { %2520 = vrot.lane.b32.xlu1 %v2518_v11, %s5937_s14  ;;  %v6591_v11 = vld [vmem:[#allocation4 + $0x1a0] sm:$0xff] }
0x325f   :  { %v2521_v42 = vpop.permute.xlu1 %2520 }
0x3260   :  { %v2523_v13 = vadd.f32 %v2521_v42, %v2513_v12  ;;  %v6594_v42 = vld [vmem:[#allocation4 + $0x198] sm:$0xff] }
0x3262   :  { %5668 = vtanh.f32 %v2523_v13 }
0x326f   :  { %v5669_v28 = vpop.eup %5668 }
0x3270   :  { %2526 = vrot.lane.b32.xlu0 %v5669_v28, %s5936_s13  ;;  %v6601_v28 = vld [vmem:[#allocation4 + $0x188] sm:$0xff] }
0x32e2   :  { %v2527_v20 = vpop.permute.xlu0 %2526 }
0x32e3   :  { %v2529_v22 = vmul.f32 %v5667_v8, %v2527_v20  ;;  %v6588_v8 = vld [vmem:[#allocation4 + $0x1a8] sm:$0xff]  ;;  %v6604_v20 = vld [vmem:[#allocation4 + $0x180] sm:$0xff] }
0x32e5   :  { %2531 = vrot.lane.b32.xlu1 %v2529_v22, %s5937_s14 }
0x3357   :  { %v2532_v18 = vpop.permute.xlu1 %2531 }
0x3358   :  { %5449 = vmatmul.mubr.msk.f32.vlgmr.msra.gmra.mxu1 %vm199_vm3, %v2532_v18 }
0x3359   :  { %5463 = vmatpush3.msra.mxu1 %v6369_v14  ;;  %5470 = vmatprep.mubr.msk.f32.mxu1 %vm5935_vm0, %v5934_v0 }
0x335a   :  { %5464 = vmatprep.subr.mxu1 %v5934_v0 }
0x335b   :  { %5465 = vmatpush3.msra.mxu1 %v6372_v15 }
0x335c   :  { %5466 = vmatprep.subr.mxu1 %v5934_v0 }
0x335d   :  { %5467 = vmatpush3.msra.mxu1 %v6376_v16 }
0x335e   :  { %5468 = vmatprep.subr.mxu1 %v5934_v0 }
0x335f   :  { %5469 = vmatpush3.msra.mxu1 %v6380_v17 }
0x3360   :  { %3006 = vmatprep.subr.mxu1 %v6557_v61 }
0x3418   :  { %v2601_v26 = vpop.f32.mrf.mxu1 }
0x3419   :  { %v2605_v14 = vadd.f32 %v2601_v26, %v2022_v24 }
0x341a   :  { %v5450_v27 = vpop.f32.mrf.mxu1 }
0x341b   :  { %5670 = vtanh.f32 %v2605_v14  ;;  %v4922_v30 = vmul.f32 -1.442695, %v2605_v14 }
0x341d   :  { %5672 = vpow2.f32 %v4922_v30 }
0x3428   :  { %v5671_v29 = vpop.eup %5670 }
0x3429   :  { %2615 = vrot.lane.b32.xlu0 %v5671_v29, %s5936_s13  ;;  %v4927_v29 = vld [vmem:[%s7160_s3 + $0x3] ss:$8 sm:$0x3] }
0x342a   :  { %v5673_v15 = vpop.eup %5672 }
0x342b   :  { %v2609_v58 = vadd.f32 1.0, %v5673_v15 }
0x342d   :  { %5674 = vrcp.f32 %v2609_v58 }
0x343a   :  { %v5675_v16 = vpop.eup %5674 }
0x343b   :  { %v2613_v17 = vmul.f32 %v5675_v16, %v2523_v13  ;;  %v6597_v13 = vld [vmem:[#allocation4 + $0x190] sm:$0xff] }
0x349b   :  { %v2616_v45 = vpop.permute.xlu0 %2615 }
0x349c   :  { %v2618_v41 = vmul.f32 %v5675_v16, %v2616_v45 }
0x349e   :  { %2620 = vrot.lane.b32.xlu1 %v2618_v41, %s5937_s14 }
0x3510   :  { %v2621_v31 = vpop.permute.xlu1 %2620 }
0x3511   :  { %v2623_v21 = vadd.f32 %v2621_v31, %v2613_v17 }
0x3513   :  { %5676 = vtanh.f32 %v2623_v21 }
0x3520   :  { %v5677_v38 = vpop.eup %5676 }
0x3521   :  { %2626 = vrot.lane.b32.xlu0 %v5677_v38, %s5936_s13 }
0x3593   :  { %v2627_v40 = vpop.permute.xlu0 %2626 }
0x3594   :  { %v2629_v43 = vmul.f32 %v5675_v16, %v2627_v40 }
0x3596   :  { %2631 = vrot.lane.b32.xlu1 %v2629_v43, %s5937_s14 }
0x3608   :  { %v2632_v44 = vpop.permute.xlu1 %2631 }
0x3609   :  { %5460 = vmatmul.mubr.msk.f32.vlgmr.msra.gmra.mxu0 %vm199_vm3, %v2632_v44 }
0x360a   :  { %2899 = vmatpush1.msra.mxu0 %v2837_v32  ;;  %2938 = vmatprep.mubr.f32.mxu0 %v5934_v0 }
0x360b   :  { %2900 = vmatprep.subr.mxu0 %v2836_v46 }
0x360c   :  { %2901 = vmatpush1.msra.mxu0 %v2835_v48 }
0x360d   :  { %2902 = vmatprep.subr.mxu0 %v2834_v33 }
0x360e   :  { %2903 = vmatpush1.msra.mxu0 %v2833_v49 }
0x360f   :  { %2904 = vmatprep.subr.mxu0 %v2832_v34 }
0x3610   :  { %2905 = vmatpush1.msra.mxu0 %v2831_v50 }
0x3611   :  { %4928 = vmatmul.mubr.msk.f32.vlgmr.msra.gmra.mxu0 %vm199_vm3, %v6425_v51  ;;  %v2027_v51 = vadd.f32 %v6471_v23, %v6416_v25  ;;  %3206 = vmatprep.subr.mxu0 %v6557_v61 }
0x3612   :  { %2944 = vmatprep.mubr.f32.mxu0 %v5934_v0 }
0x3615   :  { %4929 = vmatmul.mubr.msk.f32.gmra.mxu0 %vm199_vm3, %v6451_v19 }
0x3616   :  { %2950 = vmatprep.mubr.f32.mxu0 %v5934_v0 }
0x3619   :  { %4930 = vmatmul.mubr.msk.f32.gmra.mxu0 %vm199_vm3, %v6478_v47 }
0x361a   :  { %2956 = vmatprep.mubr.f32.mxu0 %v5934_v0 }
0x361d   :  { %4931 = vmatmul.mubr.msk.f32.gmra.mxu0 %vm199_vm3, %v6497_v10  ;;  %v6562_v10 = vld [vmem:[#allocation4 + $0x1f0] sm:$0xff] }
0x361e   :  { %2962 = vmatprep.mubr.f32.mxu0 %v5934_v0  ;;  %3207 = vmatpush1.msra.mxu0 %v6562_v10 }
0x361f   :  { %3208 = vmatprep.subr.mxu0 %v6564_v5 }
0x3620   :  { %3209 = vmatpush1.msra.mxu0 %v6567_v1 }
0x3621   :  { %4932 = vmatmul.mubr.msk.f32.gmra.mxu0 %vm199_vm3, %v2532_v18  ;;  %3210 = vmatprep.subr.mxu0 %v6570_v6  ;;  %v2859_v18 = vlaneseq }
0x3622   :  { %2968 = vmatprep.mubr.f32.mxu0 %v5934_v0  ;;  %3211 = vmatpush1.msra.mxu0 %v6573_v36 }
0x3623   :  { %3212 = vmatprep.subr.mxu0 %v6576_v3  ;;  %v6647_v14 = vshrl.u32 %v2859_v18, 7 }
0x3624   :  { %3213 = vmatpush1.msra.mxu0 %v6579_v62 }
0x3625   :  { %4933 = vmatmul.mubr.msk.f32.gmra.mxu0 %vm199_vm3, %v2632_v44  ;;  %3214 = vmatprep.subr.mxu0 %v6582_v4  ;;  %v2861_v27 = vsub.s32 0, %v6647_v14  ;;  %v2865_v17 = vsub.s32 1, %v6647_v14  ;;  %v2032_v44 = vadd.f32 %v6469_v52, %v6416_v25 }
0x3626   :  { %2974 = vmatprep.mubr.f32.mxu0 %v5934_v0  ;;  %3215 = vmatpush1.msra.mxu0 %v6585_v7 }
0x3627   :  { %3216 = vmatprep.subr.mxu0 %v6588_v8  ;;  %v6655_v30 = vrot.slane %v4927_v29, %v2861_v27  ;;  %v6661_v31 = vrot.slane %v4927_v29, %v2865_v17 }
0x3628   :  { %3217 = vmatpush1.msra.mxu0 %v6591_v11 }
0x3629   :  { %3218 = vmatprep.subr.mxu0 %v6594_v42 }
0x362a   :  { %3219 = vmatpush1.msra.mxu0 %v6597_v13 }
0x362b   :  { %3220 = vmatprep.subr.mxu0 %v6601_v28 }
0x362c   :  { %3221 = vmatpush1.msra.mxu0 %v6604_v20 }
0x362d   :  { %3406 = vmatprep.subr.mxu0 %v6557_v61 }
0x36c9   :  { %v2701_v19 = vpop.f32.mrf.mxu0 }
0x36ca   :  { %v2705_v47 = vadd.f32 %v2701_v19, %v2027_v51 }
0x36cb   :  { %v5461_v9 = vpop.f32.mrf.mxu0 }
0x36cc   :  { %5678 = vtanh.f32 %v2705_v47  ;;  %v4924_v57 = vmul.f32 -1.442695, %v2705_v47 }
0x36ce   :  { %5680 = vpow2.f32 %v4924_v57 }
0x36d1   :  { %v2940_v15 = vpop.f32.mrf.mxu0 }
0x36d2   :  { %v2941_v58 = vadd.f32 %v2940_v15, %v6655_v30 }
0x36d9   :  { %v5679_v35 = vpop.eup %5678 }
0x36da   :  { %2715 = vrot.lane.b32.xlu0 %v5679_v35, %s5936_s13 }
0x36db   :  { %v5681_v39 = vpop.eup %5680 }
0x36dc   :  { %v2709_v53 = vadd.f32 1.0, %v5681_v39 }
0x36de   :  { %5682 = vrcp.f32 %v2709_v53 }
0x36eb   :  { %v5683_v54 = vpop.eup %5682 }
0x36ec   :  { %v2713_v2 = vmul.f32 %v5683_v54, %v2623_v21  ;;  %v2942_v21 = vpop.f32.mrf.mxu0 }
0x36ed   :  { %v2943_v38 = vadd.f32 %v2942_v21, %v6661_v31 }
0x374c   :  { %v2716_v56 = vpop.permute.xlu0 %2715 }
0x374d   :  { %v2718_v59 = vmul.f32 %v5683_v54, %v2716_v56 }
0x374f   :  { %2720 = vrot.lane.b32.xlu1 %v2718_v59, %s5937_s14 }
0x37c1   :  { %v2721_v60 = vpop.permute.xlu1 %2720 }
0x37c2   :  { %v6554_v23 = vadd.f32 %v2721_v60, %v2713_v2 }
0x37c4   :  { %5684 = vtanh.f32 %v6554_v23 }
0x37d1   :  { %v5685_v63 = vpop.eup %5684 }
0x37d2   :  { %2726 = vrot.lane.b32.xlu0 %v5685_v63, %s5936_s13 }
0x3844   :  { %v2727_v55 = vpop.permute.xlu0 %2726 }
0x3845   :  { %v2729_v12 = vmul.f32 %v5683_v54, %v2727_v55 }
0x3847   :  { %2731 = vrot.lane.b32.xlu1 %v2729_v12, %s5937_s14 }
0x38b9   :  { %v2732_v22 = vpop.permute.xlu1 %2731 }
0x38ba   :  { %5471 = vmatmul.mubr.msk.f32.vlgmr.msra.gmra.mxu1 %vm199_vm3, %v2732_v22  ;;  %4934 = vmatmul.mubr.msk.f32.gmra.mxu0 %vm199_vm3, %v2732_v22  ;;  %v2946_v22 = vpop.f32.mrf.mxu0 }
0x38bb   :  { %3007 = vmatpush1.msra.mxu1 %v6562_v10  ;;  %3054 = vmatprep.mubr.f32.mxu1 %v5934_v0  ;;  %v2947_v18 = vadd.f32 %v2946_v22, %v6655_v30 }
0x38bc   :  { %3008 = vmatprep.subr.mxu1 %v6564_v5  ;;  %2980 = vmatprep.mubr.f32.mxu0 %v5934_v0  ;;  %v2948_v15 = vpop.f32.mrf.mxu0 }
0x38bd   :  { %3009 = vmatpush1.msra.mxu1 %v6567_v1 }
0x38be   :  { %3010 = vmatprep.subr.mxu1 %v6570_v6 }
0x38bf   :  { %3011 = vmatpush1.msra.mxu1 %v6573_v36 }
0x38c0   :  { %3012 = vmatprep.subr.mxu1 %v6576_v3 }
0x38c1   :  { %3013 = vmatpush1.msra.mxu1 %v6579_v62 }
0x38c2   :  { %3014 = vmatprep.subr.mxu1 %v6582_v4 }
0x38c3   :  { %3015 = vmatpush1.msra.mxu1 %v6585_v7 }
0x38c4   :  { %3016 = vmatprep.subr.mxu1 %v6588_v8 }
0x38c5   :  { %3017 = vmatpush1.msra.mxu1 %v6591_v11 }
0x38c6   :  { %3018 = vmatprep.subr.mxu1 %v6594_v42 }
0x38c7   :  { %3019 = vmatpush1.msra.mxu1 %v6597_v13 }
0x38c8   :  { %3020 = vmatprep.subr.mxu1 %v6601_v28 }
0x38c9   :  { %3021 = vmatpush1.msra.mxu1 %v6604_v20 }
0x38ca   :  { %3055 = vmatmul.mubr.f32.vlgmr.msra.gmra.mxu1 %v5934_v0  ;;  %3106 = vmatprep.subr.mxu1 %v6557_v61 }
0x38cb   :  { %3107 = vmatpush1.msra.mxu1 %v6562_v10  ;;  %3154 = vmatprep.mubr.f32.mxu1 %v5934_v0 }
0x38cc   :  { %3108 = vmatprep.subr.mxu1 %v6564_v5 }
0x38cd   :  { %3109 = vmatpush1.msra.mxu1 %v6567_v1 }
0x38ce   :  { %3110 = vmatprep.subr.mxu1 %v6570_v6 }
0x38cf   :  { %3111 = vmatpush1.msra.mxu1 %v6573_v36 }
0x38d0   :  { %3112 = vmatprep.subr.mxu1 %v6576_v3 }
0x38d1   :  { %3113 = vmatpush1.msra.mxu1 %v6579_v62 }
0x38d2   :  { %3114 = vmatprep.subr.mxu1 %v6582_v4 }
0x38d3   :  { %3115 = vmatpush1.msra.mxu1 %v6585_v7 }
0x38d4   :  { %3116 = vmatprep.subr.mxu1 %v6588_v8 }
0x38d5   :  { %3117 = vmatpush1.msra.mxu1 %v6591_v11 }
0x38d6   :  { %3118 = vmatprep.subr.mxu1 %v6594_v42 }
0x38d7   :  { %3119 = vmatpush1.msra.mxu1 %v6597_v13 }
0x38d8   :  { %3120 = vmatprep.subr.mxu1 %v6601_v28 }
0x38d9   :  { %3121 = vmatpush1.msra.mxu1 %v6604_v20 }
0x38da   :  { %3306 = vmatprep.subr.mxu1 %v6557_v61 }
0x397a   :  { %v2801_v24 = vpop.f32.mrf.mxu1 }
0x397b   :  { %v2805_v46 = vadd.f32 %v2801_v24, %v2032_v44 }
0x397c   :  { %v5472_v26 = vpop.f32.mrf.mxu1 }
0x397d   :  { %v4926_v51 = vmul.f32 -1.442695, %v2805_v46 }
0x398a   :  { %v3056_v16 = vpop.f32.mrf.mxu1 }
0x398b   :  { %v3061_v45 = vadd.f32 %v3056_v16, %v2941_v58  ;;  %v2949_v16 = vadd.f32 %v2948_v15, %v6661_v31 }
0x398c   :  { %v3058_v37 = vpop.f32.mrf.mxu1 }
0x398d   :  { %v4936_v41 = vmul.f32 -1.442695, %v3061_v45  ;;  %v3062_v40 = vadd.f32 %v3058_v37, %v2943_v38 }
0x398f   :  { %5686 = vpow2.f32 %v4936_v41  ;;  %v4937_v50 = vmul.f32 -1.442695, %v3062_v40 }
0x3990   :  { %5688 = vtanh.f32 %v3062_v40 }
0x399c   :  { %v5687_v43 = vpop.eup %5686 }
0x399d   :  { %v3069_v32 = vadd.f32 1.0, %v5687_v43  ;;  %v5689_v48 = vpop.eup %5688 }
0x399f   :  { %5690 = vrcp.f32 %v3069_v32 }
0x39a0   :  { %5692 = vtanh.f32 %v2805_v46 }
0x39a1   :  { %5694 = vpow2.f32 %v4937_v50 }
0x39a2   :  { %5696 = vpow2.f32 %v4926_v51 }
0x39ac   :  { %v5691_v33 = vpop.eup %5690 }
0x39ad   :  { %v3077_v49 = vmul.f32 %v5691_v33, %v5689_v48  ;;  %v5693_v34 = vpop.eup %5692  ;;  %v3076_v9 = vmul.f32 0.0, %v5691_v33 }
0x39ae   :  { %v5695_v19 = vpop.eup %5694 }
0x39af   :  { %3079 = vrot.lane.b32.xlu0 %v3077_v49, %s5936_s13  ;;  %v3070_v47 = vadd.f32 1.0, %v5695_v19  ;;  %v5697_v35 = vpop.eup %5696 }
0x39b0   :  { %v2809_v57 = vadd.f32 1.0, %v5697_v35  ;;  %v2952_v35 = vpop.f32.mrf.mxu0 }
0x39b1   :  { %5698 = vrcp.f32 %v3070_v47 }
0x39b3   :  { %2815 = vrot.lane.b32.xlu0 %v5693_v34, %s5936_s13 }
0x39be   :  { %v5699_v39 = vpop.eup %5698 }
0x3a21   :  { %v3080_v25 = vpop.permute.xlu0 %3079 }
0x3a22   :  { %v6668_v52 = vadd.f32 %v3080_v25, %v3076_v9  ;;  %v2954_v25 = vpop.f32.mrf.mxu0 }
0x3a24   :  { %5700 = vtanh.f32 %v6668_v52 }
0x3a25   :  { %5702 = vrcp.f32 %v2809_v57  ;;  %v2816_v56 = vpop.permute.xlu0 %2815 }
0x3a31   :  { %v5701_v53 = vpop.eup %5700 }
0x3a32   :  { %v3084_v54 = vmul.f32 %v5701_v53, %v5699_v39  ;;  %v5703_v59 = vpop.eup %5702 }
0x3a33   :  { %v2818_v2 = vmul.f32 %v5703_v59, %v2816_v56  ;;  %v2813_v63 = vmul.f32 %v5703_v59, %v6554_v23 }
0x3a34   :  { %3086 = vrot.lane.b32.xlu1 %v3084_v54, %s5936_s13 }
0x3a38   :  { %2820 = vrot.lane.b32.xlu1 %v2818_v2, %s5937_s14 }
0x3aa6   :  { %v6673_v60 = vpop.permute.xlu1 %3086 }
0x3aa7   :  { %4938 = vmatmul.mubr.msk.f32.vlgmr.msra.gmra.mxu1 %vm2987_vm4, %v6673_v60 }
0x3aa8   :  { %3307 = vmatpush1.msra.mxu1 %v6562_v10  ;;  %3354 = vmatprep.mubr.f32.mxu1 %v5934_v0 }
0x3aa9   :  { %3308 = vmatprep.subr.mxu1 %v6564_v5 }
0x3aaa   :  { %v2821_v55 = vpop.permute.xlu1 %2820  ;;  %3309 = vmatpush1.msra.mxu1 %v6567_v1 }
0x3aab   :  { %v2823_v12 = vadd.f32 %v2821_v55, %v2813_v63  ;;  %3310 = vmatprep.subr.mxu1 %v6570_v6 }
0x3aac   :  { %3311 = vmatpush1.msra.mxu1 %v6573_v36 }
0x3aad   :  { %5704 = vtanh.f32 %v2823_v12  ;;  %3312 = vmatprep.subr.mxu1 %v6576_v3  ;;  %v2953_v12 = vadd.f32 %v2952_v35, %v6655_v30 }
0x3aae   :  { %3313 = vmatpush1.msra.mxu1 %v6579_v62 }
0x3aaf   :  { %3314 = vmatprep.subr.mxu1 %v6582_v4 }
0x3ab0   :  { %3315 = vmatpush1.msra.mxu1 %v6585_v7 }
0x3ab1   :  { %3316 = vmatprep.subr.mxu1 %v6588_v8 }
0x3ab2   :  { %3317 = vmatpush1.msra.mxu1 %v6591_v11 }
0x3ab3   :  { %3318 = vmatprep.subr.mxu1 %v6594_v42 }
0x3ab4   :  { %3319 = vmatpush1.msra.mxu1 %v6597_v13 }
0x3ab5   :  { %3320 = vmatprep.subr.mxu1 %v6601_v28 }
0x3ab6   :  { %3321 = vmatpush1.msra.mxu1 %v6604_v20 }
0x3ab7   :  { %3506 = vmatprep.subr.mxu1 %v6557_v61 }
0x3aba   :  { %v5705_v23 = vpop.eup %5704 }
0x3abb   :  { %2826 = vrot.lane.b32.xlu1 %v5705_v23, %s5936_s13 }
0x3b2d   :  { %v2827_v43 = vpop.permute.xlu1 %2826 }
0x3b2e   :  { %v2829_v32 = vmul.f32 %v5703_v59, %v2827_v43 }
0x3b67   :  { %v3156_v24 = vpop.f32.mrf.mxu1 }
0x3b68   :  { %v3161_v26 = vadd.f32 %v3156_v24, %v2947_v18 }
0x3b69   :  { %v3158_v58 = vpop.f32.mrf.mxu1 }
0x3b6a   :  { %v4939_v29 = vmul.f32 -1.442695, %v3161_v26  ;;  %v3162_v45 = vadd.f32 %v3158_v58, %v2949_v16  ;;  %v2955_v26 = vadd.f32 %v2954_v25, %v6661_v31 }
0x3b6c   :  { %5706 = vpow2.f32 %v4939_v29  ;;  %v4940_v44 = vmul.f32 -1.442695, %v3162_v45 }
0x3b6d   :  { %5708 = vtanh.f32 %v3162_v45 }
0x3b79   :  { %v5707_v41 = vpop.eup %5706 }
0x3b7a   :  { %v3169_v21 = vadd.f32 1.0, %v5707_v41  ;;  %v5709_v37 = vpop.eup %5708 }
0x3b7c   :  { %5710 = vrcp.f32 %v3169_v21 }
0x3b7d   :  { %5712 = vpow2.f32 %v4940_v44 }
0x3b89   :  { %v5711_v38 = vpop.eup %5710 }
0x3b8a   :  { %v3177_v40 = vmul.f32 %v5711_v38, %v5709_v37  ;;  %v5713_v46 = vpop.eup %5712  ;;  %v3176_v33 = vmul.f32 %v5711_v38, %v6668_v52  ;;  %v2958_v52 = vpop.f32.mrf.mxu0 }
0x3b8b   :  { %v3170_v48 = vadd.f32 1.0, %v5713_v46 }
0x3b8c   :  { %3179 = vrot.lane.b32.xlu0 %v3177_v40, %s5936_s13  ;;  %v6725_v57 = vpop.f32.mrf.mxu0 }
0x3b8d   :  { %5714 = vrcp.f32 %v3170_v48 }
0x3b8e   :  { %v6727_v39 = vpop.f32.mrf.mxu0 }
0x3b90   :  { %2870 = vrot.lane.b32.xlu0 %v2829_v32, %s5937_s14  ;;  %v6729_v53 = vpop.f32.mrf.mxu0 }
0x3b92   :  { %v6731_v54 = vpop.f32.mrf.mxu0 }
0x3b94   :  { %v6733_v56 = vpop.f32.mrf.mxu0 }
0x3b96   :  { %v6735_v59 = vpop.f32.mrf.mxu0 }
0x3b98   :  { %v6737_v2 = vpop.f32.mrf.mxu0 }
0x3b9a   :  { %v5715_v51 = vpop.eup %5714 }
0x3bfe   :  { %v3180_v49 = vpop.permute.xlu0 %3179 }
0x3bff   :  { %v3182_v34 = vadd.f32 %v3180_v49, %v3176_v33  ;;  %v2959_v49 = vadd.f32 %v2958_v52, %v6655_v30 }
0x3c01   :  { %5716 = vtanh.f32 %v3182_v34 }
0x3c02   :  { %v2871_v50 = vpop.permute.xlu0 %2870 }
0x3c03   :  { %4935 = vmatmul.mubr.msk.f32.gmra.mxu0 %vm199_vm3, %v2871_v50 }
0x3c04   :  { %3254 = vmatprep.mubr.f32.mxu0 %v5934_v0 }
0x3c0e   :  { %v5717_v19 = vpop.eup %5716 }
0x3c0f   :  { %v3184_v47 = vmul.f32 %v5717_v19, %v5715_v51 }
0x3c11   :  { %3186 = vrot.lane.b32.xlu1 %v3184_v47, %s5936_s13  ;;  %v2961_v47 = vadd.f32 %v6725_v57, %v6661_v31 }
0x3c83   :  { %v6704_v9 = vpop.permute.xlu1 %3186 }
0x3c84   :  { %4941 = vmatmul.mubr.msk.f32.vlgmr.msra.gmra.mxu0 %vm2987_vm4, %v6704_v9 }
0x3c85   :  { %3407 = vmatpush1.msra.mxu0 %v6562_v10  ;;  %3454 = vmatprep.mubr.f32.mxu0 %v5934_v0 }
0x3c86   :  { %3408 = vmatprep.subr.mxu0 %v6564_v5 }
0x3c87   :  { %3409 = vmatpush1.msra.mxu0 %v6567_v1 }
0x3c88   :  { %3410 = vmatprep.subr.mxu0 %v6570_v6 }
0x3c89   :  { %3411 = vmatpush1.msra.mxu0 %v6573_v36 }
0x3c8a   :  { %3412 = vmatprep.subr.mxu0 %v6576_v3 }
0x3c8b   :  { %3413 = vmatpush1.msra.mxu0 %v6579_v62 }
0x3c8c   :  { %3414 = vmatprep.subr.mxu0 %v6582_v4 }
0x3c8d   :  { %3415 = vmatpush1.msra.mxu0 %v6585_v7 }
0x3c8e   :  { %3416 = vmatprep.subr.mxu0 %v6588_v8 }
0x3c8f   :  { %3417 = vmatpush1.msra.mxu0 %v6591_v11 }
0x3c90   :  { %3418 = vmatprep.subr.mxu0 %v6594_v42 }
0x3c91   :  { %3419 = vmatpush1.msra.mxu0 %v6597_v13 }
0x3c92   :  { %3420 = vmatprep.subr.mxu0 %v6601_v28 }
0x3c93   :  { %3421 = vmatpush1.msra.mxu0 %v6604_v20 }
0x3c94   :  { %3606 = vmatprep.subr.mxu0 %v6557_v61 }
0x3cc3   :  { %v6739_v63 = vpop.f32.mrf.mxu0 }
0x3cc5   :  { %v6741_v55 = vpop.f32.mrf.mxu0 }
0x3d44   :  { %v3256_v23 = vpop.f32.mrf.mxu0 }
0x3d45   :  { %v3261_v22 = vadd.f32 %v3256_v23, %v2953_v12 }
0x3d46   :  { %v3258_v24 = vpop.f32.mrf.mxu0 }
0x3d47   :  { %v4942_v18 = vmul.f32 -1.442695, %v3261_v22  ;;  %v3262_v29 = vadd.f32 %v3258_v24, %v2955_v26 }
0x3d49   :  { %5718 = vpow2.f32 %v4942_v18  ;;  %v4943_v21 = vmul.f32 -1.442695, %v3262_v29 }
0x3d4a   :  { %5720 = vtanh.f32 %v3262_v29 }
0x3d56   :  { %v5719_v15 = vpop.eup %5718 }
0x3d57   :  { %v3269_v58 = vadd.f32 1.0, %v5719_v15  ;;  %v5721_v16 = vpop.eup %5720 }
0x3d59   :  { %5722 = vrcp.f32 %v3269_v58 }
0x3d5a   :  { %5724 = vpow2.f32 %v4943_v21 }
0x3d66   :  { %v5723_v45 = vpop.eup %5722 }
0x3d67   :  { %v3277_v41 = vmul.f32 %v5723_v45, %v5721_v16  ;;  %v5725_v37 = vpop.eup %5724  ;;  %v3276_v40 = vmul.f32 %v5723_v45, %v3182_v34 }
0x3d68   :  { %v3270_v38 = vadd.f32 1.0, %v5725_v37 }
0x3d69   :  { %3279 = vrot.lane.b32.xlu0 %v3277_v41, %s5936_s13  ;;  %v2965_v41 = vadd.f32 %v6727_v39, %v6655_v30 }
0x3d6a   :  { %5726 = vrcp.f32 %v3270_v38 }
0x3d77   :  { %v5727_v44 = vpop.eup %5726 }
0x3ddb   :  { %v3280_v43 = vpop.permute.xlu0 %3279 }
0x3ddc   :  { %v3282_v32 = vadd.f32 %v3280_v43, %v3276_v40  ;;  %v2967_v43 = vadd.f32 %v6729_v53, %v6661_v31 }
0x3dde   :  { %5728 = vtanh.f32 %v3282_v32 }
0x3deb   :  { %v5729_v46 = vpop.eup %5728 }
0x3dec   :  { %v3284_v48 = vmul.f32 %v5729_v46, %v5727_v44 }
0x3dee   :  { %3286 = vrot.lane.b32.xlu1 %v3284_v48, %s5936_s13 }
0x3e60   :  { %v6747_v33 = vpop.permute.xlu1 %3286 }
0x3e61   :  { %4944 = vmatmul.mubr.msk.f32.vlgmr.msra.gmra.mxu1 %vm2987_vm4, %v6747_v33 }
0x3e62   :  { %3507 = vmatpush1.msra.mxu1 %v6562_v10  ;;  %3554 = vmatprep.mubr.f32.mxu1 %v5934_v0 }
0x3e63   :  { %3508 = vmatprep.subr.mxu1 %v6564_v5 }
0x3e64   :  { %3509 = vmatpush1.msra.mxu1 %v6567_v1 }
0x3e65   :  { %3510 = vmatprep.subr.mxu1 %v6570_v6 }
0x3e66   :  { %3511 = vmatpush1.msra.mxu1 %v6573_v36 }
0x3e67   :  { %3512 = vmatprep.subr.mxu1 %v6576_v3 }
0x3e68   :  { %3513 = vmatpush1.msra.mxu1 %v6579_v62 }
0x3e69   :  { %3514 = vmatprep.subr.mxu1 %v6582_v4 }
0x3e6a   :  { %3515 = vmatpush1.msra.mxu1 %v6585_v7 }
0x3e6b   :  { %3516 = vmatprep.subr.mxu1 %v6588_v8 }
0x3e6c   :  { %3517 = vmatpush1.msra.mxu1 %v6591_v11 }
0x3e6d   :  { %3518 = vmatprep.subr.mxu1 %v6594_v42 }
0x3e6e   :  { %3519 = vmatpush1.msra.mxu1 %v6597_v13 }
0x3e6f   :  { %3520 = vmatprep.subr.mxu1 %v6601_v28 }
0x3e70   :  { %3521 = vmatpush1.msra.mxu1 %v6604_v20 }
0x3e71   :  { %3706 = vmatprep.subr.mxu1 %v6557_v61 }
0x3f21   :  { %v3356_v34 = vpop.f32.mrf.mxu1 }
0x3f22   :  { %v3361_v50 = vadd.f32 %v3356_v34, %v2959_v49 }
0x3f23   :  { %v3358_v19 = vpop.f32.mrf.mxu1 }
0x3f24   :  { %v4945_v51 = vmul.f32 -1.442695, %v3361_v50  ;;  %v3362_v35 = vadd.f32 %v3358_v19, %v2961_v47 }
0x3f26   :  { %5730 = vpow2.f32 %v4945_v51  ;;  %v4946_v61 = vmul.f32 -1.442695, %v3362_v35 }
0x3f27   :  { %5732 = vtanh.f32 %v3362_v35 }
0x3f33   :  { %v5731_v25 = vpop.eup %5730 }
0x3f34   :  { %v3369_v12 = vadd.f32 1.0, %v5731_v25  ;;  %v5733_v23 = vpop.eup %5732 }
0x3f36   :  { %5734 = vrcp.f32 %v3369_v12 }
0x3f37   :  { %5736 = vpow2.f32 %v4946_v61 }
0x3f43   :  { %v5735_v22 = vpop.eup %5734 }
0x3f44   :  { %v3377_v18 = vmul.f32 %v5735_v22, %v5733_v23  ;;  %v5737_v52 = vpop.eup %5736  ;;  %v3376_v26 = vmul.f32 %v5735_v22, %v3282_v32 }
0x3f45   :  { %v3370_v24 = vadd.f32 1.0, %v5737_v52 }
0x3f46   :  { %3379 = vrot.lane.b32.xlu0 %v3377_v18, %s5936_s13 }
0x3f47   :  { %5738 = vrcp.f32 %v3370_v24 }
0x3f54   :  { %v5739_v57 = vpop.eup %5738 }
0x3fb8   :  { %v3380_v29 = vpop.permute.xlu0 %3379 }
0x3fb9   :  { %v3382_v15 = vadd.f32 %v3380_v29, %v3376_v26  ;;  %v3800_v26 = vld [vmem:[#allocation2 + $0x270] sm:$0xff] }
0x3fbb   :  { %5740 = vtanh.f32 %v3382_v15 }
0x3fc8   :  { %v5741_v58 = vpop.eup %5740 }
0x3fc9   :  { %v3384_v16 = vmul.f32 %v5741_v58, %v5739_v57  ;;  %v3798_v57 = vld [vmem:[#allocation2 + $0x260] sm:$0xff]  ;;  %v3797_v58 = vld [vmem:[#allocation2 + $0x258] sm:$0xff] }
0x3fcb   :  { %3386 = vrot.lane.b32.xlu1 %v3384_v16, %s5936_s13  ;;  %v3796_v16 = vld [vmem:[#allocation2 + $0x250] sm:$0xff] }
0x403d   :  { %v6773_v45 = vpop.permute.xlu1 %3386 }
0x403e   :  { %4947 = vmatmul.mubr.msk.f32.vlgmr.msra.gmra.mxu0 %vm2987_vm4, %v6773_v45 }
0x403f   :  { %3607 = vmatpush1.msra.mxu0 %v6562_v10  ;;  %3654 = vmatprep.mubr.f32.mxu0 %v5934_v0 }
0x4040   :  { %3608 = vmatprep.subr.mxu0 %v6564_v5 }
0x4041   :  { %3609 = vmatpush1.msra.mxu0 %v6567_v1 }
0x4042   :  { %3610 = vmatprep.subr.mxu0 %v6570_v6 }
0x4043   :  { %3611 = vmatpush1.msra.mxu0 %v6573_v36 }
0x4044   :  { %3612 = vmatprep.subr.mxu0 %v6576_v3 }
0x4045   :  { %3613 = vmatpush1.msra.mxu0 %v6579_v62 }
0x4046   :  { %3614 = vmatprep.subr.mxu0 %v6582_v4 }
0x4047   :  { %3615 = vmatpush1.msra.mxu0 %v6585_v7 }
0x4048   :  { %3616 = vmatprep.subr.mxu0 %v6588_v8 }
0x4049   :  { %3617 = vmatpush1.msra.mxu0 %v6591_v11 }
0x404a   :  { %3618 = vmatprep.subr.mxu0 %v6594_v42 }
0x404b   :  { %3619 = vmatpush1.msra.mxu0 %v6597_v13 }
0x404c   :  { %3620 = vmatprep.subr.mxu0 %v6601_v28 }
0x404d   :  { %3621 = vmatpush1.msra.mxu0 %v6604_v20 }
0x40fe   :  { %v3456_v21 = vpop.f32.mrf.mxu0 }
0x40ff   :  { %v3461_v37 = vadd.f32 %v3456_v21, %v2965_v41  ;;  %v3795_v41 = vld [vmem:[#allocation2 + $0x248] sm:$0xff]  ;;  %v3794_v21 = vld [vmem:[#allocation2 + $0x240] sm:$0xff] }
0x4100   :  { %v3458_v40 = vpop.f32.mrf.mxu0 }
0x4101   :  { %v4948_v38 = vmul.f32 -1.442695, %v3461_v37  ;;  %v3462_v32 = vadd.f32 %v3458_v40, %v2967_v43  ;;  %v3793_v37 = vld [vmem:[#allocation2 + $0x238] sm:$0xff]  ;;  %v3791_v40 = vld [vmem:[#allocation2 + $0x228] sm:$0xff]  ;;  %v3790_v43 = vld [vmem:[#allocation2 + $0x220] sm:$0xff] }
0x4103   :  { %5742 = vpow2.f32 %v4948_v38  ;;  %v4949_v50 = vmul.f32 -1.442695, %v3462_v32  ;;  %v3792_v38 = vld [vmem:[#allocation2 + $0x230] sm:$0xff] }
0x4104   :  { %5744 = vtanh.f32 %v3462_v32  ;;  %v3789_v32 = vld [vmem:[#allocation2 + $0x218] sm:$0xff] }
0x4110   :  { %v5743_v44 = vpop.eup %5742 }
0x4111   :  { %v3469_v46 = vadd.f32 1.0, %v5743_v44  ;;  %v5745_v48 = vpop.eup %5744  ;;  %v3788_v44 = vld [vmem:[#allocation2 + $0x210] sm:$0xff] }
0x4113   :  { %5746 = vrcp.f32 %v3469_v46  ;;  %v3787_v46 = vld [vmem:[#allocation2 + $0x208] sm:$0xff] }
0x4114   :  { %5748 = vpow2.f32 %v4949_v50 }
0x4120   :  { %v5747_v49 = vpop.eup %5746 }
0x4121   :  { %v3477_v34 = vmul.f32 %v5747_v49, %v5745_v48  ;;  %v5749_v39 = vpop.eup %5748  ;;  %v3476_v19 = vmul.f32 %v5747_v49, %v3382_v15  ;;  %v3799_v15 = vld [vmem:[#allocation2 + $0x268] sm:$0xff]  ;;  %v3786_v48 = vld [vmem:[#allocation2 + $0x200] sm:$0xff] }
0x4122   :  { %v3470_v51 = vadd.f32 1.0, %v5749_v39 }
0x4123   :  { %3479 = vrot.lane.b32.xlu0 %v3477_v34, %s5936_s13 }
0x4124   :  { %5750 = vrcp.f32 %v3470_v51 }
0x4131   :  { %v5751_v53 = vpop.eup %5750 }
0x4195   :  { %v3480_v47 = vpop.permute.xlu0 %3479 }
0x4196   :  { %v3482_v35 = vadd.f32 %v3480_v47, %v3476_v19 }
0x4198   :  { %5752 = vtanh.f32 %v3482_v35 }
0x41a5   :  { %v5753_v25 = vpop.eup %5752 }
0x41a6   :  { %v3484_v12 = vmul.f32 %v5753_v25, %v5751_v53  ;;  %v6852_v53 = vld [vmem:[#allocation4 + $0x278] sm:$0xff] }
0x41a8   :  { %3486 = vrot.lane.b32.xlu1 %v3484_v12, %s5936_s13 }
0x421a   :  { %v6799_v23 = vpop.permute.xlu1 %3486 }
0x421b   :  { %4950 = vmatmul.mubr.msk.f32.vlgmr.msra.gmra.mxu1 %vm2987_vm4, %v6799_v23 }
0x421c   :  { %3707 = vmatpush1.msra.mxu1 %v6562_v10  ;;  %3754 = vmatprep.mubr.f32.mxu1 %v5934_v0  ;;  %v2971_v10 = vadd.f32 %v6731_v54, %v6655_v30 }
0x421d   :  { %3708 = vmatprep.subr.mxu1 %v6564_v5 }
0x421e   :  { %3709 = vmatpush1.msra.mxu1 %v6567_v1 }
0x421f   :  { %3710 = vmatprep.subr.mxu1 %v6570_v6 }
0x4220   :  { %3711 = vmatpush1.msra.mxu1 %v6573_v36 }
0x4221   :  { %3712 = vmatprep.subr.mxu1 %v6576_v3  ;;  %v2973_v3 = vadd.f32 %v6733_v56, %v6661_v31 }
0x4222   :  { %3713 = vmatpush1.msra.mxu1 %v6579_v62 }
0x4223   :  { %3714 = vmatprep.subr.mxu1 %v6582_v4 }
0x4224   :  { %3715 = vmatpush1.msra.mxu1 %v6585_v7 }
0x4225   :  { %3716 = vmatprep.subr.mxu1 %v6588_v8 }
0x4226   :  { %3717 = vmatpush1.msra.mxu1 %v6591_v11 }
0x4227   :  { %3718 = vmatprep.subr.mxu1 %v6594_v42 }
0x4228   :  { %3719 = vmatpush1.msra.mxu1 %v6597_v13  ;;  %v3801_v13 = vld [vmem:[#allocation2 + $0x278] sm:$0xff] }
0x4229   :  { %3720 = vmatprep.subr.mxu1 %v6601_v28  ;;  %3853 = vmatprep.subr.mxu0 %v3801_v13 }
0x422a   :  { %3721 = vmatpush1.msra.mxu1 %v6604_v20 }
0x422b   :  { %3966 = vmatprep.subr.mxu1 %v6852_v53 }
0x42db   :  { %v3556_v5 = vpop.f32.mrf.mxu1 }
0x42dc   :  { %v3561_v1 = vadd.f32 %v3556_v5, %v2971_v10  ;;  %v6860_v5 = vld [vmem:[#allocation4 + $0x270] sm:$0xff] }
0x42dd   :  { %v3558_v36 = vpop.f32.mrf.mxu1 }
0x42de   :  { %v4951_v6 = vmul.f32 -1.442695, %v3561_v1  ;;  %v3562_v62 = vadd.f32 %v3558_v36, %v2973_v3  ;;  %v6862_v1 = vld [vmem:[#allocation4 + $0x268] sm:$0xff]  ;;  %v6868_v36 = vld [vmem:[#allocation4 + $0x258] sm:$0xff]  ;;  %v6871_v3 = vld [vmem:[#allocation4 + $0x250] sm:$0xff] }
0x42e0   :  { %5754 = vpow2.f32 %v4951_v6  ;;  %v4952_v28 = vmul.f32 -1.442695, %v3562_v62  ;;  %v6865_v6 = vld [vmem:[#allocation4 + $0x260] sm:$0xff] }
0x42e1   :  { %5756 = vtanh.f32 %v3562_v62  ;;  %v6874_v62 = vld [vmem:[#allocation4 + $0x248] sm:$0xff] }
0x42ed   :  { %v5755_v4 = vpop.eup %5754 }
0x42ee   :  { %v3569_v7 = vadd.f32 1.0, %v5755_v4  ;;  %v5757_v8 = vpop.eup %5756  ;;  %v6877_v4 = vld [vmem:[#allocation4 + $0x240] sm:$0xff] }
0x42f0   :  { %5758 = vrcp.f32 %v3569_v7  ;;  %v6880_v7 = vld [vmem:[#allocation4 + $0x238] sm:$0xff] }
0x42f1   :  { %5760 = vpow2.f32 %v4952_v28  ;;  %v6889_v28 = vld [vmem:[#allocation4 + $0x220] sm:$0xff] }
0x42fd   :  { %v5759_v11 = vpop.eup %5758 }
0x42fe   :  { %v3577_v42 = vmul.f32 %v5759_v11, %v5757_v8  ;;  %v5761_v20 = vpop.eup %5760  ;;  %v3576_v22 = vmul.f32 %v5759_v11, %v3482_v35  ;;  %v6883_v8 = vld [vmem:[#allocation4 + $0x230] sm:$0xff] }
0x42ff   :  { %v3570_v54 = vadd.f32 1.0, %v5761_v20 }
0x4300   :  { %3579 = vrot.lane.b32.xlu0 %v3577_v42, %s5936_s13  ;;  %v6886_v42 = vld [vmem:[#allocation4 + $0x228] sm:$0xff] }
0x4301   :  { %5762 = vrcp.f32 %v3570_v54  ;;  %v6892_v54 = vld [vmem:[#allocation4 + $0x218] sm:$0xff] }
0x430e   :  { %v5763_v56 = vpop.eup %5762 }
0x4372   :  { %v3580_v18 = vpop.permute.xlu0 %3579 }
0x4373   :  { %v6824_v61 = vadd.f32 %v3580_v18, %v3576_v22  ;;  %v6895_v22 = vld [vmem:[#allocation4 + $0x210] sm:$0xff]  ;;  %v6899_v18 = vld [vmem:[#allocation4 + $0x208] sm:$0xff] }
0x4375   :  { %5764 = vtanh.f32 %v6824_v61 }
0x4382   :  { %v5765_v52 = vpop.eup %5764 }
0x4383   :  { %v3584_v24 = vmul.f32 %v5765_v52, %v5763_v56  ;;  %v4959_v52 = vld [vmem:[%s7160_s3 + $0x4] ss:$8 sm:$0x3] }
0x4385   :  { %3586 = vrot.lane.b32.xlu1 %v3584_v24, %s5936_s13 }
0x43f7   :  { %v3587_v29 = vpop.permute.xlu1 %3586 }
0x43f8   :  { %4953 = vmatmul.mubr.msk.f32.vlgmr.msra.gmra.mxu0 %vm2987_vm4, %v3587_v29 }
0x43f9   :  { %3854 = vmatpush1.msra.mxu0 %v3800_v26  ;;  %3901 = vmatprep.mubr.f32.mxu0 %v5934_v0  ;;  %v2983_v26 = vadd.f32 %v6739_v63, %v6655_v30 }
0x43fa   :  { %3855 = vmatprep.subr.mxu0 %v3799_v15 }
0x43fb   :  { %3856 = vmatpush1.msra.mxu0 %v3798_v57 }
0x43fc   :  { %3857 = vmatprep.subr.mxu0 %v3797_v58 }
0x43fd   :  { %3858 = vmatpush1.msra.mxu0 %v3796_v16 }
0x43fe   :  { %3859 = vmatprep.subr.mxu0 %v3795_v41 }
0x43ff   :  { %3860 = vmatpush1.msra.mxu0 %v3794_v21 }
0x4400   :  { %3861 = vmatprep.subr.mxu0 %v3793_v37 }
0x4401   :  { %3862 = vmatpush1.msra.mxu0 %v3792_v38 }
0x4402   :  { %3863 = vmatprep.subr.mxu0 %v3791_v40  ;;  %v6957_v40 = vrot.slane %v4959_v52, %v2865_v17 }
0x4403   :  { %3864 = vmatpush1.msra.mxu0 %v3790_v43 }
0x4404   :  { %3865 = vmatprep.subr.mxu0 %v3789_v32 }
0x4405   :  { %3866 = vmatpush1.msra.mxu0 %v3788_v44 }
0x4406   :  { %3867 = vmatprep.subr.mxu0 %v3787_v46  ;;  %v2985_v46 = vadd.f32 %v6741_v55, %v6661_v31 }
0x4407   :  { %3868 = vmatpush1.msra.mxu0 %v3786_v48 }
0x4408   :  { %4960 = vmatmul.mubr.msk.f32.vlgmr.msra.gmra.mxu0 %vm2987_vm4, %v6673_v60  ;;  %v2977_v60 = vadd.f32 %v6735_v59, %v6655_v30  ;;  %4166 = vmatprep.subr.mxu0 %v6852_v53 }
0x4409   :  { %3907 = vmatprep.mubr.f32.mxu0 %v5934_v0  ;;  %4167 = vmatpush1.msra.mxu0 %v6860_v5 }
0x440a   :  { %4168 = vmatprep.subr.mxu0 %v6862_v1 }
0x440b   :  { %4169 = vmatpush1.msra.mxu0 %v6865_v6 }
0x440c   :  { %4961 = vmatmul.mubr.msk.f32.gmra.mxu0 %vm2987_vm4, %v6704_v9  ;;  %4170 = vmatprep.subr.mxu0 %v6868_v36 }
0x440d   :  { %3913 = vmatprep.mubr.f32.mxu0 %v5934_v0  ;;  %4171 = vmatpush1.msra.mxu0 %v6871_v3 }
0x440e   :  { %4172 = vmatprep.subr.mxu0 %v6874_v62 }
0x440f   :  { %4173 = vmatpush1.msra.mxu0 %v6877_v4 }
0x4410   :  { %4962 = vmatmul.mubr.msk.f32.gmra.mxu0 %vm2987_vm4, %v6747_v33  ;;  %4174 = vmatprep.subr.mxu0 %v6880_v7 }
0x4411   :  { %3919 = vmatprep.mubr.f32.mxu0 %v5934_v0  ;;  %4175 = vmatpush1.msra.mxu0 %v6883_v8 }
0x4412   :  { %4176 = vmatprep.subr.mxu0 %v6886_v42 }
0x4413   :  { %4177 = vmatpush1.msra.mxu0 %v6889_v28 }
0x4414   :  { %4963 = vmatmul.mubr.msk.f32.gmra.mxu0 %vm2987_vm4, %v6773_v45  ;;  %v2979_v45 = vadd.f32 %v6737_v2, %v6661_v31  ;;  %4178 = vmatprep.subr.mxu0 %v6892_v54 }
0x4415   :  { %3925 = vmatprep.mubr.f32.mxu0 %v5934_v0  ;;  %4179 = vmatpush1.msra.mxu0 %v6895_v22 }
0x4416   :  { %4180 = vmatprep.subr.mxu0 %v6899_v18 }
0x4418   :  { %4964 = vmatmul.mubr.msk.f32.gmra.mxu0 %vm2987_vm4, %v6799_v23 }
0x4419   :  { %3931 = vmatprep.mubr.f32.mxu0 %v5934_v0 }
0x441c   :  { %4965 = vmatmul.mubr.msk.f32.gmra.mxu0 %vm2987_vm4, %v3587_v29  ;;  %v6952_v29 = vrot.slane %v4959_v52, %v2861_v27 }
0x441d   :  { %3937 = vmatprep.mubr.f32.mxu0 %v5934_v0 }
0x44b8   :  { %v3656_v9 = vpop.f32.mrf.mxu0 }
0x44b9   :  { %v3661_v33 = vadd.f32 %v3656_v9, %v2977_v60 }
0x44ba   :  { %v3658_v34 = vpop.f32.mrf.mxu0 }
0x44bb   :  { %v4954_v49 = vmul.f32 -1.442695, %v3661_v33  ;;  %v3662_v50 = vadd.f32 %v3658_v34, %v2979_v45 }
0x44bd   :  { %5766 = vpow2.f32 %v4954_v49  ;;  %v4955_v59 = vmul.f32 -1.442695, %v3662_v50 }
0x44be   :  { %5768 = vtanh.f32 %v3662_v50 }
0x44c8   :  { %v3903_v15 = vpop.f32.mrf.mxu0 }
0x44c9   :  { %v3904_v16 = vadd.f32 %v3903_v15, %v6952_v29 }
0x44ca   :  { %v5767_v39 = vpop.eup %5766  ;;  %v3905_v30 = vpop.f32.mrf.mxu0 }
0x44cb   :  { %v3669_v51 = vadd.f32 1.0, %v5767_v39  ;;  %v5769_v19 = vpop.eup %5768  ;;  %v3906_v27 = vadd.f32 %v3905_v30, %v6957_v40 }
0x44cd   :  { %5770 = vrcp.f32 %v3669_v51 }
0x44ce   :  { %5772 = vpow2.f32 %v4955_v59 }
0x44da   :  { %v5771_v47 = vpop.eup %5770 }
0x44db   :  { %v3677_v35 = vmul.f32 %v5771_v47, %v5769_v19  ;;  %v5773_v25 = vpop.eup %5772  ;;  %v3676_v12 = vmul.f32 %v5771_v47, %v6824_v61  ;;  %v6902_v61 = vld [vmem:[#allocation4 + $0x200] sm:$0xff] }
0x44dc   :  { %v3670_v2 = vadd.f32 1.0, %v5773_v25  ;;  %4181 = vmatpush1.msra.mxu0 %v6902_v61 }
0x44dd   :  { %3679 = vrot.lane.b32.xlu0 %v3677_v35, %s5936_s13  ;;  %4366 = vmatprep.subr.mxu0 %v6852_v53 }
0x44de   :  { %5774 = vrcp.f32 %v3670_v2 }
0x44eb   :  { %v5775_v11 = vpop.eup %5774 }
0x454f   :  { %v3680_v23 = vpop.permute.xlu0 %3679 }
0x4550   :  { %v6857_v10 = vadd.f32 %v3680_v23, %v3676_v12 }
0x4552   :  { %5776 = vtanh.f32 %v6857_v10 }
0x455f   :  { %v5777_v13 = vpop.eup %5776 }
0x4560   :  { %v3684_v20 = vmul.f32 %v5777_v13, %v5775_v11 }
0x4562   :  { %3686 = vrot.lane.b32.xlu1 %v3684_v20, %s5936_s13 }
0x45d4   :  { %v3687_v56 = vpop.permute.xlu1 %3686 }
0x45d5   :  { %4956 = vmatmul.mubr.msk.f32.vlgmr.msra.gmra.mxu1 %vm2987_vm4, %v3687_v56  ;;  %4966 = vmatmul.mubr.msk.f32.gmra.mxu0 %vm2987_vm4, %v3687_v56 }
0x45d6   :  { %3967 = vmatpush1.msra.mxu1 %v6860_v5  ;;  %4014 = vmatprep.mubr.f32.mxu1 %v5934_v0 }
0x45d7   :  { %3968 = vmatprep.subr.mxu1 %v6862_v1  ;;  %3943 = vmatprep.mubr.f32.mxu0 %v5934_v0 }
0x45d8   :  { %3969 = vmatpush1.msra.mxu1 %v6865_v6 }
0x45d9   :  { %3970 = vmatprep.subr.mxu1 %v6868_v36 }
0x45da   :  { %3971 = vmatpush1.msra.mxu1 %v6871_v3 }
0x45db   :  { %3972 = vmatprep.subr.mxu1 %v6874_v62 }
0x45dc   :  { %3973 = vmatpush1.msra.mxu1 %v6877_v4 }
0x45dd   :  { %3974 = vmatprep.subr.mxu1 %v6880_v7 }
0x45de   :  { %3975 = vmatpush1.msra.mxu1 %v6883_v8 }
0x45df   :  { %3976 = vmatprep.subr.mxu1 %v6886_v42 }
0x45e0   :  { %3977 = vmatpush1.msra.mxu1 %v6889_v28 }
0x45e1   :  { %3978 = vmatprep.subr.mxu1 %v6892_v54 }
0x45e2   :  { %3979 = vmatpush1.msra.mxu1 %v6895_v22 }
0x45e3   :  { %3980 = vmatprep.subr.mxu1 %v6899_v18 }
0x45e4   :  { %3981 = vmatpush1.msra.mxu1 %v6902_v61 }
0x45e5   :  { %4015 = vmatmul.mubr.f32.vlgmr.msra.gmra.mxu1 %v5934_v0  ;;  %4066 = vmatprep.subr.mxu1 %v6852_v53 }
0x45e6   :  { %4067 = vmatpush1.msra.mxu1 %v6860_v5  ;;  %4114 = vmatprep.mubr.f32.mxu1 %v5934_v0 }
0x45e7   :  { %4068 = vmatprep.subr.mxu1 %v6862_v1 }
0x45e8   :  { %4069 = vmatpush1.msra.mxu1 %v6865_v6 }
0x45e9   :  { %4070 = vmatprep.subr.mxu1 %v6868_v36 }
0x45ea   :  { %4071 = vmatpush1.msra.mxu1 %v6871_v3 }
0x45eb   :  { %4072 = vmatprep.subr.mxu1 %v6874_v62 }
0x45ec   :  { %4073 = vmatpush1.msra.mxu1 %v6877_v4 }
0x45ed   :  { %4074 = vmatprep.subr.mxu1 %v6880_v7 }
0x45ee   :  { %4075 = vmatpush1.msra.mxu1 %v6883_v8 }
0x45ef   :  { %4076 = vmatprep.subr.mxu1 %v6886_v42 }
0x45f0   :  { %4077 = vmatpush1.msra.mxu1 %v6889_v28 }
0x45f1   :  { %4078 = vmatprep.subr.mxu1 %v6892_v54 }
0x45f2   :  { %4079 = vmatpush1.msra.mxu1 %v6895_v22 }
0x45f3   :  { %4080 = vmatprep.subr.mxu1 %v6899_v18 }
0x45f4   :  { %4081 = vmatpush1.msra.mxu1 %v6902_v61 }
0x45f5   :  { %4266 = vmatprep.subr.mxu1 %v6852_v53 }
0x4695   :  { %v3756_v24 = vpop.f32.mrf.mxu1 }
0x4696   :  { %v3761_v57 = vadd.f32 %v3756_v24, %v2983_v26  ;;  %v3909_v26 = vpop.f32.mrf.mxu0 }
0x4697   :  { %v3758_v58 = vpop.f32.mrf.mxu1  ;;  %v3910_v15 = vadd.f32 %v3909_v26, %v6952_v29 }
0x4698   :  { %v4957_v41 = vmul.f32 -1.442695, %v3761_v57  ;;  %v3762_v9 = vadd.f32 %v3758_v58, %v2985_v46 }
0x469a   :  { %5778 = vpow2.f32 %v4957_v41  ;;  %v4958_v39 = vmul.f32 -1.442695, %v3762_v9  ;;  %v3911_v41 = vpop.f32.mrf.mxu0 }
0x46a5   :  { %v4016_v21 = vpop.f32.mrf.mxu1 }
0x46a6   :  { %v4021_v37 = vadd.f32 %v4016_v21, %v3904_v16 }
0x46a7   :  { %v4018_v63 = vpop.f32.mrf.mxu1  ;;  %v5779_v43 = vpop.eup %5778 }
0x46a8   :  { %v4968_v38 = vmul.f32 -1.442695, %v4021_v37  ;;  %v4022_v32 = vadd.f32 %v4018_v63, %v3906_v27  ;;  %v3769_v48 = vadd.f32 1.0, %v5779_v43  ;;  %v3912_v37 = vadd.f32 %v3911_v41, %v6957_v40 }
0x46aa   :  { %5780 = vpow2.f32 %v4968_v38  ;;  %v4969_v50 = vmul.f32 -1.442695, %v4022_v32 }
0x46ab   :  { %5782 = vtanh.f32 %v4022_v32 }
0x46b7   :  { %v5781_v44 = vpop.eup %5780 }
0x46b8   :  { %v4029_v60 = vadd.f32 1.0, %v5781_v44  ;;  %v5783_v14 = vpop.eup %5782 }
0x46ba   :  { %5784 = vrcp.f32 %v4029_v60 }
0x46bb   :  { %5786 = vrcp.f32 %v3769_v48 }
0x46bc   :  { %5788 = vtanh.f32 %v3762_v9 }
0x46bd   :  { %5790 = vpow2.f32 %v4969_v50 }
0x46be   :  { %5792 = vpow2.f32 %v4958_v39 }
0x46c7   :  { %v5785_v17 = vpop.eup %5784 }
0x46c8   :  { %v4037_v33 = vmul.f32 %v5785_v17, %v5783_v14  ;;  %v5787_v49 = vpop.eup %5786  ;;  %v4036_v19 = vmul.f32 0.0, %v5785_v17 }
0x46c9   :  { %v5789_v34 = vpop.eup %5788  ;;  %v3776_v25 = vmul.f32 %v5787_v49, %v6857_v10 }
0x46ca   :  { %4039 = vrot.lane.b32.xlu0 %v4037_v33, %s5936_s13  ;;  %v3777_v45 = vmul.f32 %v5789_v34, %v5787_v49  ;;  %v5791_v31 = vpop.eup %5790 }
0x46cb   :  { %v4030_v55 = vadd.f32 1.0, %v5791_v31  ;;  %v5793_v51 = vpop.eup %5792 }
0x46cc   :  { %v3770_v59 = vadd.f32 1.0, %v5793_v51 }
0x46cd   :  { %5794 = vrcp.f32 %v4030_v55 }
0x46ce   :  { %3779 = vrot.lane.b32.xlu0 %v3777_v45, %s5936_s13  ;;  %v3915_v45 = vpop.f32.mrf.mxu0 }
0x46d0   :  { %v3917_v50 = vpop.f32.mrf.mxu0 }
0x46d2   :  { %v3921_v39 = vpop.f32.mrf.mxu0 }
0x46d4   :  { %v7009_v31 = vpop.f32.mrf.mxu0 }
0x46d6   :  { %v7011_v55 = vpop.f32.mrf.mxu0 }
0x46d8   :  { %v7013_v51 = vpop.f32.mrf.mxu0 }
0x46da   :  { %v5795_v23 = vpop.eup %5794 }
0x473c   :  { %v4040_v47 = vpop.permute.xlu0 %4039 }
0x473d   :  { %v4042_v35 = vadd.f32 %v4040_v47, %v4036_v19  ;;  %v7015_v19 = vpop.f32.mrf.mxu0 }
0x473f   :  { %5796 = vtanh.f32 %v4042_v35  ;;  %v7017_v47 = vpop.f32.mrf.mxu0 }
0x4740   :  { %v3780_v2 = vpop.permute.xlu0 %3779  ;;  %5798 = vrcp.f32 %v3770_v59 }
0x4741   :  { %v3782_v12 = vadd.f32 %v3780_v2, %v3776_v25 }
0x4743   :  { %5800 = vtanh.f32 %v3782_v12  ;;  %v3916_v12 = vadd.f32 %v3915_v45, %v6952_v29 }
0x474c   :  { %v5797_v11 = vpop.eup %5796 }
0x474d   :  { %v4044_v13 = vmul.f32 %v5797_v11, %v5795_v23  ;;  %v5799_v20 = vpop.eup %5798 }
0x474f   :  { %4046 = vrot.lane.b32.xlu1 %v4044_v13, %s5936_s13 }
0x4750   :  { %v5801_v56 = vpop.eup %5800 }
0x4751   :  { %v3784_v52 = vmul.f32 %v5801_v56, %v5799_v20  ;;  %v3918_v56 = vadd.f32 %v3917_v50, %v6957_v40 }
0x4753   :  { %3833 = vrot.lane.b32.xlu0 %v3784_v52, %s5936_s13 }
0x47c1   :  { %v4047_v24 = vpop.permute.xlu1 %4046 }
0x47c2   :  { %4970 = vmatmul.mubr.msk.f32.vlgmr.msra.gmra.mxu1 %vm2987_vm4, %v4047_v24 }
0x47c3   :  { %4267 = vmatpush1.msra.mxu1 %v6860_v5  ;;  %4314 = vmatprep.mubr.f32.mxu1 %v5934_v0 }
0x47c4   :  { %4268 = vmatprep.subr.mxu1 %v6862_v1 }
0x47c5   :  { %v3834_v10 = vpop.permute.xlu0 %3833  ;;  %4269 = vmatpush1.msra.mxu1 %v6865_v6 }
0x47c6   :  { %4967 = vmatmul.mubr.msk.f32.gmra.mxu0 %vm2987_vm4, %v3834_v10  ;;  %4270 = vmatprep.subr.mxu1 %v6868_v36 }
0x47c7   :  { %4214 = vmatprep.mubr.f32.mxu0 %v5934_v0  ;;  %4271 = vmatpush1.msra.mxu1 %v6871_v3 }
0x47c8   :  { %4272 = vmatprep.subr.mxu1 %v6874_v62 }
0x47c9   :  { %4273 = vmatpush1.msra.mxu1 %v6877_v4 }
0x47ca   :  { %4274 = vmatprep.subr.mxu1 %v6880_v7 }
0x47cb   :  { %4275 = vmatpush1.msra.mxu1 %v6883_v8 }
0x47cc   :  { %4276 = vmatprep.subr.mxu1 %v6886_v42 }
0x47cd   :  { %4277 = vmatpush1.msra.mxu1 %v6889_v28 }
0x47ce   :  { %4278 = vmatprep.subr.mxu1 %v6892_v54 }
0x47cf   :  { %4279 = vmatpush1.msra.mxu1 %v6895_v22 }
0x47d0   :  { %4280 = vmatprep.subr.mxu1 %v6899_v18 }
0x47d1   :  { %4281 = vmatpush1.msra.mxu1 %v6902_v61 }
0x47d2   :  { %4466 = vmatprep.subr.mxu1 %v6852_v53 }
0x4882   :  { %v4116_v57 = vpop.f32.mrf.mxu1 }
0x4883   :  { %v4121_v58 = vadd.f32 %v4116_v57, %v3910_v15 }
0x4884   :  { %v4118_v21 = vpop.f32.mrf.mxu1 }
0x4885   :  { %v4971_v16 = vmul.f32 -1.442695, %v4121_v58  ;;  %v4122_v38 = vadd.f32 %v4118_v21, %v3912_v37 }
0x4887   :  { %5802 = vpow2.f32 %v4971_v16  ;;  %v4972_v44 = vmul.f32 -1.442695, %v4122_v38 }
0x4888   :  { %5804 = vtanh.f32 %v4122_v38 }
0x4894   :  { %v5803_v30 = vpop.eup %5802 }
0x4895   :  { %v4129_v63 = vadd.f32 1.0, %v5803_v30  ;;  %v5805_v27 = vpop.eup %5804 }
0x4897   :  { %5806 = vrcp.f32 %v4129_v63 }
0x4898   :  { %5808 = vpow2.f32 %v4972_v44 }
0x48a4   :  { %v5807_v43 = vpop.eup %5806 }
0x48a5   :  { %v4137_v32 = vmul.f32 %v5807_v43, %v5805_v27  ;;  %v5809_v46 = vpop.eup %5808  ;;  %v4136_v60 = vmul.f32 %v5807_v43, %v4042_v35  ;;  %v7019_v35 = vpop.f32.mrf.mxu0 }
0x48a6   :  { %v4130_v48 = vadd.f32 1.0, %v5809_v46 }
0x48a7   :  { %4139 = vrot.lane.b32.xlu1 %v4137_v32, %s5936_s13  ;;  %v7021_v59 = vpop.f32.mrf.mxu0  ;;  %v3922_v32 = vadd.f32 %v3921_v39, %v6952_v29 }
0x48a8   :  { %5810 = vrcp.f32 %v4130_v48 }
0x48a9   :  { %v7023_v25 = vpop.f32.mrf.mxu0 }
0x48ab   :  { %v7025_v2 = vpop.f32.mrf.mxu0 }
0x48b5   :  { %v5811_v17 = vpop.eup %5810 }
0x4919   :  { %v4140_v9 = vpop.permute.xlu1 %4139 }
0x491a   :  { %v4142_v14 = vadd.f32 %v4140_v9, %v4136_v60  ;;  %v3924_v9 = vadd.f32 %v7009_v31, %v6957_v40 }
0x491c   :  { %5812 = vtanh.f32 %v4142_v14 }
0x4929   :  { %v5813_v33 = vpop.eup %5812 }
0x492a   :  { %v4144_v49 = vmul.f32 %v5813_v33, %v5811_v17 }
0x492c   :  { %4146 = vrot.lane.b32.xlu1 %v4144_v49, %s5936_s13 }
0x499e   :  { %v4147_v34 = vpop.permute.xlu1 %4146 }
0x499f   :  { %4973 = vmatmul.mubr.msk.f32.vlgmr.msra.gmra.mxu0 %vm2987_vm4, %v4147_v34 }
0x49a0   :  { %4367 = vmatpush1.msra.mxu0 %v6860_v5  ;;  %4414 = vmatprep.mubr.f32.mxu0 %v5934_v0 }
0x49a1   :  { %4368 = vmatprep.subr.mxu0 %v6862_v1 }
0x49a2   :  { %4369 = vmatpush1.msra.mxu0 %v6865_v6 }
0x49a3   :  { %4370 = vmatprep.subr.mxu0 %v6868_v36 }
0x49a4   :  { %4371 = vmatpush1.msra.mxu0 %v6871_v3 }
0x49a5   :  { %4372 = vmatprep.subr.mxu0 %v6874_v62 }
0x49a6   :  { %4373 = vmatpush1.msra.mxu0 %v6877_v4 }
0x49a7   :  { %4374 = vmatprep.subr.mxu0 %v6880_v7 }
0x49a8   :  { %4375 = vmatpush1.msra.mxu0 %v6883_v8 }
0x49a9   :  { %4376 = vmatprep.subr.mxu0 %v6886_v42 }
0x49aa   :  { %4377 = vmatpush1.msra.mxu0 %v6889_v28 }
0x49ab   :  { %4378 = vmatprep.subr.mxu0 %v6892_v54 }
0x49ac   :  { %4379 = vmatpush1.msra.mxu0 %v6895_v22 }
0x49ad   :  { %4380 = vmatprep.subr.mxu0 %v6899_v18 }
0x49ae   :  { %4381 = vmatpush1.msra.mxu0 %v6902_v61 }
0x49af   :  { %4566 = vmatprep.subr.mxu0 %v6852_v53 }
0x4a5f   :  { %v4216_v23 = vpop.f32.mrf.mxu0 }
0x4a60   :  { %v4221_v11 = vadd.f32 %v4216_v23, %v3916_v12 }
0x4a61   :  { %v4218_v20 = vpop.f32.mrf.mxu0 }
0x4a62   :  { %v4974_v13 = vmul.f32 -1.442695, %v4221_v11  ;;  %v4222_v52 = vadd.f32 %v4218_v20, %v3918_v56 }
0x4a64   :  { %5814 = vpow2.f32 %v4974_v13  ;;  %v4975_v58 = vmul.f32 -1.442695, %v4222_v52 }
0x4a65   :  { %5816 = vtanh.f32 %v4222_v52  ;;  %v3928_v52 = vadd.f32 %v7011_v55, %v6952_v29 }
0x4a71   :  { %v5815_v24 = vpop.eup %5814 }
0x4a72   :  { %v4229_v10 = vadd.f32 1.0, %v5815_v24  ;;  %v5817_v26 = vpop.eup %5816 }
0x4a74   :  { %5818 = vrcp.f32 %v4229_v10 }
0x4a75   :  { %5820 = vpow2.f32 %v4975_v58 }
0x4a81   :  { %v5819_v15 = vpop.eup %5818 }
0x4a82   :  { %v4237_v57 = vmul.f32 %v5819_v15, %v5817_v26  ;;  %v5821_v16 = vpop.eup %5820  ;;  %v4236_v21 = vmul.f32 %v5819_v15, %v4142_v14 }
0x4a83   :  { %v4230_v41 = vadd.f32 1.0, %v5821_v16 }
0x4a84   :  { %4239 = vrot.lane.b32.xlu0 %v4237_v57, %s5936_s13  ;;  %v3930_v57 = vadd.f32 %v7013_v51, %v6957_v40 }
0x4a85   :  { %5822 = vrcp.f32 %v4230_v41 }
0x4a92   :  { %v5823_v30 = vpop.eup %5822 }
0x4af6   :  { %v4240_v37 = vpop.permute.xlu0 %4239 }
0x4af7   :  { %v4242_v38 = vadd.f32 %v4240_v37, %v4236_v21 }
0x4af9   :  { %5824 = vtanh.f32 %v4242_v38 }
0x4b06   :  { %v5825_v63 = vpop.eup %5824 }
0x4b07   :  { %v4244_v27 = vmul.f32 %v5825_v63, %v5823_v30 }
0x4b09   :  { %4246 = vrot.lane.b32.xlu1 %v4244_v27, %s5936_s13 }
0x4b7b   :  { %v4247_v43 = vpop.permute.xlu1 %4246 }
0x4b7c   :  { %4976 = vmatmul.mubr.msk.f32.vlgmr.msra.gmra.mxu1 %vm2987_vm4, %v4247_v43 }
0x4b7d   :  { %4467 = vmatpush1.msra.mxu1 %v6860_v5  ;;  %4514 = vmatprep.mubr.f32.mxu1 %v5934_v0 }
0x4b7e   :  { %4468 = vmatprep.subr.mxu1 %v6862_v1 }
0x4b7f   :  { %4469 = vmatpush1.msra.mxu1 %v6865_v6 }
0x4b80   :  { %4470 = vmatprep.subr.mxu1 %v6868_v36 }
0x4b81   :  { %4471 = vmatpush1.msra.mxu1 %v6871_v3 }
0x4b82   :  { %4472 = vmatprep.subr.mxu1 %v6874_v62 }
0x4b83   :  { %4473 = vmatpush1.msra.mxu1 %v6877_v4 }
0x4b84   :  { %4474 = vmatprep.subr.mxu1 %v6880_v7 }
0x4b85   :  { %4475 = vmatpush1.msra.mxu1 %v6883_v8 }
0x4b86   :  { %4476 = vmatprep.subr.mxu1 %v6886_v42 }
0x4b87   :  { %4477 = vmatpush1.msra.mxu1 %v6889_v28 }
0x4b88   :  { %4478 = vmatprep.subr.mxu1 %v6892_v54 }
0x4b89   :  { %4479 = vmatpush1.msra.mxu1 %v6895_v22 }
0x4b8a   :  { %4480 = vmatprep.subr.mxu1 %v6899_v18 }
0x4b8b   :  { %4481 = vmatpush1.msra.mxu1 %v6902_v61 }
0x4b8c   :  { %4666 = vmatprep.subr.mxu1 %v6852_v53 }
0x4c3c   :  { %v4316_v44 = vpop.f32.mrf.mxu1 }
0x4c3d   :  { %v4321_v46 = vadd.f32 %v4316_v44, %v3922_v32 }
0x4c3e   :  { %v4318_v60 = vpop.f32.mrf.mxu1 }
0x4c3f   :  { %v4977_v48 = vmul.f32 -1.442695, %v4321_v46  ;;  %v4322_v14 = vadd.f32 %v4318_v60, %v3924_v9 }
0x4c41   :  { %5826 = vpow2.f32 %v4977_v48  ;;  %v4978_v53 = vmul.f32 -1.442695, %v4322_v14 }
0x4c42   :  { %5828 = vtanh.f32 %v4322_v14 }
0x4c4e   :  { %v5827_v17 = vpop.eup %5826 }
0x4c4f   :  { %v4329_v33 = vadd.f32 1.0, %v5827_v17  ;;  %v5829_v49 = vpop.eup %5828 }
0x4c51   :  { %5830 = vrcp.f32 %v4329_v33 }
0x4c52   :  { %5832 = vpow2.f32 %v4978_v53 }
0x4c5e   :  { %v5831_v34 = vpop.eup %5830 }
0x4c5f   :  { %v4337_v45 = vmul.f32 %v5831_v34, %v5829_v49  ;;  %v5833_v50 = vpop.eup %5832  ;;  %v4336_v12 = vmul.f32 %v5831_v34, %v4242_v38  ;;  %v3940_v49 = vadd.f32 %v7019_v35, %v6952_v29 }
0x4c60   :  { %v4330_v39 = vadd.f32 1.0, %v5833_v50 }
0x4c61   :  { %4339 = vrot.lane.b32.xlu0 %v4337_v45, %s5936_s13 }
0x4c62   :  { %5834 = vrcp.f32 %v4330_v39  ;;  %v3942_v39 = vadd.f32 %v7021_v59, %v6957_v40 }
0x4c6f   :  { %v5835_v31 = vpop.eup %5834 }
0x4cd3   :  { %v4340_v23 = vpop.permute.xlu0 %4339 }
0x4cd4   :  { %v4342_v11 = vadd.f32 %v4340_v23, %v4336_v12 }
0x4cd6   :  { %5836 = vtanh.f32 %v4342_v11 }
0x4ce3   :  { %v5837_v13 = vpop.eup %5836 }
0x4ce4   :  { %v4344_v20 = vmul.f32 %v5837_v13, %v5835_v31 }
0x4ce6   :  { %4346 = vrot.lane.b32.xlu1 %v4344_v20, %s5936_s13 }
0x4d58   :  { %v4347_v56 = vpop.permute.xlu1 %4346 }
0x4d59   :  { %4979 = vmatmul.mubr.msk.f32.vlgmr.msra.gmra.mxu0 %vm2987_vm4, %v4347_v56 }
0x4d5a   :  { %4567 = vmatpush1.msra.mxu0 %v6860_v5  ;;  %4614 = vmatprep.mubr.f32.mxu0 %v5934_v0 }
0x4d5b   :  { %4568 = vmatprep.subr.mxu0 %v6862_v1 }
0x4d5c   :  { %4569 = vmatpush1.msra.mxu0 %v6865_v6 }
0x4d5d   :  { %4570 = vmatprep.subr.mxu0 %v6868_v36 }
0x4d5e   :  { %4571 = vmatpush1.msra.mxu0 %v6871_v3 }
0x4d5f   :  { %4572 = vmatprep.subr.mxu0 %v6874_v62 }
0x4d60   :  { %4573 = vmatpush1.msra.mxu0 %v6877_v4 }
0x4d61   :  { %4574 = vmatprep.subr.mxu0 %v6880_v7 }
0x4d62   :  { %4575 = vmatpush1.msra.mxu0 %v6883_v8 }
0x4d63   :  { %4576 = vmatprep.subr.mxu0 %v6886_v42 }
0x4d64   :  { %4577 = vmatpush1.msra.mxu0 %v6889_v28 }
0x4d65   :  { %4578 = vmatprep.subr.mxu0 %v6892_v54 }
0x4d66   :  { %4579 = vmatpush1.msra.mxu0 %v6895_v22 }
0x4d67   :  { %4580 = vmatprep.subr.mxu0 %v6899_v18 }
0x4d68   :  { %4581 = vmatpush1.msra.mxu0 %v6902_v61 }
0x4d69   :  { %5473 = vmatprep.subr.mxu0 %v5934_v0 }
0x4e19   :  { %v4416_v24 = vpop.f32.mrf.mxu0 }
0x4e1a   :  { %v4421_v10 = vadd.f32 %v4416_v24, %v3928_v52 }
0x4e1b   :  { %v4418_v15 = vpop.f32.mrf.mxu0 }
0x4e1c   :  { %v4980_v26 = vmul.f32 -1.442695, %v4421_v10  ;;  %v4422_v58 = vadd.f32 %v4418_v15, %v3930_v57 }
0x4e1e   :  { %5838 = vpow2.f32 %v4980_v26  ;;  %v4981_v30 = vmul.f32 -1.442695, %v4422_v58 }
0x4e1f   :  { %5840 = vtanh.f32 %v4422_v58 }
0x4e2b   :  { %v5839_v16 = vpop.eup %5838 }
0x4e2c   :  { %v4429_v41 = vadd.f32 1.0, %v5839_v16  ;;  %v5841_v21 = vpop.eup %5840  ;;  %v3946_v16 = vadd.f32 %v7023_v25, %v6952_v29  ;;  %v4751_v25 = vld [vmem:[%s7161_s4 + $0x30] sm:$0xff] }
0x4e2e   :  { %5842 = vrcp.f32 %v4429_v41 }
0x4e2f   :  { %5844 = vpow2.f32 %v4981_v30  ;;  %v3948_v30 = vadd.f32 %v7025_v2, %v6957_v40  ;;  %v4749_v2 = vld [vmem:[%s7161_s4 + $0x20] sm:$0xff] }
0x4e3b   :  { %v5843_v37 = vpop.eup %5842 }
0x4e3c   :  { %v4437_v38 = vmul.f32 %v5843_v37, %v5841_v21  ;;  %v5845_v55 = vpop.eup %5844  ;;  %v4436_v27 = vmul.f32 %v5843_v37, %v4342_v11 }
0x4e3d   :  { %v4430_v63 = vadd.f32 1.0, %v5845_v55 }
0x4e3e   :  { %4439 = vrot.lane.b32.xlu0 %v4437_v38, %s5936_s13 }
0x4e3f   :  { %5846 = vrcp.f32 %v4430_v63 }
0x4e4c   :  { %v5847_v51 = vpop.eup %5846 }
0x4eb0   :  { %v4440_v43 = vpop.permute.xlu0 %4439 }
0x4eb1   :  { %v4442_v32 = vadd.f32 %v4440_v43, %v4436_v27 }
0x4eb3   :  { %5848 = vtanh.f32 %v4442_v32 }
0x4ec0   :  { %v5849_v44 = vpop.eup %5848 }
0x4ec1   :  { %v4444_v46 = vmul.f32 %v5849_v44, %v5847_v51  ;;  %v4748_v44 = vld [vmem:[%s7161_s4 + $0x18] sm:$0xff] }
0x4ec3   :  { %4446 = vrot.lane.b32.xlu1 %v4444_v46, %s5936_s13  ;;  %v4747_v46 = vld [vmem:[%s7161_s4 + $0x10] sm:$0xff] }
0x4f35   :  { %v4447_v48 = vpop.permute.xlu1 %4446 }
0x4f36   :  { %4982 = vmatmul.mubr.msk.f32.vlgmr.msra.gmra.mxu1 %vm2987_vm4, %v4447_v48  ;;  %v4746_v48 = vld [vmem:[%s7161_s4 + $0x8] sm:$0xff] }
0x4f37   :  { %4667 = vmatpush1.msra.mxu1 %v6860_v5  ;;  %4714 = vmatprep.mubr.f32.mxu1 %v5934_v0  ;;  %v3934_v5 = vadd.f32 %v7015_v19, %v6952_v29  ;;  %v4752_v29 = vld [vmem:[%s7161_s4 + $0x38] sm:$0xff] }
0x4f38   :  { %4668 = vmatprep.subr.mxu1 %v6862_v1 }
0x4f39   :  { %4669 = vmatpush1.msra.mxu1 %v6865_v6 }
0x4f3a   :  { %4670 = vmatprep.subr.mxu1 %v6868_v36 }
0x4f3b   :  { %4671 = vmatpush1.msra.mxu1 %v6871_v3 }
0x4f3c   :  { %4672 = vmatprep.subr.mxu1 %v6874_v62  ;;  %v3936_v62 = vadd.f32 %v7017_v47, %v6957_v40  ;;  %v4750_v40 = vld [vmem:[%s7161_s4 + $0x28] sm:$0xff] }
0x4f3d   :  { %4673 = vmatpush1.msra.mxu1 %v6877_v4 }
0x4f3e   :  { %4674 = vmatprep.subr.mxu1 %v6880_v7 }
0x4f3f   :  { %4675 = vmatpush1.msra.mxu1 %v6883_v8 }
0x4f40   :  { %4676 = vmatprep.subr.mxu1 %v6886_v42 }
0x4f41   :  { %4677 = vmatpush1.msra.mxu1 %v6889_v28 }
0x4f42   :  { %4678 = vmatprep.subr.mxu1 %v6892_v54 }
0x4f43   :  { %4679 = vmatpush1.msra.mxu1 %v6895_v22 }
0x4f44   :  { %4680 = vmatprep.subr.mxu1 %v6899_v18 }
0x4f45   :  { %4681 = vmatpush1.msra.mxu1 %v6902_v61 }
0x4ff6   :  { %v4516_v1 = vpop.f32.mrf.mxu1 }
0x4ff7   :  { %v4521_v6 = vadd.f32 %v4516_v1, %v3934_v5  ;;  %v4745_v5 = vld [vmem:[%s7161_s4] sm:$0xff] }
0x4ff8   :  { %v4518_v3 = vpop.f32.mrf.mxu1 }
0x4ff9   :  { %v4983_v36 = vmul.f32 -1.442695, %v4521_v6  ;;  %v4522_v4 = vadd.f32 %v4518_v3, %v3936_v62 }
0x4ffb   :  { %5850 = vpow2.f32 %v4983_v36  ;;  %v4984_v22 = vmul.f32 -1.442695, %v4522_v4 }
0x4ffc   :  { %5852 = vtanh.f32 %v4522_v4 }
0x5008   :  { %v5851_v7 = vpop.eup %5850 }
0x5009   :  { %v4529_v8 = vadd.f32 1.0, %v5851_v7  ;;  %v5853_v42 = vpop.eup %5852 }
0x500b   :  { %5854 = vrcp.f32 %v4529_v8 }
0x500c   :  { %5856 = vpow2.f32 %v4984_v22 }
0x5018   :  { %v5855_v28 = vpop.eup %5854 }
0x5019   :  { %v4537_v54 = vmul.f32 %v5855_v28, %v5853_v42  ;;  %v5857_v18 = vpop.eup %5856  ;;  %v4536_v19 = vmul.f32 %v5855_v28, %v4442_v32 }
0x501a   :  { %v4530_v61 = vadd.f32 1.0, %v5857_v18 }
0x501b   :  { %4539 = vrot.lane.b32.xlu0 %v4537_v54, %s5936_s13 }
0x501c   :  { %5858 = vrcp.f32 %v4530_v61 }
0x5029   :  { %v5859_v47 = vpop.eup %5858 }
0x508d   :  { %v4540_v60 = vpop.permute.xlu0 %4539 }
0x508e   :  { %v4542_v9 = vadd.f32 %v4540_v60, %v4536_v19 }
0x5090   :  { %5860 = vtanh.f32 %v4542_v9 }
0x509d   :  { %v5861_v14 = vpop.eup %5860 }
0x509e   :  { %v4544_v17 = vmul.f32 %v5861_v14, %v5859_v47 }
0x50a0   :  { %4546 = vrot.lane.b32.xlu1 %v4544_v17, %s5936_s13 }
0x5112   :  { %v4547_v33 = vpop.permute.xlu1 %4546 }
0x5113   :  { %4985 = vmatmul.mubr.msk.f32.vlgmr.msra.gmra.mxu0 %vm2987_vm4, %v4547_v33 }
0x5114   :  { %5489 = vmatprep.mubr.msk.f32.mxu0 %vm5935_vm0, %v5934_v0  ;;  %5474 = vmatpush3.msra.mxu0 %v4752_v29 }
0x5115   :  { %5475 = vmatprep.subr.mxu0 %v5934_v0 }
0x5116   :  { %5476 = vmatpush3.msra.mxu0 %v4751_v25 }
0x5117   :  { %5477 = vmatprep.subr.mxu0 %v5934_v0 }
0x5118   :  { %5478 = vmatpush3.msra.mxu0 %v4750_v40 }
0x5119   :  { %5479 = vmatprep.subr.mxu0 %v5934_v0 }
0x511a   :  { %5480 = vmatpush3.msra.mxu0 %v4749_v2 }
0x511b   :  { %5481 = vmatprep.subr.mxu0 %v5934_v0 }
0x511c   :  { %5482 = vmatpush3.msra.mxu0 %v4748_v44 }
0x511d   :  { %5483 = vmatprep.subr.mxu0 %v5934_v0 }
0x511e   :  { %5484 = vmatpush3.msra.mxu0 %v4747_v46 }
0x511f   :  { %5485 = vmatprep.subr.mxu0 %v5934_v0 }
0x5120   :  { %5486 = vmatpush3.msra.mxu0 %v4746_v48 }
0x5121   :  { %5487 = vmatprep.subr.mxu0 %v5934_v0  ;;  %v4991_v0 = vld [vmem:[%s7162_s5] ss:$0 sm:$0xff] }
0x5122   :  { %5488 = vmatpush3.msra.mxu0 %v4745_v5 }
0x51d3   :  { %v4616_v34 = vpop.f32.mrf.mxu0 }
0x51d4   :  { %v4621_v45 = vadd.f32 %v4616_v34, %v3940_v49 }
0x51d5   :  { %v4618_v50 = vpop.f32.mrf.mxu0 }
0x51d6   :  { %v4986_v53 = vmul.f32 -1.442695, %v4621_v45  ;;  %v4622_v12 = vadd.f32 %v4618_v50, %v3942_v39 }
0x51d8   :  { %5862 = vpow2.f32 %v4986_v53  ;;  %v4987_v56 = vmul.f32 -1.442695, %v4622_v12 }
0x51d9   :  { %5864 = vtanh.f32 %v4622_v12 }
0x51e5   :  { %v5863_v23 = vpop.eup %5862 }
0x51e6   :  { %v4629_v11 = vadd.f32 1.0, %v5863_v23  ;;  %v5865_v31 = vpop.eup %5864 }
0x51e8   :  { %5866 = vrcp.f32 %v4629_v11 }
0x51e9   :  { %5868 = vpow2.f32 %v4987_v56 }
0x51f5   :  { %v5867_v13 = vpop.eup %5866 }
0x51f6   :  { %v4637_v20 = vmul.f32 %v5867_v13, %v5865_v31  ;;  %v5869_v35 = vpop.eup %5868  ;;  %v4636_v24 = vmul.f32 %v5867_v13, %v4542_v9 }
0x51f7   :  { %v4630_v52 = vadd.f32 1.0, %v5869_v35 }
0x51f8   :  { %4639 = vrot.lane.b32.xlu0 %v4637_v20, %s5936_s13 }
0x51f9   :  { %5870 = vrcp.f32 %v4630_v52 }
0x5206   :  { %v5871_v59 = vpop.eup %5870 }
0x526a   :  { %v4640_v10 = vpop.permute.xlu0 %4639 }
0x526b   :  { %v4642_v26 = vadd.f32 %v4640_v10, %v4636_v24 }
0x526d   :  { %5872 = vtanh.f32 %v4642_v26 }
0x527a   :  { %v5873_v15 = vpop.eup %5872 }
0x527b   :  { %v4644_v57 = vmul.f32 %v5873_v15, %v5871_v59 }
0x527d   :  { %4646 = vrot.lane.b32.xlu1 %v4644_v57, %s5936_s13 }
0x52ef   :  { %v4647_v58 = vpop.permute.xlu1 %4646 }
0x52f0   :  { %4988 = vmatmul.mubr.msk.f32.vlgmr.msra.gmra.mxu1 %vm2987_vm4, %v4647_v58 }
0x53b0   :  { %v4716_v41 = vpop.f32.mrf.mxu1 }
0x53b1   :  { %v4721_v21 = vadd.f32 %v4716_v41, %v3946_v16 }
0x53b2   :  { %v4718_v38 = vpop.f32.mrf.mxu1 }
0x53b3   :  { %v4989_v37 = vmul.f32 -1.442695, %v4721_v21  ;;  %v4722_v55 = vadd.f32 %v4718_v38, %v3948_v30 }
0x53b5   :  { %5874 = vpow2.f32 %v4989_v37  ;;  %v4990_v1 = vmul.f32 -1.442695, %v4722_v55 }
0x53b6   :  { %5876 = vtanh.f32 %v4722_v55 }
0x53c2   :  { %v5875_v63 = vpop.eup %5874 }
0x53c3   :  { %v4729_v27 = vadd.f32 1.0, %v5875_v63  ;;  %v5877_v43 = vpop.eup %5876 }
0x53c5   :  { %5878 = vrcp.f32 %v4729_v27 }
0x53c6   :  { %5880 = vpow2.f32 %v4990_v1 }
0x53d2   :  { %v5879_v32 = vpop.eup %5878 }
0x53d3   :  { %v4737_v51 = vmul.f32 %v5879_v32, %v5877_v43  ;;  %v5881_v6 = vpop.eup %5880  ;;  %v4736_v3 = vmul.f32 %v5879_v32, %v4642_v26 }
0x53d4   :  { %v4730_v36 = vadd.f32 1.0, %v5881_v6 }
0x53d5   :  { %4739 = vrot.lane.b32.xlu0 %v4737_v51, %s5936_s13 }
0x53d6   :  { %5882 = vrcp.f32 %v4730_v36 }
0x53e3   :  { %v5883_v7 = vpop.eup %5882 }
0x5447   :  { %v4740_v62 = vpop.permute.xlu0 %4739 }
0x5448   :  { %v4742_v4 = vadd.f32 %v4740_v62, %v4736_v3 }
0x544a   :  { %5884 = vtanh.f32 %v4742_v4 }
0x5457   :  { %v5885_v8 = vpop.eup %5884 }
0x5458   :  { %v4744_v42 = vmul.f32 %v5885_v8, %v5883_v7 }
0x545a   :  { %4761 = vrot.lane.b32.xlu1 %v4744_v42, %s5936_s13  ;;  %s5939_s13 = smov 124  }
0x54cc   :  { %v4762_v28 = vpop.permute.xlu1 %4761 }
0x54cd   :  { %5490 = vmatmul.mubr.msk.f32.vlgmr.msra.gmra.mxu0 %vm2987_vm4, %v4762_v28 }
0x558d   :  { %v4831_v54 = vpop.f32.mrf.mxu0 }
0x558e   :  { %v4832_v22 = vadd.f32 %v4991_v0, %v4831_v54 }
0x558f   :  { %v5491_v18 = vpop.f32.mrf.mxu0 }
0x5590   :  { %4836 = vrot.lane.b32.xlu1 %v4832_v22, %s5938_s25  ;;  %v4840_v61 = vsel %vm65_vm2, %v4832_v22, 0.0 }
0x5591   :  { %4841 = vadd.xlane.f32.xlu0 %v4840_v61 }
0x5602   :  { %v4837_v19 = vpop.permute.xlu1 %4836 }
0x5603   :  { %v4839_v9 = vadd.f32 %v4837_v19, %v4832_v22 }
0x561a   :  { %v4842_v60 = vpop.xlane.xlu0 %4841 }
0x561b   :  { %v4844_v47 = vmul.f32 0.25, %v4842_v60 }
0x561d   :  { %v4845_v14 = vsub.f32 %v4839_v9, %v4844_v47 }
0x561f   :  { %4847 = vrot.lane.b32.xlu1 %v4845_v14, %s5939_s13 }
0x5691   :  { %v4848_v17 = vpop.permute.xlu1 %4847 }
0x5692   :  { %4850 = vst.msk [vmem:[%s7163_s6] sm:$0xff] %vm65_vm2, %v4848_v17 }
0x5693   :  { %4855 = vsyncpa [#allocation3], 1 }
0x5694   :  { %4856 = vsyncpa [#allocation5], 1 }

</bundles_post_ra>
